<compile_context>
chip_gen: v5e
topology: v5e:2x2
jax: 0.10.0
libtpu: 0.0.40
codegen_flags: <defaults>
</compile_context>

<pallas_src>
import functools

import jax
import jax.numpy as jnp
import numpy as np
from jax import lax
from jax.experimental import pallas as pl
from jax.experimental.pallas import tpu as pltpu

LRELU_SLOPE = 0.1
_SUBLANE = 8        # f32 sublane tile (bias slab / channel padding)
_W_ROW_ALIGN = 16   # bf16 sublane tile (weight slab row alignment)
_LANES = 128        # lane tile (time axis padding)

MODEL_CONFIG = dict(
    c_spec=16,             # spectrogram channels (multiple of 8 here)
    hidden=32,             # conv_pre output channels
    pre_kernel=7,
    post_kernel=7,
    ups=((2, 4), (2, 4)),  # (stride, kernel) per upsample stage
    res_kernel=3,
    res_dilations=(1, 3),
    num_resblocks=2,
)


def _ceil_to(v, m):
    return (v + m - 1) // m * m


def _upsampled_length(t, cfg):
    for (stride, ku) in cfg["ups"]:
        pad = (ku - stride) // 2
        t = (t - 1) * stride - 2 * pad + ku
    return t


# ----------------------------------------------------------------------------
# In-kernel math (phase-major, channel-major, lane-dense)
# ----------------------------------------------------------------------------
def _leaky_relu(x):
    return jnp.where(x > 0, x, LRELU_SLOPE * x)


def _mm(a, b):
    """MXU matmul: bf16 operands, f32 accumulation."""
    return jnp.dot(a.astype(jnp.bfloat16), b.astype(jnp.bfloat16),
                   preferred_element_type=jnp.float32)


def _tap(x, off, t_valid):
    """tap[:, u] = x[:, u + off] for 0 <= u + off < t_valid, else 0.

    Pure data movement: one XLU lane roll + a boundary mask (VPU).  No matmul,
    no unaligned lane pads/concats.  The mask also neutralises roll wrap-around
    and any garbage living in the lane-padding columns >= t_valid.
    """
    t_lanes = x.shape[1]
    if off == 0:
        return x            # valid output columns read x[u] directly
    rolled = pltpu.roll(x, (-off) % t_lanes, axis=1)
    lane = lax.broadcasted_iota(jnp.int32, (1, t_lanes), 1)
    valid = jnp.logical_and(lane + off >= 0, lane + off < t_valid)
    return jnp.where(valid, rolled, 0.0)


def _get_w(w_src, e):
    """Point-of-use weight load: static slice of the bf16 weight slab."""
    return w_src[e["w_off"]:e["w_off"] + e["rows"], 0:e["cols"]]


def _get_b(b_src, e):
    return b_src[e["b_off"]:e["b_off"] + e["rows"], 0:1]


def _phase_conv(phases, w2, b, *, kernel, dilation, t_valid):
    """'Same'-padded Conv1d on a phase-major signal.

    phases: list of P arrays (Cin, T_lanes); full-rate signal is
            v[:, P*u + r] = phases[r][:, u].
    w2:     (Cout, kernel*Cin) flattened weight (shared by all output phases).
    All P per-phase matmuls are fused along the lane axis into one matmul.
    Returns the P output phases, each (Cout, T_lanes) f32.
    """
    n_ph = len(phases)
    t_lanes = phases[0].shape[1]
    p_pad = (kernel - 1) // 2 * dilation
    stacks = []
    for r in range(n_ph):
        taps = []
        for k in range(kernel):
            delta = r + k * dilation - p_pad          # full-rate offset
            taps.append(_tap(phases[delta % n_ph], delta // n_ph, t_valid))
        stacks.append(jnp.concatenate(taps, axis=0))  # (K*Cin, T_lanes)
    y = _mm(w2, jnp.concatenate(stacks, axis=1)) + b  # (Cout, P*T_lanes)
    return [y[:, r * t_lanes:(r + 1) * t_lanes] for r in range(n_ph)]


def _predictor_math(spec_ct, ef0_row, w_src, b_src, plan, cfg, t_valid):
    """Channel-major, phase-major HiFi-GAN generator."""
    # ---- input assembly: channels = [spec | f0 | zero pad] ------------------
    n_extra = plan["c_in_pad"] - cfg["c_spec"]
    rows = lax.broadcasted_iota(jnp.int32, (n_extra, 1), 0)
    f0_block = jnp.where(rows == 0, ef0_row, 0.0)
    x0 = jnp.concatenate([spec_ct, f0_block], axis=0)    # (c_in_pad, T_lanes)

    # ---- conv_pre ------------------------------------------------------------
    e = plan["conv_pre"]
    phases = _phase_conv([x0], _get_w(w_src, e), _get_b(b_src, e),
                         kernel=cfg["pre_kernel"], dilation=1, t_valid=t_valid)

    # ---- upsample stages (polyphase ConvTranspose) + MRF res-blocks ----------
    for stage in plan["ups"]:
        act = [_leaky_relu(p) for p in phases]
        ups = []
        for e, taps in zip(stage["phases"], stage["taps"]):
            stack = jnp.concatenate(
                [_tap(act[s], off, t_valid) for (s, off) in taps], axis=0)
            ups.append(_mm(_get_w(w_src, e), stack) + _get_b(b_src, e))
        phases = ups                                     # p_out phases

        acc = None
        for block in stage["res"]:
            xr = phases
            for e, dil in zip(block, cfg["res_dilations"]):
                cv = _phase_conv([_leaky_relu(p) for p in xr],
                                 _get_w(w_src, e), _get_b(b_src, e),
                                 kernel=cfg["res_kernel"], dilation=dil,
                                 t_valid=t_valid)
                xr = [a + c for a, c in zip(xr, cv)]     # residual add (f32)
            acc = xr if acc is None else [a + c for a, c in zip(acc, xr)]
        inv = 1.0 / cfg["num_resblocks"]
        phases = [p * inv for p in acc]                  # MRF average

    # ---- conv_post + tanh -----------------------------------------------------
    e = plan["conv_post"]
    outs = _phase_conv([_leaky_relu(p) for p in phases],
                       _get_w(w_src, e), _get_b(b_src, e),
                       kernel=cfg["post_kernel"], dilation=1, t_valid=t_valid)
    return jnp.tanh(jnp.concatenate(outs, axis=0))       # (P_final, T_lanes)


def _wrapper_math(spec_ct, f0_row, w_src, b_src, plan, cfg, t_valid):
    """WrapperHifiGanForwarder.forward on channel-major inputs."""
    # ef0 = f0.clone(); ef0[ef0 > 0] = exp(ef0[ef0 > 0])
    pos = f0_row > 0
    ef0 = jnp.where(pos, jnp.exp(jnp.where(pos, f0_row, 0.0)), f0_row)
    return _predictor_math(spec_ct, ef0, w_src, b_src, plan, cfg, t_valid)


def _fused_kernel(spec_ref, f0_ref, w_ref, b_ref, out_ref, *, plan, cfg,
                  t_valid):
    out_ref[...] = _wrapper_math(spec_ref[...], f0_ref[...], w_ref, b_ref,
                                 plan, cfg, t_valid)


# ----------------------------------------------------------------------------
# Wrapper (single fused launch, lane-dense I/O)
# ----------------------------------------------------------------------------
def _estimate_cost(plan, cfg, t_lanes, bytes_accessed):
    def cf(e, n_phase_cols):
        return 2 * e["rows"] * e["cols"] * n_phase_cols * t_lanes
    flops = cf(plan["conv_pre"], 1)
    n_ph = 1
    for stage, (stride, _ku) in zip(plan["ups"], cfg["ups"]):
        n_ph *= stride
        for e in stage["phases"]:
            flops += cf(e, 1)
        for block in stage["res"]:
            for e in block:
                flops += cf(e, n_ph)
    flops += cf(plan["conv_post"], n_ph)
    transcendentals = (1 + n_ph) * t_lanes               # exp(f0) + tanh(wave)
    return pl.CostEstimate(flops=int(flops), transcendentals=int(transcendentals),
                           bytes_accessed=int(bytes_accessed))


def wrapper_forward_pallas(spec, f0, w_slab, b_slab, plan, cfg):
    """spec: (T, C_spec) f32, f0: (T, 1) f32 -> wave: (upsampled T,) f32."""
    t = spec.shape[0]
    n_ph = plan["n_phases_out"]
    assert _upsampled_length(t, cfg) == n_ph * t
    t_lanes = _ceil_to(t, _LANES)
    # Layout plumbing only (outside the kernel): channel-major, lane-dense.
    spec_ct = jnp.pad(spec.T, ((0, 0), (0, t_lanes - t)))
    f0_row = jnp.pad(f0.reshape(1, t), ((0, 0), (0, t_lanes - t)))

    kernel = functools.partial(_fused_kernel, plan=plan, cfg=cfg, t_valid=t)
    vmem = pl.BlockSpec(memory_space=pltpu.MemorySpace.VMEM)
    bytes_accessed = (spec_ct.size * 4 + f0_row.size * 4 + w_slab.size * 2
                      + b_slab.size * 4 + n_ph * t_lanes * 4)
    out = pl.pallas_call(
        kernel,
        out_shape=jax.ShapeDtypeStruct((n_ph, t_lanes), jnp.float32),
        in_specs=[vmem] * 4,
        out_specs=vmem,
        compiler_params=pltpu.CompilerParams(
            vmem_limit_bytes=48 * 1024 * 1024),
        cost_estimate=_estimate_cost(plan, cfg, t_lanes, bytes_accessed),
    )(spec_ct, f0_row, w_slab, b_slab)
    # out[r, u] = wave[n_ph*u + r] -> de-interleave outside the kernel (cheap).
    return out[:, :t].T.reshape(-1)


# ----------------------------------------------------------------------------
# Synthetic HifiGanPredictor parameters (PyTorch layouts) + one-time re-layout
# ----------------------------------------------------------------------------
def init_params(key, cfg):
    keys = iter(jax.random.split(key, 64))

    def nrm(shape):
        return jax.random.normal(next(keys), shape, jnp.float32) * 0.1

    h = cfg["hidden"]
    params = {
        "conv_pre_w": nrm((cfg["pre_kernel"], cfg["c_spec"] + 1, h)),  # [K,Ci,Co]
        "conv_pre_b": nrm((h,)),
        "ups": [],
    }
    cin = h
    for (_stride, ku) in cfg["ups"]:
        cout = cin // 2
        params["ups"].append({
            "up_w": nrm((cin, cout, ku)),    # PyTorch ConvTranspose1d [Ci,Co,K]
            "up_b": nrm((cout,)),
            "res": [
                [(nrm((cfg["res_kernel"], cout, cout)), nrm((cout,)))
                 for _ in cfg["res_dilations"]]
                for _ in range(cfg["num_resblocks"])
            ],
        })
        cin = cout
    params["conv_post_w"] = nrm((cfg["post_kernel"], cin, 1))
    params["conv_post_b"] = nrm((1,))
    return params


def _flatten_conv_w(w_kio, cin_pad=None):
    """[K, Cin, Cout] -> (Cout, K*Cin_pad) with
    w2[co, k*Cin_pad + ci] = w[k, ci, co] (zero for padded channels)."""
    k, cin, cout = w_kio.shape
    cin_pad = cin if cin_pad is None else cin_pad
    if cin_pad != cin:
        w_kio = jnp.pad(w_kio, ((0, 0), (0, cin_pad - cin), (0, 0)))
    return jnp.transpose(w_kio, (2, 0, 1)).reshape(cout, k * cin_pad)


def _convT_phase_taps(p_in, stride, ku, pad):
    """Polyphase decomposition of ConvTranspose1d(stride) applied to a p_in-
    phase input: for each of the p_in*stride output phases, the list of
    (input_phase, time_offset, weight_tap_k) that contribute.
    Derivation: output index j = m*stride + k - pad; j = p_out*u + r and
    m = p_in*v + s give v = u - (s*stride + k - pad - r)/p_out."""
    p_out = p_in * stride
    meta = []
    for r in range(p_out):
        taps = []
        for s in range(p_in):
            for k in range(ku):
                num = s * stride + k - pad - r
                if num % p_out == 0:
                    taps.append((s, -(num // p_out), k))
        assert taps, "degenerate polyphase decomposition"
        meta.append(taps)
    return meta


def _flatten_convT_phase(w_pt, taps):
    """PyTorch ConvTranspose1d weight [Cin, Cout, K] -> per-output-phase
    (Cout, n_taps*Cin) matrix matching the tap order of _convT_phase_taps."""
    cols = [jnp.transpose(w_pt[:, :, k]) for (_s, _off, k) in taps]
    return jnp.concatenate(cols, axis=1)


def prepare_params(params, cfg):
    """One-time re-layout: flatten every conv (im2col / polyphase), pack all
    weights into ONE bf16 slab and all biases into ONE f32 slab, and build a
    static plan (slab offsets + polyphase tap metadata) for the kernel."""
    assert cfg["c_spec"] % _SUBLANE == 0, "script assumes spec channels % 8 == 0"
    w_blocks, b_blocks = [], []

    def add(w2, b):
        entry = {"w_idx": len(w_blocks), "b_idx": len(b_blocks),
                 "rows": int(w2.shape[0]), "cols": int(w2.shape[1])}
        w_blocks.append(w2.astype(jnp.bfloat16))
        b_blocks.append(jnp.asarray(b, jnp.float32).reshape(-1, 1))
        return entry

    c_in_pad = _ceil_to(cfg["c_spec"] + 1, _SUBLANE)
    plan = {"c_in_pad": c_in_pad, "ups": []}
    plan["conv_pre"] = add(
        _flatten_conv_w(params["conv_pre_w"], c_in_pad), params["conv_pre_b"])

    n_ph = 1
    for layer, (stride, ku) in zip(params["ups"], cfg["ups"]):
        pad_t = (ku - stride) // 2
        # Exact integer upsampling keeps every phase the same lane length.
        assert ku == stride + 2 * pad_t
        taps_meta = _convT_phase_taps(n_ph, stride, ku, pad_t)
        n_ph *= stride
        stage = {
            "taps": [[(s, off) for (s, off, _k) in taps_meta[r]]
                     for r in range(n_ph)],
            "phases": [add(_flatten_convT_phase(layer["up_w"], taps_meta[r]),
                           layer["up_b"]) for r in range(n_ph)],
            "res": [[add(_flatten_conv_w(w), b) for (w, b) in block]
                    for block in layer["res"]],
        }
        plan["ups"].append(stage)
    plan["conv_post"] = add(_flatten_conv_w(params["conv_post_w"]),
                            params["conv_post_b"])
    plan["n_phases_out"] = n_ph

    # ---- pack into two slabs (fewer inputs -> fewer DMA descriptors) --------
    w_cols = _ceil_to(max(blk.shape[1] for blk in w_blocks), _LANES)
    w_offs, off = [], 0
    for blk in w_blocks:
        w_offs.append(off)
        off += _ceil_to(blk.shape[0], _W_ROW_ALIGN)
    w_slab = jnp.zeros((_ceil_to(off, _W_ROW_ALIGN), w_cols), jnp.bfloat16)
    for o, blk in zip(w_offs, w_blocks):
        w_slab = w_slab.at[o:o + blk.shape[0], :blk.shape[1]].set(blk)

    b_offs, off = [], 0
    for blk in b_blocks:
        b_offs.append(off)
        off += _ceil_to(blk.shape[0], _SUBLANE)
    b_slab = jnp.zeros((_ceil_to(off, _SUBLANE), 1), jnp.float32)
    for o, blk in zip(b_offs, b_blocks):
        b_slab = b_slab.at[o:o + blk.shape[0], :].set(blk)

    def resolve(e):
        e["w_off"] = w_offs[e["w_idx"]]
        e["b_off"] = b_offs[e["b_idx"]]

    resolve(plan["conv_pre"])
    resolve(plan["conv_post"])
    for stage in plan["ups"]:
        for e in stage["phases"]:
            resolve(e)
        for block in stage["res"]:
            for e in block:
                resolve(e)
    return w_slab, b_slab, plan


# ----------------------------------------------------------------------------
# Independent reference: same module semantics via XLA convolutions
# (same bf16-operand / f32-accumulate quantization as the kernel)
# ----------------------------------------------------------------------------
def _ref_conv(x_nct, w_kio, b, *, dilation, pad):
    w_oik = jnp.transpose(w_kio, (2, 1, 0)).astype(jnp.bfloat16)
    y = lax.conv_general_dilated(
        x_nct.astype(jnp.bfloat16), w_oik, window_strides=(1,),
        padding=[(pad, pad)], rhs_dilation=(dilation,),
        dimension_numbers=("NCH", "OIH", "NCH"),
        preferred_element_type=jnp.float32)
    return y + b.reshape(1, -1, 1)


def _ref_convT(x_nct, w_pt, b, *, stride, pad):
    k = w_pt.shape[2]
    w_oik = jnp.flip(jnp.transpose(w_pt, (1, 0, 2)), axis=2).astype(jnp.bfloat16)
    y = lax.conv_general_dilated(
        x_nct.astype(jnp.bfloat16), w_oik, window_strides=(1,),
        padding=[(k - 1 - pad, k - 1 - pad)], lhs_dilation=(stride,),
        dimension_numbers=("NCH", "OIH", "NCH"),
        preferred_element_type=jnp.float32)
    return y + b.reshape(1, -1, 1)


def wrapper_forward_reference(params, spec, f0, cfg):
    pos = f0 > 0
    ef0 = jnp.where(pos, jnp.exp(jnp.where(pos, f0, 0.0)), f0)       # (T, 1)
    x = jnp.concatenate([spec.T[None], ef0.reshape(1, 1, -1)], axis=1)
    x = _ref_conv(x, params["conv_pre_w"], params["conv_pre_b"],
                  dilation=1, pad=(cfg["pre_kernel"] - 1) // 2)
    for layer, (stride, ku) in zip(params["ups"], cfg["ups"]):
        x = _ref_convT(_leaky_relu(x), layer["up_w"], layer["up_b"],
                       stride=stride, pad=(ku - stride) // 2)
        xs = None
        for block in layer["res"]:
            xr = x
            for (w, b), d in zip(block, cfg["res_dilations"]):
                xr = xr + _ref_conv(_leaky_relu(xr), w, b, dilation=d,
                                    pad=(cfg["res_kernel"] - 1) // 2 * d)
            xs = xr if xs is None else xs + xr
        x = xs / cfg["num_resblocks"]
    x = _ref_conv(_leaky_relu(x), params["conv_post_w"], params["conv_post_b"],
                  dilation=1, pad=(cfg["post_kernel"] - 1) // 2)
    return jnp.tanh(x)[0, 0]


# ----------------------------------------------------------------------------
if __name__ == "__main__":
    cfg = MODEL_CONFIG
    T = 8

    key = jax.random.PRNGKey(0)
    k_spec, k_f0, k_par = jax.random.split(key, 3)
    spec = jax.random.normal(k_spec, (T, cfg["c_spec"]), jnp.float32)
    f0 = jax.random.normal(k_f0, (T, 1), jnp.float32) * 2.0   # mixed sign

    params = init_params(k_par, cfg)
    w_slab, b_slab, plan = prepare_params(params, cfg)   # one-time re-layout

    fwd = jax.jit(functools.partial(wrapper_forward_pallas, plan=plan, cfg=cfg))
    wave = jax.block_until_ready(fwd(spec, f0, w_slab, b_slab))

    wave_ref = jax.block_until_ready(
        wrapper_forward_reference(params, spec, f0, cfg))

    t_out = _upsampled_length(T, cfg)
    assert wave.shape == (t_out,), wave.shape
    np.testing.assert_allclose(np.asarray(wave), np.asarray(wave_ref),
                               rtol=1e-2, atol=1e-2)
    print("KERNEL_OK")
</pallas_src>

<mosaic_0001>
module attributes {stable_mosaic.version = 11 : i64} {
  func.func @_fused_kernel(%arg0: memref<16x128xf32, #tpu.memory_space<vmem>>, %arg1: memref<1x128xf32, #tpu.memory_space<vmem>>, %arg2: memref<272x256xbf16, #tpu.memory_space<vmem>>, %arg3: memref<200x1xf32, #tpu.memory_space<vmem>>, %arg4: memref<4x128xf32, #tpu.memory_space<vmem>>) attributes {dimension_semantics = [], scalar_prefetch = 0 : i64, scratch_operands = 0 : i64, tpu.core_type = #tpu.core_type<tc>} {
    %c0 = arith.constant 0 : index
    %c0_0 = arith.constant 0 : index
    %0 = vector.load %arg0[%c0, %c0_0] : memref<16x128xf32, #tpu.memory_space<vmem>>, vector<16x128xf32>
    %c0_1 = arith.constant 0 : index
    %c0_2 = arith.constant 0 : index
    %1 = vector.load %arg1[%c0_1, %c0_2] : memref<1x128xf32, #tpu.memory_space<vmem>>, vector<1x128xf32>
    %cst = arith.constant 0.000000e+00 : f32
    %2 = vector.broadcast %cst : f32 to vector<1x128xf32>
    %3 = arith.cmpf ogt, %1, %2 : vector<1x128xf32>
    %cst_3 = arith.constant 0.000000e+00 : f32
    %4 = vector.broadcast %cst_3 : f32 to vector<1x128xf32>
    %5 = arith.select %3, %1, %4 : vector<1x128xi1>, vector<1x128xf32>
    %6 = math.exp %5 : vector<1x128xf32>
    %7 = arith.select %3, %6, %1 : vector<1x128xi1>, vector<1x128xf32>
    %8 = tpu.iota {dimensions = array<i32: 0>} : vector<8x1xi32>
    %c0_i32 = arith.constant 0 : i32
    %9 = vector.broadcast %c0_i32 : i32 to vector<8x1xi32>
    %10 = arith.cmpi eq, %8, %9 : vector<8x1xi32>
    %cst_4 = arith.constant 0.000000e+00 : f32
    %11 = vector.shape_cast %10 : vector<8x1xi1> to vector<8x1xi1>
    %12 = vector.broadcast %11 : vector<8x1xi1> to vector<8x128xi1>
    %13 = vector.shape_cast %7 : vector<1x128xf32> to vector<1x128xf32>
    %14 = vector.broadcast %13 : vector<1x128xf32> to vector<8x128xf32>
    %15 = vector.broadcast %cst_4 : f32 to vector<8x128xf32>
    %16 = arith.select %12, %14, %15 : vector<8x128xi1>, vector<8x128xf32>
    %17 = tpu.concatenate %0, %16 in 0 : vector<16x128xf32>, vector<8x128xf32> -> vector<24x128xf32>
    %c0_5 = arith.constant 0 : index
    %c0_6 = arith.constant 0 : index
    %18 = vector.load %arg2[%c0_5, %c0_6] : memref<272x256xbf16, #tpu.memory_space<vmem>>, vector<32x168xbf16>
    %c0_7 = arith.constant 0 : index
    %c0_8 = arith.constant 0 : index
    %19 = vector.load %arg3[%c0_7, %c0_8] : memref<200x1xf32, #tpu.memory_space<vmem>>, vector<32x1xf32>
    %c3_i32 = arith.constant 3 : i32
    %20 = tpu.dynamic_rotate %17 by %c3_i32 dim 1 : vector<24x128xf32>, i32 -> vector<24x128xf32>
    %21 = tpu.iota {dimensions = array<i32: 1>} : vector<1x128xi32>
    %c-3_i32 = arith.constant -3 : i32
    %22 = vector.broadcast %c-3_i32 : i32 to vector<1x128xi32>
    %23 = arith.addi %21, %22 : vector<1x128xi32>
    %c0_i32_9 = arith.constant 0 : i32
    %24 = vector.broadcast %c0_i32_9 : i32 to vector<1x128xi32>
    %25 = arith.cmpi sge, %23, %24 : vector<1x128xi32>
    %c-3_i32_10 = arith.constant -3 : i32
    %26 = vector.broadcast %c-3_i32_10 : i32 to vector<1x128xi32>
    %27 = arith.addi %21, %26 : vector<1x128xi32>
    %c8_i32 = arith.constant 8 : i32
    %28 = vector.broadcast %c8_i32 : i32 to vector<1x128xi32>
    %29 = arith.cmpi slt, %27, %28 : vector<1x128xi32>
    %30 = arith.andi %25, %29 : vector<1x128xi1>
    %cst_11 = arith.constant 0.000000e+00 : f32
    %31 = vector.shape_cast %30 : vector<1x128xi1> to vector<1x128xi1>
    %32 = vector.broadcast %31 : vector<1x128xi1> to vector<24x128xi1>
    %33 = vector.broadcast %cst_11 : f32 to vector<24x128xf32>
    %34 = arith.select %32, %20, %33 : vector<24x128xi1>, vector<24x128xf32>
    %c2_i32 = arith.constant 2 : i32
    %35 = tpu.dynamic_rotate %17 by %c2_i32 dim 1 : vector<24x128xf32>, i32 -> vector<24x128xf32>
    %36 = tpu.iota {dimensions = array<i32: 1>} : vector<1x128xi32>
    %c-2_i32 = arith.constant -2 : i32
    %37 = vector.broadcast %c-2_i32 : i32 to vector<1x128xi32>
    %38 = arith.addi %36, %37 : vector<1x128xi32>
    %c0_i32_12 = arith.constant 0 : i32
    %39 = vector.broadcast %c0_i32_12 : i32 to vector<1x128xi32>
    %40 = arith.cmpi sge, %38, %39 : vector<1x128xi32>
    %c-2_i32_13 = arith.constant -2 : i32
    %41 = vector.broadcast %c-2_i32_13 : i32 to vector<1x128xi32>
    %42 = arith.addi %36, %41 : vector<1x128xi32>
    %c8_i32_14 = arith.constant 8 : i32
    %43 = vector.broadcast %c8_i32_14 : i32 to vector<1x128xi32>
    %44 = arith.cmpi slt, %42, %43 : vector<1x128xi32>
    %45 = arith.andi %40, %44 : vector<1x128xi1>
    %cst_15 = arith.constant 0.000000e+00 : f32
    %46 = vector.shape_cast %45 : vector<1x128xi1> to vector<1x128xi1>
    %47 = vector.broadcast %46 : vector<1x128xi1> to vector<24x128xi1>
    %48 = vector.broadcast %cst_15 : f32 to vector<24x128xf32>
    %49 = arith.select %47, %35, %48 : vector<24x128xi1>, vector<24x128xf32>
    %c1_i32 = arith.constant 1 : i32
    %50 = tpu.dynamic_rotate %17 by %c1_i32 dim 1 : vector<24x128xf32>, i32 -> vector<24x128xf32>
    %51 = tpu.iota {dimensions = array<i32: 1>} : vector<1x128xi32>
    %c-1_i32 = arith.constant -1 : i32
    %52 = vector.broadcast %c-1_i32 : i32 to vector<1x128xi32>
    %53 = arith.addi %51, %52 : vector<1x128xi32>
    %c0_i32_16 = arith.constant 0 : i32
    %54 = vector.broadcast %c0_i32_16 : i32 to vector<1x128xi32>
    %55 = arith.cmpi sge, %53, %54 : vector<1x128xi32>
    %c-1_i32_17 = arith.constant -1 : i32
    %56 = vector.broadcast %c-1_i32_17 : i32 to vector<1x128xi32>
    %57 = arith.addi %51, %56 : vector<1x128xi32>
    %c8_i32_18 = arith.constant 8 : i32
    %58 = vector.broadcast %c8_i32_18 : i32 to vector<1x128xi32>
    %59 = arith.cmpi slt, %57, %58 : vector<1x128xi32>
    %60 = arith.andi %55, %59 : vector<1x128xi1>
    %cst_19 = arith.constant 0.000000e+00 : f32
    %61 = vector.shape_cast %60 : vector<1x128xi1> to vector<1x128xi1>
    %62 = vector.broadcast %61 : vector<1x128xi1> to vector<24x128xi1>
    %63 = vector.broadcast %cst_19 : f32 to vector<24x128xf32>
    %64 = arith.select %62, %50, %63 : vector<24x128xi1>, vector<24x128xf32>
    %c127_i32 = arith.constant 127 : i32
    %65 = tpu.dynamic_rotate %17 by %c127_i32 dim 1 : vector<24x128xf32>, i32 -> vector<24x128xf32>
    %66 = tpu.iota {dimensions = array<i32: 1>} : vector<1x128xi32>
    %c1_i32_20 = arith.constant 1 : i32
    %67 = vector.broadcast %c1_i32_20 : i32 to vector<1x128xi32>
    %68 = arith.addi %66, %67 : vector<1x128xi32>
    %c0_i32_21 = arith.constant 0 : i32
    %69 = vector.broadcast %c0_i32_21 : i32 to vector<1x128xi32>
    %70 = arith.cmpi sge, %68, %69 : vector<1x128xi32>
    %c1_i32_22 = arith.constant 1 : i32
    %71 = vector.broadcast %c1_i32_22 : i32 to vector<1x128xi32>
    %72 = arith.addi %66, %71 : vector<1x128xi32>
    %c8_i32_23 = arith.constant 8 : i32
    %73 = vector.broadcast %c8_i32_23 : i32 to vector<1x128xi32>
    %74 = arith.cmpi slt, %72, %73 : vector<1x128xi32>
    %75 = arith.andi %70, %74 : vector<1x128xi1>
    %cst_24 = arith.constant 0.000000e+00 : f32
    %76 = vector.shape_cast %75 : vector<1x128xi1> to vector<1x128xi1>
    %77 = vector.broadcast %76 : vector<1x128xi1> to vector<24x128xi1>
    %78 = vector.broadcast %cst_24 : f32 to vector<24x128xf32>
    %79 = arith.select %77, %65, %78 : vector<24x128xi1>, vector<24x128xf32>
    %c126_i32 = arith.constant 126 : i32
    %80 = tpu.dynamic_rotate %17 by %c126_i32 dim 1 : vector<24x128xf32>, i32 -> vector<24x128xf32>
    %81 = tpu.iota {dimensions = array<i32: 1>} : vector<1x128xi32>
    %c2_i32_25 = arith.constant 2 : i32
    %82 = vector.broadcast %c2_i32_25 : i32 to vector<1x128xi32>
    %83 = arith.addi %81, %82 : vector<1x128xi32>
    %c0_i32_26 = arith.constant 0 : i32
    %84 = vector.broadcast %c0_i32_26 : i32 to vector<1x128xi32>
    %85 = arith.cmpi sge, %83, %84 : vector<1x128xi32>
    %c2_i32_27 = arith.constant 2 : i32
    %86 = vector.broadcast %c2_i32_27 : i32 to vector<1x128xi32>
    %87 = arith.addi %81, %86 : vector<1x128xi32>
    %c8_i32_28 = arith.constant 8 : i32
    %88 = vector.broadcast %c8_i32_28 : i32 to vector<1x128xi32>
    %89 = arith.cmpi slt, %87, %88 : vector<1x128xi32>
    %90 = arith.andi %85, %89 : vector<1x128xi1>
    %cst_29 = arith.constant 0.000000e+00 : f32
    %91 = vector.shape_cast %90 : vector<1x128xi1> to vector<1x128xi1>
    %92 = vector.broadcast %91 : vector<1x128xi1> to vector<24x128xi1>
    %93 = vector.broadcast %cst_29 : f32 to vector<24x128xf32>
    %94 = arith.select %92, %80, %93 : vector<24x128xi1>, vector<24x128xf32>
    %c125_i32 = arith.constant 125 : i32
    %95 = tpu.dynamic_rotate %17 by %c125_i32 dim 1 : vector<24x128xf32>, i32 -> vector<24x128xf32>
    %96 = tpu.iota {dimensions = array<i32: 1>} : vector<1x128xi32>
    %c3_i32_30 = arith.constant 3 : i32
    %97 = vector.broadcast %c3_i32_30 : i32 to vector<1x128xi32>
    %98 = arith.addi %96, %97 : vector<1x128xi32>
    %c0_i32_31 = arith.constant 0 : i32
    %99 = vector.broadcast %c0_i32_31 : i32 to vector<1x128xi32>
    %100 = arith.cmpi sge, %98, %99 : vector<1x128xi32>
    %c3_i32_32 = arith.constant 3 : i32
    %101 = vector.broadcast %c3_i32_32 : i32 to vector<1x128xi32>
    %102 = arith.addi %96, %101 : vector<1x128xi32>
    %c8_i32_33 = arith.constant 8 : i32
    %103 = vector.broadcast %c8_i32_33 : i32 to vector<1x128xi32>
    %104 = arith.cmpi slt, %102, %103 : vector<1x128xi32>
    %105 = arith.andi %100, %104 : vector<1x128xi1>
    %cst_34 = arith.constant 0.000000e+00 : f32
    %106 = vector.shape_cast %105 : vector<1x128xi1> to vector<1x128xi1>
    %107 = vector.broadcast %106 : vector<1x128xi1> to vector<24x128xi1>
    %108 = vector.broadcast %cst_34 : f32 to vector<24x128xf32>
    %109 = arith.select %107, %95, %108 : vector<24x128xi1>, vector<24x128xf32>
    %110 = tpu.concatenate %34, %49, %64, %17, %79, %94, %109 in 0 : vector<24x128xf32>, vector<24x128xf32>, vector<24x128xf32>, vector<24x128xf32>, vector<24x128xf32>, vector<24x128xf32>, vector<24x128xf32> -> vector<168x128xf32>
    %111 = arith.truncf %110 : vector<168x128xf32> to vector<168x128xbf16>
    %cst_35 = arith.constant dense<0.000000e+00> : vector<32x128xf32>
    %112 = tpu.matmul %18, %111, %cst_35 {dimension_numbers = #tpu.dot_dimension_numbers<[1], [0], [0], [1], [0, 0, 1, 1], [], []>} : vector<32x168xbf16>, vector<168x128xbf16>, vector<32x128xf32> -> vector<32x128xf32>
    %113 = vector.broadcast %19 : vector<32x1xf32> to vector<32x128xf32>
    %114 = arith.addf %112, %113 : vector<32x128xf32>
    %cst_36 = arith.constant 0.000000e+00 : f32
    %115 = vector.broadcast %cst_36 : f32 to vector<32x128xf32>
    %116 = arith.cmpf ogt, %114, %115 : vector<32x128xf32>
    %cst_37 = arith.constant 1.000000e-01 : f32
    %117 = vector.broadcast %cst_37 : f32 to vector<32x128xf32>
    %118 = arith.mulf %117, %114 : vector<32x128xf32>
    %119 = arith.select %116, %114, %118 : vector<32x128xi1>, vector<32x128xf32>
    %c1_i32_38 = arith.constant 1 : i32
    %120 = tpu.dynamic_rotate %119 by %c1_i32_38 dim 1 : vector<32x128xf32>, i32 -> vector<32x128xf32>
    %121 = tpu.iota {dimensions = array<i32: 1>} : vector<1x128xi32>
    %c-1_i32_39 = arith.constant -1 : i32
    %122 = vector.broadcast %c-1_i32_39 : i32 to vector<1x128xi32>
    %123 = arith.addi %121, %122 : vector<1x128xi32>
    %c0_i32_40 = arith.constant 0 : i32
    %124 = vector.broadcast %c0_i32_40 : i32 to vector<1x128xi32>
    %125 = arith.cmpi sge, %123, %124 : vector<1x128xi32>
    %c-1_i32_41 = arith.constant -1 : i32
    %126 = vector.broadcast %c-1_i32_41 : i32 to vector<1x128xi32>
    %127 = arith.addi %121, %126 : vector<1x128xi32>
    %c8_i32_42 = arith.constant 8 : i32
    %128 = vector.broadcast %c8_i32_42 : i32 to vector<1x128xi32>
    %129 = arith.cmpi slt, %127, %128 : vector<1x128xi32>
    %130 = arith.andi %125, %129 : vector<1x128xi1>
    %cst_43 = arith.constant 0.000000e+00 : f32
    %131 = vector.shape_cast %130 : vector<1x128xi1> to vector<1x128xi1>
    %132 = vector.broadcast %131 : vector<1x128xi1> to vector<32x128xi1>
    %133 = vector.broadcast %cst_43 : f32 to vector<32x128xf32>
    %134 = arith.select %132, %120, %133 : vector<32x128xi1>, vector<32x128xf32>
    %135 = tpu.concatenate %119, %134 in 0 : vector<32x128xf32>, vector<32x128xf32> -> vector<64x128xf32>
    %c32 = arith.constant 32 : index
    %c0_44 = arith.constant 0 : index
    %136 = vector.load %arg2[%c32, %c0_44] : memref<272x256xbf16, #tpu.memory_space<vmem>>, vector<16x64xbf16>
    %137 = arith.truncf %135 : vector<64x128xf32> to vector<64x128xbf16>
    %cst_45 = arith.constant dense<0.000000e+00> : vector<16x128xf32>
    %138 = tpu.matmul %136, %137, %cst_45 {dimension_numbers = #tpu.dot_dimension_numbers<[1], [0], [0], [1], [0, 0, 1, 1], [], []>} : vector<16x64xbf16>, vector<64x128xbf16>, vector<16x128xf32> -> vector<16x128xf32>
    %c32_46 = arith.constant 32 : index
    %c0_47 = arith.constant 0 : index
    %139 = vector.load %arg3[%c32_46, %c0_47] : memref<200x1xf32, #tpu.memory_space<vmem>>, vector<16x1xf32>
    %140 = vector.broadcast %139 : vector<16x1xf32> to vector<16x128xf32>
    %141 = arith.addf %138, %140 : vector<16x128xf32>
    %c127_i32_48 = arith.constant 127 : i32
    %142 = tpu.dynamic_rotate %119 by %c127_i32_48 dim 1 : vector<32x128xf32>, i32 -> vector<32x128xf32>
    %143 = tpu.iota {dimensions = array<i32: 1>} : vector<1x128xi32>
    %c1_i32_49 = arith.constant 1 : i32
    %144 = vector.broadcast %c1_i32_49 : i32 to vector<1x128xi32>
    %145 = arith.addi %143, %144 : vector<1x128xi32>
    %c0_i32_50 = arith.constant 0 : i32
    %146 = vector.broadcast %c0_i32_50 : i32 to vector<1x128xi32>
    %147 = arith.cmpi sge, %145, %146 : vector<1x128xi32>
    %c1_i32_51 = arith.constant 1 : i32
    %148 = vector.broadcast %c1_i32_51 : i32 to vector<1x128xi32>
    %149 = arith.addi %143, %148 : vector<1x128xi32>
    %c8_i32_52 = arith.constant 8 : i32
    %150 = vector.broadcast %c8_i32_52 : i32 to vector<1x128xi32>
    %151 = arith.cmpi slt, %149, %150 : vector<1x128xi32>
    %152 = arith.andi %147, %151 : vector<1x128xi1>
    %cst_53 = arith.constant 0.000000e+00 : f32
    %153 = vector.shape_cast %152 : vector<1x128xi1> to vector<1x128xi1>
    %154 = vector.broadcast %153 : vector<1x128xi1> to vector<32x128xi1>
    %155 = vector.broadcast %cst_53 : f32 to vector<32x128xf32>
    %156 = arith.select %154, %142, %155 : vector<32x128xi1>, vector<32x128xf32>
    %157 = tpu.concatenate %156, %119 in 0 : vector<32x128xf32>, vector<32x128xf32> -> vector<64x128xf32>
    %c48 = arith.constant 48 : index
    %c0_54 = arith.constant 0 : index
    %158 = vector.load %arg2[%c48, %c0_54] : memref<272x256xbf16, #tpu.memory_space<vmem>>, vector<16x64xbf16>
    %159 = arith.truncf %157 : vector<64x128xf32> to vector<64x128xbf16>
    %cst_55 = arith.constant dense<0.000000e+00> : vector<16x128xf32>
    %160 = tpu.matmul %158, %159, %cst_55 {dimension_numbers = #tpu.dot_dimension_numbers<[1], [0], [0], [1], [0, 0, 1, 1], [], []>} : vector<16x64xbf16>, vector<64x128xbf16>, vector<16x128xf32> -> vector<16x128xf32>
    %c48_56 = arith.constant 48 : index
    %c0_57 = arith.constant 0 : index
    %161 = vector.load %arg3[%c48_56, %c0_57] : memref<200x1xf32, #tpu.memory_space<vmem>>, vector<16x1xf32>
    %162 = vector.broadcast %161 : vector<16x1xf32> to vector<16x128xf32>
    %163 = arith.addf %160, %162 : vector<16x128xf32>
    %cst_58 = arith.constant 0.000000e+00 : f32
    %164 = vector.broadcast %cst_58 : f32 to vector<16x128xf32>
    %165 = arith.cmpf ogt, %141, %164 : vector<16x128xf32>
    %cst_59 = arith.constant 1.000000e-01 : f32
    %166 = vector.broadcast %cst_59 : f32 to vector<16x128xf32>
    %167 = arith.mulf %166, %141 : vector<16x128xf32>
    %168 = arith.select %165, %141, %167 : vector<16x128xi1>, vector<16x128xf32>
    %cst_60 = arith.constant 0.000000e+00 : f32
    %169 = vector.broadcast %cst_60 : f32 to vector<16x128xf32>
    %170 = arith.cmpf ogt, %163, %169 : vector<16x128xf32>
    %cst_61 = arith.constant 1.000000e-01 : f32
    %171 = vector.broadcast %cst_61 : f32 to vector<16x128xf32>
    %172 = arith.mulf %171, %163 : vector<16x128xf32>
    %173 = arith.select %170, %163, %172 : vector<16x128xi1>, vector<16x128xf32>
    %c64 = arith.constant 64 : index
    %c0_62 = arith.constant 0 : index
    %174 = vector.load %arg2[%c64, %c0_62] : memref<272x256xbf16, #tpu.memory_space<vmem>>, vector<16x48xbf16>
    %c64_63 = arith.constant 64 : index
    %c0_64 = arith.constant 0 : index
    %175 = vector.load %arg3[%c64_63, %c0_64] : memref<200x1xf32, #tpu.memory_space<vmem>>, vector<16x1xf32>
    %c1_i32_65 = arith.constant 1 : i32
    %176 = tpu.dynamic_rotate %173 by %c1_i32_65 dim 1 : vector<16x128xf32>, i32 -> vector<16x128xf32>
    %177 = tpu.iota {dimensions = array<i32: 1>} : vector<1x128xi32>
    %c-1_i32_66 = arith.constant -1 : i32
    %178 = vector.broadcast %c-1_i32_66 : i32 to vector<1x128xi32>
    %179 = arith.addi %177, %178 : vector<1x128xi32>
    %c0_i32_67 = arith.constant 0 : i32
    %180 = vector.broadcast %c0_i32_67 : i32 to vector<1x128xi32>
    %181 = arith.cmpi sge, %179, %180 : vector<1x128xi32>
    %c-1_i32_68 = arith.constant -1 : i32
    %182 = vector.broadcast %c-1_i32_68 : i32 to vector<1x128xi32>
    %183 = arith.addi %177, %182 : vector<1x128xi32>
    %c8_i32_69 = arith.constant 8 : i32
    %184 = vector.broadcast %c8_i32_69 : i32 to vector<1x128xi32>
    %185 = arith.cmpi slt, %183, %184 : vector<1x128xi32>
    %186 = arith.andi %181, %185 : vector<1x128xi1>
    %cst_70 = arith.constant 0.000000e+00 : f32
    %187 = vector.shape_cast %186 : vector<1x128xi1> to vector<1x128xi1>
    %188 = vector.broadcast %187 : vector<1x128xi1> to vector<16x128xi1>
    %189 = vector.broadcast %cst_70 : f32 to vector<16x128xf32>
    %190 = arith.select %188, %176, %189 : vector<16x128xi1>, vector<16x128xf32>
    %191 = tpu.concatenate %190, %168, %173 in 0 : vector<16x128xf32>, vector<16x128xf32>, vector<16x128xf32> -> vector<48x128xf32>
    %c127_i32_71 = arith.constant 127 : i32
    %192 = tpu.dynamic_rotate %168 by %c127_i32_71 dim 1 : vector<16x128xf32>, i32 -> vector<16x128xf32>
    %193 = tpu.iota {dimensions = array<i32: 1>} : vector<1x128xi32>
    %c1_i32_72 = arith.constant 1 : i32
    %194 = vector.broadcast %c1_i32_72 : i32 to vector<1x128xi32>
    %195 = arith.addi %193, %194 : vector<1x128xi32>
    %c0_i32_73 = arith.constant 0 : i32
    %196 = vector.broadcast %c0_i32_73 : i32 to vector<1x128xi32>
    %197 = arith.cmpi sge, %195, %196 : vector<1x128xi32>
    %c1_i32_74 = arith.constant 1 : i32
    %198 = vector.broadcast %c1_i32_74 : i32 to vector<1x128xi32>
    %199 = arith.addi %193, %198 : vector<1x128xi32>
    %c8_i32_75 = arith.constant 8 : i32
    %200 = vector.broadcast %c8_i32_75 : i32 to vector<1x128xi32>
    %201 = arith.cmpi slt, %199, %200 : vector<1x128xi32>
    %202 = arith.andi %197, %201 : vector<1x128xi1>
    %cst_76 = arith.constant 0.000000e+00 : f32
    %203 = vector.shape_cast %202 : vector<1x128xi1> to vector<1x128xi1>
    %204 = vector.broadcast %203 : vector<1x128xi1> to vector<16x128xi1>
    %205 = vector.broadcast %cst_76 : f32 to vector<16x128xf32>
    %206 = arith.select %204, %192, %205 : vector<16x128xi1>, vector<16x128xf32>
    %207 = tpu.concatenate %168, %173, %206 in 0 : vector<16x128xf32>, vector<16x128xf32>, vector<16x128xf32> -> vector<48x128xf32>
    %208 = tpu.concatenate %191, %207 in 1 : vector<48x128xf32>, vector<48x128xf32> -> vector<48x256xf32>
    %209 = arith.truncf %208 : vector<48x256xf32> to vector<48x256xbf16>
    %cst_77 = arith.constant dense<0.000000e+00> : vector<16x256xf32>
    %210 = tpu.matmul %174, %209, %cst_77 {dimension_numbers = #tpu.dot_dimension_numbers<[1], [0], [0], [1], [0, 0, 1, 1], [], []>} : vector<16x48xbf16>, vector<48x256xbf16>, vector<16x256xf32> -> vector<16x256xf32>
    %211 = vector.broadcast %175 : vector<16x1xf32> to vector<16x256xf32>
    %212 = arith.addf %210, %211 : vector<16x256xf32>
    %213 = vector.extract_strided_slice %212 {offsets = [0, 0], sizes = [16, 128], strides = [1, 1]} : vector<16x256xf32> to vector<16x128xf32>
    %214 = vector.extract_strided_slice %212 {offsets = [0, 128], sizes = [16, 128], strides = [1, 1]} : vector<16x256xf32> to vector<16x128xf32>
    %215 = arith.addf %141, %213 : vector<16x128xf32>
    %216 = arith.addf %163, %214 : vector<16x128xf32>
    %cst_78 = arith.constant 0.000000e+00 : f32
    %217 = vector.broadcast %cst_78 : f32 to vector<16x128xf32>
    %218 = arith.cmpf ogt, %215, %217 : vector<16x128xf32>
    %cst_79 = arith.constant 1.000000e-01 : f32
    %219 = vector.broadcast %cst_79 : f32 to vector<16x128xf32>
    %220 = arith.mulf %219, %215 : vector<16x128xf32>
    %221 = arith.select %218, %215, %220 : vector<16x128xi1>, vector<16x128xf32>
    %cst_80 = arith.constant 0.000000e+00 : f32
    %222 = vector.broadcast %cst_80 : f32 to vector<16x128xf32>
    %223 = arith.cmpf ogt, %216, %222 : vector<16x128xf32>
    %cst_81 = arith.constant 1.000000e-01 : f32
    %224 = vector.broadcast %cst_81 : f32 to vector<16x128xf32>
    %225 = arith.mulf %224, %216 : vector<16x128xf32>
    %226 = arith.select %223, %216, %225 : vector<16x128xi1>, vector<16x128xf32>
    %c80 = arith.constant 80 : index
    %c0_82 = arith.constant 0 : index
    %227 = vector.load %arg2[%c80, %c0_82] : memref<272x256xbf16, #tpu.memory_space<vmem>>, vector<16x48xbf16>
    %c80_83 = arith.constant 80 : index
    %c0_84 = arith.constant 0 : index
    %228 = vector.load %arg3[%c80_83, %c0_84] : memref<200x1xf32, #tpu.memory_space<vmem>>, vector<16x1xf32>
    %c2_i32_85 = arith.constant 2 : i32
    %229 = tpu.dynamic_rotate %226 by %c2_i32_85 dim 1 : vector<16x128xf32>, i32 -> vector<16x128xf32>
    %230 = tpu.iota {dimensions = array<i32: 1>} : vector<1x128xi32>
    %c-2_i32_86 = arith.constant -2 : i32
    %231 = vector.broadcast %c-2_i32_86 : i32 to vector<1x128xi32>
    %232 = arith.addi %230, %231 : vector<1x128xi32>
    %c0_i32_87 = arith.constant 0 : i32
    %233 = vector.broadcast %c0_i32_87 : i32 to vector<1x128xi32>
    %234 = arith.cmpi sge, %232, %233 : vector<1x128xi32>
    %c-2_i32_88 = arith.constant -2 : i32
    %235 = vector.broadcast %c-2_i32_88 : i32 to vector<1x128xi32>
    %236 = arith.addi %230, %235 : vector<1x128xi32>
    %c8_i32_89 = arith.constant 8 : i32
    %237 = vector.broadcast %c8_i32_89 : i32 to vector<1x128xi32>
    %238 = arith.cmpi slt, %236, %237 : vector<1x128xi32>
    %239 = arith.andi %234, %238 : vector<1x128xi1>
    %cst_90 = arith.constant 0.000000e+00 : f32
    %240 = vector.shape_cast %239 : vector<1x128xi1> to vector<1x128xi1>
    %241 = vector.broadcast %240 : vector<1x128xi1> to vector<16x128xi1>
    %242 = vector.broadcast %cst_90 : f32 to vector<16x128xf32>
    %243 = arith.select %241, %229, %242 : vector<16x128xi1>, vector<16x128xf32>
    %c127_i32_91 = arith.constant 127 : i32
    %244 = tpu.dynamic_rotate %226 by %c127_i32_91 dim 1 : vector<16x128xf32>, i32 -> vector<16x128xf32>
    %245 = tpu.iota {dimensions = array<i32: 1>} : vector<1x128xi32>
    %c1_i32_92 = arith.constant 1 : i32
    %246 = vector.broadcast %c1_i32_92 : i32 to vector<1x128xi32>
    %247 = arith.addi %245, %246 : vector<1x128xi32>
    %c0_i32_93 = arith.constant 0 : i32
    %248 = vector.broadcast %c0_i32_93 : i32 to vector<1x128xi32>
    %249 = arith.cmpi sge, %247, %248 : vector<1x128xi32>
    %c1_i32_94 = arith.constant 1 : i32
    %250 = vector.broadcast %c1_i32_94 : i32 to vector<1x128xi32>
    %251 = arith.addi %245, %250 : vector<1x128xi32>
    %c8_i32_95 = arith.constant 8 : i32
    %252 = vector.broadcast %c8_i32_95 : i32 to vector<1x128xi32>
    %253 = arith.cmpi slt, %251, %252 : vector<1x128xi32>
    %254 = arith.andi %249, %253 : vector<1x128xi1>
    %cst_96 = arith.constant 0.000000e+00 : f32
    %255 = vector.shape_cast %254 : vector<1x128xi1> to vector<1x128xi1>
    %256 = vector.broadcast %255 : vector<1x128xi1> to vector<16x128xi1>
    %257 = vector.broadcast %cst_96 : f32 to vector<16x128xf32>
    %258 = arith.select %256, %244, %257 : vector<16x128xi1>, vector<16x128xf32>
    %259 = tpu.concatenate %243, %221, %258 in 0 : vector<16x128xf32>, vector<16x128xf32>, vector<16x128xf32> -> vector<48x128xf32>
    %c1_i32_97 = arith.constant 1 : i32
    %260 = tpu.dynamic_rotate %221 by %c1_i32_97 dim 1 : vector<16x128xf32>, i32 -> vector<16x128xf32>
    %261 = tpu.iota {dimensions = array<i32: 1>} : vector<1x128xi32>
    %c-1_i32_98 = arith.constant -1 : i32
    %262 = vector.broadcast %c-1_i32_98 : i32 to vector<1x128xi32>
    %263 = arith.addi %261, %262 : vector<1x128xi32>
    %c0_i32_99 = arith.constant 0 : i32
    %264 = vector.broadcast %c0_i32_99 : i32 to vector<1x128xi32>
    %265 = arith.cmpi sge, %263, %264 : vector<1x128xi32>
    %c-1_i32_100 = arith.constant -1 : i32
    %266 = vector.broadcast %c-1_i32_100 : i32 to vector<1x128xi32>
    %267 = arith.addi %261, %266 : vector<1x128xi32>
    %c8_i32_101 = arith.constant 8 : i32
    %268 = vector.broadcast %c8_i32_101 : i32 to vector<1x128xi32>
    %269 = arith.cmpi slt, %267, %268 : vector<1x128xi32>
    %270 = arith.andi %265, %269 : vector<1x128xi1>
    %cst_102 = arith.constant 0.000000e+00 : f32
    %271 = vector.shape_cast %270 : vector<1x128xi1> to vector<1x128xi1>
    %272 = vector.broadcast %271 : vector<1x128xi1> to vector<16x128xi1>
    %273 = vector.broadcast %cst_102 : f32 to vector<16x128xf32>
    %274 = arith.select %272, %260, %273 : vector<16x128xi1>, vector<16x128xf32>
    %c126_i32_103 = arith.constant 126 : i32
    %275 = tpu.dynamic_rotate %221 by %c126_i32_103 dim 1 : vector<16x128xf32>, i32 -> vector<16x128xf32>
    %276 = tpu.iota {dimensions = array<i32: 1>} : vector<1x128xi32>
    %c2_i32_104 = arith.constant 2 : i32
    %277 = vector.broadcast %c2_i32_104 : i32 to vector<1x128xi32>
    %278 = arith.addi %276, %277 : vector<1x128xi32>
    %c0_i32_105 = arith.constant 0 : i32
    %279 = vector.broadcast %c0_i32_105 : i32 to vector<1x128xi32>
    %280 = arith.cmpi sge, %278, %279 : vector<1x128xi32>
    %c2_i32_106 = arith.constant 2 : i32
    %281 = vector.broadcast %c2_i32_106 : i32 to vector<1x128xi32>
    %282 = arith.addi %276, %281 : vector<1x128xi32>
    %c8_i32_107 = arith.constant 8 : i32
    %283 = vector.broadcast %c8_i32_107 : i32 to vector<1x128xi32>
    %284 = arith.cmpi slt, %282, %283 : vector<1x128xi32>
    %285 = arith.andi %280, %284 : vector<1x128xi1>
    %cst_108 = arith.constant 0.000000e+00 : f32
    %286 = vector.shape_cast %285 : vector<1x128xi1> to vector<1x128xi1>
    %287 = vector.broadcast %286 : vector<1x128xi1> to vector<16x128xi1>
    %288 = vector.broadcast %cst_108 : f32 to vector<16x128xf32>
    %289 = arith.select %287, %275, %288 : vector<16x128xi1>, vector<16x128xf32>
    %290 = tpu.concatenate %274, %226, %289 in 0 : vector<16x128xf32>, vector<16x128xf32>, vector<16x128xf32> -> vector<48x128xf32>
    %291 = tpu.concatenate %259, %290 in 1 : vector<48x128xf32>, vector<48x128xf32> -> vector<48x256xf32>
    %292 = arith.truncf %291 : vector<48x256xf32> to vector<48x256xbf16>
    %cst_109 = arith.constant dense<0.000000e+00> : vector<16x256xf32>
    %293 = tpu.matmul %227, %292, %cst_109 {dimension_numbers = #tpu.dot_dimension_numbers<[1], [0], [0], [1], [0, 0, 1, 1], [], []>} : vector<16x48xbf16>, vector<48x256xbf16>, vector<16x256xf32> -> vector<16x256xf32>
    %294 = vector.broadcast %228 : vector<16x1xf32> to vector<16x256xf32>
    %295 = arith.addf %293, %294 : vector<16x256xf32>
    %296 = vector.extract_strided_slice %295 {offsets = [0, 0], sizes = [16, 128], strides = [1, 1]} : vector<16x256xf32> to vector<16x128xf32>
    %297 = vector.extract_strided_slice %295 {offsets = [0, 128], sizes = [16, 128], strides = [1, 1]} : vector<16x256xf32> to vector<16x128xf32>
    %298 = arith.addf %215, %296 : vector<16x128xf32>
    %299 = arith.addf %216, %297 : vector<16x128xf32>
    %cst_110 = arith.constant 0.000000e+00 : f32
    %300 = vector.broadcast %cst_110 : f32 to vector<16x128xf32>
    %301 = arith.cmpf ogt, %141, %300 : vector<16x128xf32>
    %cst_111 = arith.constant 1.000000e-01 : f32
    %302 = vector.broadcast %cst_111 : f32 to vector<16x128xf32>
    %303 = arith.mulf %302, %141 : vector<16x128xf32>
    %304 = arith.select %301, %141, %303 : vector<16x128xi1>, vector<16x128xf32>
    %cst_112 = arith.constant 0.000000e+00 : f32
    %305 = vector.broadcast %cst_112 : f32 to vector<16x128xf32>
    %306 = arith.cmpf ogt, %163, %305 : vector<16x128xf32>
    %cst_113 = arith.constant 1.000000e-01 : f32
    %307 = vector.broadcast %cst_113 : f32 to vector<16x128xf32>
    %308 = arith.mulf %307, %163 : vector<16x128xf32>
    %309 = arith.select %306, %163, %308 : vector<16x128xi1>, vector<16x128xf32>
    %c96 = arith.constant 96 : index
    %c0_114 = arith.constant 0 : index
    %310 = vector.load %arg2[%c96, %c0_114] : memref<272x256xbf16, #tpu.memory_space<vmem>>, vector<16x48xbf16>
    %c96_115 = arith.constant 96 : index
    %c0_116 = arith.constant 0 : index
    %311 = vector.load %arg3[%c96_115, %c0_116] : memref<200x1xf32, #tpu.memory_space<vmem>>, vector<16x1xf32>
    %c1_i32_117 = arith.constant 1 : i32
    %312 = tpu.dynamic_rotate %309 by %c1_i32_117 dim 1 : vector<16x128xf32>, i32 -> vector<16x128xf32>
    %313 = tpu.iota {dimensions = array<i32: 1>} : vector<1x128xi32>
    %c-1_i32_118 = arith.constant -1 : i32
    %314 = vector.broadcast %c-1_i32_118 : i32 to vector<1x128xi32>
    %315 = arith.addi %313, %314 : vector<1x128xi32>
    %c0_i32_119 = arith.constant 0 : i32
    %316 = vector.broadcast %c0_i32_119 : i32 to vector<1x128xi32>
    %317 = arith.cmpi sge, %315, %316 : vector<1x128xi32>
    %c-1_i32_120 = arith.constant -1 : i32
    %318 = vector.broadcast %c-1_i32_120 : i32 to vector<1x128xi32>
    %319 = arith.addi %313, %318 : vector<1x128xi32>
    %c8_i32_121 = arith.constant 8 : i32
    %320 = vector.broadcast %c8_i32_121 : i32 to vector<1x128xi32>
    %321 = arith.cmpi slt, %319, %320 : vector<1x128xi32>
    %322 = arith.andi %317, %321 : vector<1x128xi1>
    %cst_122 = arith.constant 0.000000e+00 : f32
    %323 = vector.shape_cast %322 : vector<1x128xi1> to vector<1x128xi1>
    %324 = vector.broadcast %323 : vector<1x128xi1> to vector<16x128xi1>
    %325 = vector.broadcast %cst_122 : f32 to vector<16x128xf32>
    %326 = arith.select %324, %312, %325 : vector<16x128xi1>, vector<16x128xf32>
    %327 = tpu.concatenate %326, %304, %309 in 0 : vector<16x128xf32>, vector<16x128xf32>, vector<16x128xf32> -> vector<48x128xf32>
    %c127_i32_123 = arith.constant 127 : i32
    %328 = tpu.dynamic_rotate %304 by %c127_i32_123 dim 1 : vector<16x128xf32>, i32 -> vector<16x128xf32>
    %329 = tpu.iota {dimensions = array<i32: 1>} : vector<1x128xi32>
    %c1_i32_124 = arith.constant 1 : i32
    %330 = vector.broadcast %c1_i32_124 : i32 to vector<1x128xi32>
    %331 = arith.addi %329, %330 : vector<1x128xi32>
    %c0_i32_125 = arith.constant 0 : i32
    %332 = vector.broadcast %c0_i32_125 : i32 to vector<1x128xi32>
    %333 = arith.cmpi sge, %331, %332 : vector<1x128xi32>
    %c1_i32_126 = arith.constant 1 : i32
    %334 = vector.broadcast %c1_i32_126 : i32 to vector<1x128xi32>
    %335 = arith.addi %329, %334 : vector<1x128xi32>
    %c8_i32_127 = arith.constant 8 : i32
    %336 = vector.broadcast %c8_i32_127 : i32 to vector<1x128xi32>
    %337 = arith.cmpi slt, %335, %336 : vector<1x128xi32>
    %338 = arith.andi %333, %337 : vector<1x128xi1>
    %cst_128 = arith.constant 0.000000e+00 : f32
    %339 = vector.shape_cast %338 : vector<1x128xi1> to vector<1x128xi1>
    %340 = vector.broadcast %339 : vector<1x128xi1> to vector<16x128xi1>
    %341 = vector.broadcast %cst_128 : f32 to vector<16x128xf32>
    %342 = arith.select %340, %328, %341 : vector<16x128xi1>, vector<16x128xf32>
    %343 = tpu.concatenate %304, %309, %342 in 0 : vector<16x128xf32>, vector<16x128xf32>, vector<16x128xf32> -> vector<48x128xf32>
    %344 = tpu.concatenate %327, %343 in 1 : vector<48x128xf32>, vector<48x128xf32> -> vector<48x256xf32>
    %345 = arith.truncf %344 : vector<48x256xf32> to vector<48x256xbf16>
    %cst_129 = arith.constant dense<0.000000e+00> : vector<16x256xf32>
    %346 = tpu.matmul %310, %345, %cst_129 {dimension_numbers = #tpu.dot_dimension_numbers<[1], [0], [0], [1], [0, 0, 1, 1], [], []>} : vector<16x48xbf16>, vector<48x256xbf16>, vector<16x256xf32> -> vector<16x256xf32>
    %347 = vector.broadcast %311 : vector<16x1xf32> to vector<16x256xf32>
    %348 = arith.addf %346, %347 : vector<16x256xf32>
    %349 = vector.extract_strided_slice %348 {offsets = [0, 0], sizes = [16, 128], strides = [1, 1]} : vector<16x256xf32> to vector<16x128xf32>
    %350 = vector.extract_strided_slice %348 {offsets = [0, 128], sizes = [16, 128], strides = [1, 1]} : vector<16x256xf32> to vector<16x128xf32>
    %351 = arith.addf %141, %349 : vector<16x128xf32>
    %352 = arith.addf %163, %350 : vector<16x128xf32>
    %cst_130 = arith.constant 0.000000e+00 : f32
    %353 = vector.broadcast %cst_130 : f32 to vector<16x128xf32>
    %354 = arith.cmpf ogt, %351, %353 : vector<16x128xf32>
    %cst_131 = arith.constant 1.000000e-01 : f32
    %355 = vector.broadcast %cst_131 : f32 to vector<16x128xf32>
    %356 = arith.mulf %355, %351 : vector<16x128xf32>
    %357 = arith.select %354, %351, %356 : vector<16x128xi1>, vector<16x128xf32>
    %cst_132 = arith.constant 0.000000e+00 : f32
    %358 = vector.broadcast %cst_132 : f32 to vector<16x128xf32>
    %359 = arith.cmpf ogt, %352, %358 : vector<16x128xf32>
    %cst_133 = arith.constant 1.000000e-01 : f32
    %360 = vector.broadcast %cst_133 : f32 to vector<16x128xf32>
    %361 = arith.mulf %360, %352 : vector<16x128xf32>
    %362 = arith.select %359, %352, %361 : vector<16x128xi1>, vector<16x128xf32>
    %c112 = arith.constant 112 : index
    %c0_134 = arith.constant 0 : index
    %363 = vector.load %arg2[%c112, %c0_134] : memref<272x256xbf16, #tpu.memory_space<vmem>>, vector<16x48xbf16>
    %c112_135 = arith.constant 112 : index
    %c0_136 = arith.constant 0 : index
    %364 = vector.load %arg3[%c112_135, %c0_136] : memref<200x1xf32, #tpu.memory_space<vmem>>, vector<16x1xf32>
    %c2_i32_137 = arith.constant 2 : i32
    %365 = tpu.dynamic_rotate %362 by %c2_i32_137 dim 1 : vector<16x128xf32>, i32 -> vector<16x128xf32>
    %366 = tpu.iota {dimensions = array<i32: 1>} : vector<1x128xi32>
    %c-2_i32_138 = arith.constant -2 : i32
    %367 = vector.broadcast %c-2_i32_138 : i32 to vector<1x128xi32>
    %368 = arith.addi %366, %367 : vector<1x128xi32>
    %c0_i32_139 = arith.constant 0 : i32
    %369 = vector.broadcast %c0_i32_139 : i32 to vector<1x128xi32>
    %370 = arith.cmpi sge, %368, %369 : vector<1x128xi32>
    %c-2_i32_140 = arith.constant -2 : i32
    %371 = vector.broadcast %c-2_i32_140 : i32 to vector<1x128xi32>
    %372 = arith.addi %366, %371 : vector<1x128xi32>
    %c8_i32_141 = arith.constant 8 : i32
    %373 = vector.broadcast %c8_i32_141 : i32 to vector<1x128xi32>
    %374 = arith.cmpi slt, %372, %373 : vector<1x128xi32>
    %375 = arith.andi %370, %374 : vector<1x128xi1>
    %cst_142 = arith.constant 0.000000e+00 : f32
    %376 = vector.shape_cast %375 : vector<1x128xi1> to vector<1x128xi1>
    %377 = vector.broadcast %376 : vector<1x128xi1> to vector<16x128xi1>
    %378 = vector.broadcast %cst_142 : f32 to vector<16x128xf32>
    %379 = arith.select %377, %365, %378 : vector<16x128xi1>, vector<16x128xf32>
    %c127_i32_143 = arith.constant 127 : i32
    %380 = tpu.dynamic_rotate %362 by %c127_i32_143 dim 1 : vector<16x128xf32>, i32 -> vector<16x128xf32>
    %381 = tpu.iota {dimensions = array<i32: 1>} : vector<1x128xi32>
    %c1_i32_144 = arith.constant 1 : i32
    %382 = vector.broadcast %c1_i32_144 : i32 to vector<1x128xi32>
    %383 = arith.addi %381, %382 : vector<1x128xi32>
    %c0_i32_145 = arith.constant 0 : i32
    %384 = vector.broadcast %c0_i32_145 : i32 to vector<1x128xi32>
    %385 = arith.cmpi sge, %383, %384 : vector<1x128xi32>
    %c1_i32_146 = arith.constant 1 : i32
    %386 = vector.broadcast %c1_i32_146 : i32 to vector<1x128xi32>
    %387 = arith.addi %381, %386 : vector<1x128xi32>
    %c8_i32_147 = arith.constant 8 : i32
    %388 = vector.broadcast %c8_i32_147 : i32 to vector<1x128xi32>
    %389 = arith.cmpi slt, %387, %388 : vector<1x128xi32>
    %390 = arith.andi %385, %389 : vector<1x128xi1>
    %cst_148 = arith.constant 0.000000e+00 : f32
    %391 = vector.shape_cast %390 : vector<1x128xi1> to vector<1x128xi1>
    %392 = vector.broadcast %391 : vector<1x128xi1> to vector<16x128xi1>
    %393 = vector.broadcast %cst_148 : f32 to vector<16x128xf32>
    %394 = arith.select %392, %380, %393 : vector<16x128xi1>, vector<16x128xf32>
    %395 = tpu.concatenate %379, %357, %394 in 0 : vector<16x128xf32>, vector<16x128xf32>, vector<16x128xf32> -> vector<48x128xf32>
    %c1_i32_149 = arith.constant 1 : i32
    %396 = tpu.dynamic_rotate %357 by %c1_i32_149 dim 1 : vector<16x128xf32>, i32 -> vector<16x128xf32>
    %397 = tpu.iota {dimensions = array<i32: 1>} : vector<1x128xi32>
    %c-1_i32_150 = arith.constant -1 : i32
    %398 = vector.broadcast %c-1_i32_150 : i32 to vector<1x128xi32>
    %399 = arith.addi %397, %398 : vector<1x128xi32>
    %c0_i32_151 = arith.constant 0 : i32
    %400 = vector.broadcast %c0_i32_151 : i32 to vector<1x128xi32>
    %401 = arith.cmpi sge, %399, %400 : vector<1x128xi32>
    %c-1_i32_152 = arith.constant -1 : i32
    %402 = vector.broadcast %c-1_i32_152 : i32 to vector<1x128xi32>
    %403 = arith.addi %397, %402 : vector<1x128xi32>
    %c8_i32_153 = arith.constant 8 : i32
    %404 = vector.broadcast %c8_i32_153 : i32 to vector<1x128xi32>
    %405 = arith.cmpi slt, %403, %404 : vector<1x128xi32>
    %406 = arith.andi %401, %405 : vector<1x128xi1>
    %cst_154 = arith.constant 0.000000e+00 : f32
    %407 = vector.shape_cast %406 : vector<1x128xi1> to vector<1x128xi1>
    %408 = vector.broadcast %407 : vector<1x128xi1> to vector<16x128xi1>
    %409 = vector.broadcast %cst_154 : f32 to vector<16x128xf32>
    %410 = arith.select %408, %396, %409 : vector<16x128xi1>, vector<16x128xf32>
    %c126_i32_155 = arith.constant 126 : i32
    %411 = tpu.dynamic_rotate %357 by %c126_i32_155 dim 1 : vector<16x128xf32>, i32 -> vector<16x128xf32>
    %412 = tpu.iota {dimensions = array<i32: 1>} : vector<1x128xi32>
    %c2_i32_156 = arith.constant 2 : i32
    %413 = vector.broadcast %c2_i32_156 : i32 to vector<1x128xi32>
    %414 = arith.addi %412, %413 : vector<1x128xi32>
    %c0_i32_157 = arith.constant 0 : i32
    %415 = vector.broadcast %c0_i32_157 : i32 to vector<1x128xi32>
    %416 = arith.cmpi sge, %414, %415 : vector<1x128xi32>
    %c2_i32_158 = arith.constant 2 : i32
    %417 = vector.broadcast %c2_i32_158 : i32 to vector<1x128xi32>
    %418 = arith.addi %412, %417 : vector<1x128xi32>
    %c8_i32_159 = arith.constant 8 : i32
    %419 = vector.broadcast %c8_i32_159 : i32 to vector<1x128xi32>
    %420 = arith.cmpi slt, %418, %419 : vector<1x128xi32>
    %421 = arith.andi %416, %420 : vector<1x128xi1>
    %cst_160 = arith.constant 0.000000e+00 : f32
    %422 = vector.shape_cast %421 : vector<1x128xi1> to vector<1x128xi1>
    %423 = vector.broadcast %422 : vector<1x128xi1> to vector<16x128xi1>
    %424 = vector.broadcast %cst_160 : f32 to vector<16x128xf32>
    %425 = arith.select %423, %411, %424 : vector<16x128xi1>, vector<16x128xf32>
    %426 = tpu.concatenate %410, %362, %425 in 0 : vector<16x128xf32>, vector<16x128xf32>, vector<16x128xf32> -> vector<48x128xf32>
    %427 = tpu.concatenate %395, %426 in 1 : vector<48x128xf32>, vector<48x128xf32> -> vector<48x256xf32>
    %428 = arith.truncf %427 : vector<48x256xf32> to vector<48x256xbf16>
    %cst_161 = arith.constant dense<0.000000e+00> : vector<16x256xf32>
    %429 = tpu.matmul %363, %428, %cst_161 {dimension_numbers = #tpu.dot_dimension_numbers<[1], [0], [0], [1], [0, 0, 1, 1], [], []>} : vector<16x48xbf16>, vector<48x256xbf16>, vector<16x256xf32> -> vector<16x256xf32>
    %430 = vector.broadcast %364 : vector<16x1xf32> to vector<16x256xf32>
    %431 = arith.addf %429, %430 : vector<16x256xf32>
    %432 = vector.extract_strided_slice %431 {offsets = [0, 0], sizes = [16, 128], strides = [1, 1]} : vector<16x256xf32> to vector<16x128xf32>
    %433 = vector.extract_strided_slice %431 {offsets = [0, 128], sizes = [16, 128], strides = [1, 1]} : vector<16x256xf32> to vector<16x128xf32>
    %434 = arith.addf %351, %432 : vector<16x128xf32>
    %435 = arith.addf %352, %433 : vector<16x128xf32>
    %436 = arith.addf %298, %434 : vector<16x128xf32>
    %437 = arith.addf %299, %435 : vector<16x128xf32>
    %cst_162 = arith.constant 5.000000e-01 : f32
    %438 = vector.broadcast %cst_162 : f32 to vector<16x128xf32>
    %439 = arith.mulf %436, %438 : vector<16x128xf32>
    %cst_163 = arith.constant 5.000000e-01 : f32
    %440 = vector.broadcast %cst_163 : f32 to vector<16x128xf32>
    %441 = arith.mulf %437, %440 : vector<16x128xf32>
    %cst_164 = arith.constant 0.000000e+00 : f32
    %442 = vector.broadcast %cst_164 : f32 to vector<16x128xf32>
    %443 = arith.cmpf ogt, %439, %442 : vector<16x128xf32>
    %cst_165 = arith.constant 1.000000e-01 : f32
    %444 = vector.broadcast %cst_165 : f32 to vector<16x128xf32>
    %445 = arith.mulf %444, %439 : vector<16x128xf32>
    %446 = arith.select %443, %439, %445 : vector<16x128xi1>, vector<16x128xf32>
    %cst_166 = arith.constant 0.000000e+00 : f32
    %447 = vector.broadcast %cst_166 : f32 to vector<16x128xf32>
    %448 = arith.cmpf ogt, %441, %447 : vector<16x128xf32>
    %cst_167 = arith.constant 1.000000e-01 : f32
    %449 = vector.broadcast %cst_167 : f32 to vector<16x128xf32>
    %450 = arith.mulf %449, %441 : vector<16x128xf32>
    %451 = arith.select %448, %441, %450 : vector<16x128xi1>, vector<16x128xf32>
    %c1_i32_168 = arith.constant 1 : i32
    %452 = tpu.dynamic_rotate %451 by %c1_i32_168 dim 1 : vector<16x128xf32>, i32 -> vector<16x128xf32>
    %453 = tpu.iota {dimensions = array<i32: 1>} : vector<1x128xi32>
    %c-1_i32_169 = arith.constant -1 : i32
    %454 = vector.broadcast %c-1_i32_169 : i32 to vector<1x128xi32>
    %455 = arith.addi %453, %454 : vector<1x128xi32>
    %c0_i32_170 = arith.constant 0 : i32
    %456 = vector.broadcast %c0_i32_170 : i32 to vector<1x128xi32>
    %457 = arith.cmpi sge, %455, %456 : vector<1x128xi32>
    %c-1_i32_171 = arith.constant -1 : i32
    %458 = vector.broadcast %c-1_i32_171 : i32 to vector<1x128xi32>
    %459 = arith.addi %453, %458 : vector<1x128xi32>
    %c8_i32_172 = arith.constant 8 : i32
    %460 = vector.broadcast %c8_i32_172 : i32 to vector<1x128xi32>
    %461 = arith.cmpi slt, %459, %460 : vector<1x128xi32>
    %462 = arith.andi %457, %461 : vector<1x128xi1>
    %cst_173 = arith.constant 0.000000e+00 : f32
    %463 = vector.shape_cast %462 : vector<1x128xi1> to vector<1x128xi1>
    %464 = vector.broadcast %463 : vector<1x128xi1> to vector<16x128xi1>
    %465 = vector.broadcast %cst_173 : f32 to vector<16x128xf32>
    %466 = arith.select %464, %452, %465 : vector<16x128xi1>, vector<16x128xf32>
    %467 = tpu.concatenate %446, %466 in 0 : vector<16x128xf32>, vector<16x128xf32> -> vector<32x128xf32>
    %c128 = arith.constant 128 : index
    %c0_174 = arith.constant 0 : index
    %468 = vector.load %arg2[%c128, %c0_174] : memref<272x256xbf16, #tpu.memory_space<vmem>>, vector<8x32xbf16>
    %469 = arith.truncf %467 : vector<32x128xf32> to vector<32x128xbf16>
    %cst_175 = arith.constant dense<0.000000e+00> : vector<8x128xf32>
    %470 = tpu.matmul %468, %469, %cst_175 {dimension_numbers = #tpu.dot_dimension_numbers<[1], [0], [0], [1], [0, 0, 1, 1], [], []>} : vector<8x32xbf16>, vector<32x128xbf16>, vector<8x128xf32> -> vector<8x128xf32>
    %c128_176 = arith.constant 128 : index
    %c0_177 = arith.constant 0 : index
    %471 = vector.load %arg3[%c128_176, %c0_177] : memref<200x1xf32, #tpu.memory_space<vmem>>, vector<8x1xf32>
    %472 = vector.broadcast %471 : vector<8x1xf32> to vector<8x128xf32>
    %473 = arith.addf %470, %472 : vector<8x128xf32>
    %474 = tpu.concatenate %446, %451 in 0 : vector<16x128xf32>, vector<16x128xf32> -> vector<32x128xf32>
    %c144 = arith.constant 144 : index
    %c0_178 = arith.constant 0 : index
    %475 = vector.load %arg2[%c144, %c0_178] : memref<272x256xbf16, #tpu.memory_space<vmem>>, vector<8x32xbf16>
    %476 = arith.truncf %474 : vector<32x128xf32> to vector<32x128xbf16>
    %cst_179 = arith.constant dense<0.000000e+00> : vector<8x128xf32>
    %477 = tpu.matmul %475, %476, %cst_179 {dimension_numbers = #tpu.dot_dimension_numbers<[1], [0], [0], [1], [0, 0, 1, 1], [], []>} : vector<8x32xbf16>, vector<32x128xbf16>, vector<8x128xf32> -> vector<8x128xf32>
    %c136 = arith.constant 136 : index
    %c0_180 = arith.constant 0 : index
    %478 = vector.load %arg3[%c136, %c0_180] : memref<200x1xf32, #tpu.memory_space<vmem>>, vector<8x1xf32>
    %479 = vector.broadcast %478 : vector<8x1xf32> to vector<8x128xf32>
    %480 = arith.addf %477, %479 : vector<8x128xf32>
    %481 = tpu.concatenate %446, %451 in 0 : vector<16x128xf32>, vector<16x128xf32> -> vector<32x128xf32>
    %c160 = arith.constant 160 : index
    %c0_181 = arith.constant 0 : index
    %482 = vector.load %arg2[%c160, %c0_181] : memref<272x256xbf16, #tpu.memory_space<vmem>>, vector<8x32xbf16>
    %483 = arith.truncf %481 : vector<32x128xf32> to vector<32x128xbf16>
    %cst_182 = arith.constant dense<0.000000e+00> : vector<8x128xf32>
    %484 = tpu.matmul %482, %483, %cst_182 {dimension_numbers = #tpu.dot_dimension_numbers<[1], [0], [0], [1], [0, 0, 1, 1], [], []>} : vector<8x32xbf16>, vector<32x128xbf16>, vector<8x128xf32> -> vector<8x128xf32>
    %c144_183 = arith.constant 144 : index
    %c0_184 = arith.constant 0 : index
    %485 = vector.load %arg3[%c144_183, %c0_184] : memref<200x1xf32, #tpu.memory_space<vmem>>, vector<8x1xf32>
    %486 = vector.broadcast %485 : vector<8x1xf32> to vector<8x128xf32>
    %487 = arith.addf %484, %486 : vector<8x128xf32>
    %c127_i32_185 = arith.constant 127 : i32
    %488 = tpu.dynamic_rotate %446 by %c127_i32_185 dim 1 : vector<16x128xf32>, i32 -> vector<16x128xf32>
    %489 = tpu.iota {dimensions = array<i32: 1>} : vector<1x128xi32>
    %c1_i32_186 = arith.constant 1 : i32
    %490 = vector.broadcast %c1_i32_186 : i32 to vector<1x128xi32>
    %491 = arith.addi %489, %490 : vector<1x128xi32>
    %c0_i32_187 = arith.constant 0 : i32
    %492 = vector.broadcast %c0_i32_187 : i32 to vector<1x128xi32>
    %493 = arith.cmpi sge, %491, %492 : vector<1x128xi32>
    %c1_i32_188 = arith.constant 1 : i32
    %494 = vector.broadcast %c1_i32_188 : i32 to vector<1x128xi32>
    %495 = arith.addi %489, %494 : vector<1x128xi32>
    %c8_i32_189 = arith.constant 8 : i32
    %496 = vector.broadcast %c8_i32_189 : i32 to vector<1x128xi32>
    %497 = arith.cmpi slt, %495, %496 : vector<1x128xi32>
    %498 = arith.andi %493, %497 : vector<1x128xi1>
    %cst_190 = arith.constant 0.000000e+00 : f32
    %499 = vector.shape_cast %498 : vector<1x128xi1> to vector<1x128xi1>
    %500 = vector.broadcast %499 : vector<1x128xi1> to vector<16x128xi1>
    %501 = vector.broadcast %cst_190 : f32 to vector<16x128xf32>
    %502 = arith.select %500, %488, %501 : vector<16x128xi1>, vector<16x128xf32>
    %503 = tpu.concatenate %502, %451 in 0 : vector<16x128xf32>, vector<16x128xf32> -> vector<32x128xf32>
    %c176 = arith.constant 176 : index
    %c0_191 = arith.constant 0 : index
    %504 = vector.load %arg2[%c176, %c0_191] : memref<272x256xbf16, #tpu.memory_space<vmem>>, vector<8x32xbf16>
    %505 = arith.truncf %503 : vector<32x128xf32> to vector<32x128xbf16>
    %cst_192 = arith.constant dense<0.000000e+00> : vector<8x128xf32>
    %506 = tpu.matmul %504, %505, %cst_192 {dimension_numbers = #tpu.dot_dimension_numbers<[1], [0], [0], [1], [0, 0, 1, 1], [], []>} : vector<8x32xbf16>, vector<32x128xbf16>, vector<8x128xf32> -> vector<8x128xf32>
    %c152 = arith.constant 152 : index
    %c0_193 = arith.constant 0 : index
    %507 = vector.load %arg3[%c152, %c0_193] : memref<200x1xf32, #tpu.memory_space<vmem>>, vector<8x1xf32>
    %508 = vector.broadcast %507 : vector<8x1xf32> to vector<8x128xf32>
    %509 = arith.addf %506, %508 : vector<8x128xf32>
    %cst_194 = arith.constant 0.000000e+00 : f32
    %510 = vector.broadcast %cst_194 : f32 to vector<8x128xf32>
    %511 = arith.cmpf ogt, %473, %510 : vector<8x128xf32>
    %cst_195 = arith.constant 1.000000e-01 : f32
    %512 = vector.broadcast %cst_195 : f32 to vector<8x128xf32>
    %513 = arith.mulf %512, %473 : vector<8x128xf32>
    %514 = arith.select %511, %473, %513 : vector<8x128xi1>, vector<8x128xf32>
    %cst_196 = arith.constant 0.000000e+00 : f32
    %515 = vector.broadcast %cst_196 : f32 to vector<8x128xf32>
    %516 = arith.cmpf ogt, %480, %515 : vector<8x128xf32>
    %cst_197 = arith.constant 1.000000e-01 : f32
    %517 = vector.broadcast %cst_197 : f32 to vector<8x128xf32>
    %518 = arith.mulf %517, %480 : vector<8x128xf32>
    %519 = arith.select %516, %480, %518 : vector<8x128xi1>, vector<8x128xf32>
    %cst_198 = arith.constant 0.000000e+00 : f32
    %520 = vector.broadcast %cst_198 : f32 to vector<8x128xf32>
    %521 = arith.cmpf ogt, %487, %520 : vector<8x128xf32>
    %cst_199 = arith.constant 1.000000e-01 : f32
    %522 = vector.broadcast %cst_199 : f32 to vector<8x128xf32>
    %523 = arith.mulf %522, %487 : vector<8x128xf32>
    %524 = arith.select %521, %487, %523 : vector<8x128xi1>, vector<8x128xf32>
    %cst_200 = arith.constant 0.000000e+00 : f32
    %525 = vector.broadcast %cst_200 : f32 to vector<8x128xf32>
    %526 = arith.cmpf ogt, %509, %525 : vector<8x128xf32>
    %cst_201 = arith.constant 1.000000e-01 : f32
    %527 = vector.broadcast %cst_201 : f32 to vector<8x128xf32>
    %528 = arith.mulf %527, %509 : vector<8x128xf32>
    %529 = arith.select %526, %509, %528 : vector<8x128xi1>, vector<8x128xf32>
    %c192 = arith.constant 192 : index
    %c0_202 = arith.constant 0 : index
    %530 = vector.load %arg2[%c192, %c0_202] : memref<272x256xbf16, #tpu.memory_space<vmem>>, vector<8x24xbf16>
    %c160_203 = arith.constant 160 : index
    %c0_204 = arith.constant 0 : index
    %531 = vector.load %arg3[%c160_203, %c0_204] : memref<200x1xf32, #tpu.memory_space<vmem>>, vector<8x1xf32>
    %c1_i32_205 = arith.constant 1 : i32
    %532 = tpu.dynamic_rotate %529 by %c1_i32_205 dim 1 : vector<8x128xf32>, i32 -> vector<8x128xf32>
    %533 = tpu.iota {dimensions = array<i32: 1>} : vector<1x128xi32>
    %c-1_i32_206 = arith.constant -1 : i32
    %534 = vector.broadcast %c-1_i32_206 : i32 to vector<1x128xi32>
    %535 = arith.addi %533, %534 : vector<1x128xi32>
    %c0_i32_207 = arith.constant 0 : i32
    %536 = vector.broadcast %c0_i32_207 : i32 to vector<1x128xi32>
    %537 = arith.cmpi sge, %535, %536 : vector<1x128xi32>
    %c-1_i32_208 = arith.constant -1 : i32
    %538 = vector.broadcast %c-1_i32_208 : i32 to vector<1x128xi32>
    %539 = arith.addi %533, %538 : vector<1x128xi32>
    %c8_i32_209 = arith.constant 8 : i32
    %540 = vector.broadcast %c8_i32_209 : i32 to vector<1x128xi32>
    %541 = arith.cmpi slt, %539, %540 : vector<1x128xi32>
    %542 = arith.andi %537, %541 : vector<1x128xi1>
    %cst_210 = arith.constant 0.000000e+00 : f32
    %543 = vector.shape_cast %542 : vector<1x128xi1> to vector<1x128xi1>
    %544 = vector.broadcast %543 : vector<1x128xi1> to vector<8x128xi1>
    %545 = vector.broadcast %cst_210 : f32 to vector<8x128xf32>
    %546 = arith.select %544, %532, %545 : vector<8x128xi1>, vector<8x128xf32>
    %547 = tpu.concatenate %546, %514, %519 in 0 : vector<8x128xf32>, vector<8x128xf32>, vector<8x128xf32> -> vector<24x128xf32>
    %548 = tpu.concatenate %514, %519, %524 in 0 : vector<8x128xf32>, vector<8x128xf32>, vector<8x128xf32> -> vector<24x128xf32>
    %549 = tpu.concatenate %519, %524, %529 in 0 : vector<8x128xf32>, vector<8x128xf32>, vector<8x128xf32> -> vector<24x128xf32>
    %c127_i32_211 = arith.constant 127 : i32
    %550 = tpu.dynamic_rotate %514 by %c127_i32_211 dim 1 : vector<8x128xf32>, i32 -> vector<8x128xf32>
    %551 = tpu.iota {dimensions = array<i32: 1>} : vector<1x128xi32>
    %c1_i32_212 = arith.constant 1 : i32
    %552 = vector.broadcast %c1_i32_212 : i32 to vector<1x128xi32>
    %553 = arith.addi %551, %552 : vector<1x128xi32>
    %c0_i32_213 = arith.constant 0 : i32
    %554 = vector.broadcast %c0_i32_213 : i32 to vector<1x128xi32>
    %555 = arith.cmpi sge, %553, %554 : vector<1x128xi32>
    %c1_i32_214 = arith.constant 1 : i32
    %556 = vector.broadcast %c1_i32_214 : i32 to vector<1x128xi32>
    %557 = arith.addi %551, %556 : vector<1x128xi32>
    %c8_i32_215 = arith.constant 8 : i32
    %558 = vector.broadcast %c8_i32_215 : i32 to vector<1x128xi32>
    %559 = arith.cmpi slt, %557, %558 : vector<1x128xi32>
    %560 = arith.andi %555, %559 : vector<1x128xi1>
    %cst_216 = arith.constant 0.000000e+00 : f32
    %561 = vector.shape_cast %560 : vector<1x128xi1> to vector<1x128xi1>
    %562 = vector.broadcast %561 : vector<1x128xi1> to vector<8x128xi1>
    %563 = vector.broadcast %cst_216 : f32 to vector<8x128xf32>
    %564 = arith.select %562, %550, %563 : vector<8x128xi1>, vector<8x128xf32>
    %565 = tpu.concatenate %524, %529, %564 in 0 : vector<8x128xf32>, vector<8x128xf32>, vector<8x128xf32> -> vector<24x128xf32>
    %566 = tpu.concatenate %547, %548, %549, %565 in 1 : vector<24x128xf32>, vector<24x128xf32>, vector<24x128xf32>, vector<24x128xf32> -> vector<24x512xf32>
    %567 = arith.truncf %566 : vector<24x512xf32> to vector<24x512xbf16>
    %cst_217 = arith.constant dense<0.000000e+00> : vector<8x512xf32>
    %568 = tpu.matmul %530, %567, %cst_217 {dimension_numbers = #tpu.dot_dimension_numbers<[1], [0], [0], [1], [0, 0, 1, 1], [], []>} : vector<8x24xbf16>, vector<24x512xbf16>, vector<8x512xf32> -> vector<8x512xf32>
    %569 = vector.broadcast %531 : vector<8x1xf32> to vector<8x512xf32>
    %570 = arith.addf %568, %569 : vector<8x512xf32>
    %571 = vector.extract_strided_slice %570 {offsets = [0, 0], sizes = [8, 128], strides = [1, 1]} : vector<8x512xf32> to vector<8x128xf32>
    %572 = vector.extract_strided_slice %570 {offsets = [0, 128], sizes = [8, 128], strides = [1, 1]} : vector<8x512xf32> to vector<8x128xf32>
    %573 = vector.extract_strided_slice %570 {offsets = [0, 256], sizes = [8, 128], strides = [1, 1]} : vector<8x512xf32> to vector<8x128xf32>
    %574 = vector.extract_strided_slice %570 {offsets = [0, 384], sizes = [8, 128], strides = [1, 1]} : vector<8x512xf32> to vector<8x128xf32>
    %575 = arith.addf %473, %571 : vector<8x128xf32>
    %576 = arith.addf %480, %572 : vector<8x128xf32>
    %577 = arith.addf %487, %573 : vector<8x128xf32>
    %578 = arith.addf %509, %574 : vector<8x128xf32>
    %cst_218 = arith.constant 0.000000e+00 : f32
    %579 = vector.broadcast %cst_218 : f32 to vector<8x128xf32>
    %580 = arith.cmpf ogt, %575, %579 : vector<8x128xf32>
    %cst_219 = arith.constant 1.000000e-01 : f32
    %581 = vector.broadcast %cst_219 : f32 to vector<8x128xf32>
    %582 = arith.mulf %581, %575 : vector<8x128xf32>
    %583 = arith.select %580, %575, %582 : vector<8x128xi1>, vector<8x128xf32>
    %cst_220 = arith.constant 0.000000e+00 : f32
    %584 = vector.broadcast %cst_220 : f32 to vector<8x128xf32>
    %585 = arith.cmpf ogt, %576, %584 : vector<8x128xf32>
    %cst_221 = arith.constant 1.000000e-01 : f32
    %586 = vector.broadcast %cst_221 : f32 to vector<8x128xf32>
    %587 = arith.mulf %586, %576 : vector<8x128xf32>
    %588 = arith.select %585, %576, %587 : vector<8x128xi1>, vector<8x128xf32>
    %cst_222 = arith.constant 0.000000e+00 : f32
    %589 = vector.broadcast %cst_222 : f32 to vector<8x128xf32>
    %590 = arith.cmpf ogt, %577, %589 : vector<8x128xf32>
    %cst_223 = arith.constant 1.000000e-01 : f32
    %591 = vector.broadcast %cst_223 : f32 to vector<8x128xf32>
    %592 = arith.mulf %591, %577 : vector<8x128xf32>
    %593 = arith.select %590, %577, %592 : vector<8x128xi1>, vector<8x128xf32>
    %cst_224 = arith.constant 0.000000e+00 : f32
    %594 = vector.broadcast %cst_224 : f32 to vector<8x128xf32>
    %595 = arith.cmpf ogt, %578, %594 : vector<8x128xf32>
    %cst_225 = arith.constant 1.000000e-01 : f32
    %596 = vector.broadcast %cst_225 : f32 to vector<8x128xf32>
    %597 = arith.mulf %596, %578 : vector<8x128xf32>
    %598 = arith.select %595, %578, %597 : vector<8x128xi1>, vector<8x128xf32>
    %c208 = arith.constant 208 : index
    %c0_226 = arith.constant 0 : index
    %599 = vector.load %arg2[%c208, %c0_226] : memref<272x256xbf16, #tpu.memory_space<vmem>>, vector<8x24xbf16>
    %c168 = arith.constant 168 : index
    %c0_227 = arith.constant 0 : index
    %600 = vector.load %arg3[%c168, %c0_227] : memref<200x1xf32, #tpu.memory_space<vmem>>, vector<8x1xf32>
    %c1_i32_228 = arith.constant 1 : i32
    %601 = tpu.dynamic_rotate %588 by %c1_i32_228 dim 1 : vector<8x128xf32>, i32 -> vector<8x128xf32>
    %602 = tpu.iota {dimensions = array<i32: 1>} : vector<1x128xi32>
    %c-1_i32_229 = arith.constant -1 : i32
    %603 = vector.broadcast %c-1_i32_229 : i32 to vector<1x128xi32>
    %604 = arith.addi %602, %603 : vector<1x128xi32>
    %c0_i32_230 = arith.constant 0 : i32
    %605 = vector.broadcast %c0_i32_230 : i32 to vector<1x128xi32>
    %606 = arith.cmpi sge, %604, %605 : vector<1x128xi32>
    %c-1_i32_231 = arith.constant -1 : i32
    %607 = vector.broadcast %c-1_i32_231 : i32 to vector<1x128xi32>
    %608 = arith.addi %602, %607 : vector<1x128xi32>
    %c8_i32_232 = arith.constant 8 : i32
    %609 = vector.broadcast %c8_i32_232 : i32 to vector<1x128xi32>
    %610 = arith.cmpi slt, %608, %609 : vector<1x128xi32>
    %611 = arith.andi %606, %610 : vector<1x128xi1>
    %cst_233 = arith.constant 0.000000e+00 : f32
    %612 = vector.shape_cast %611 : vector<1x128xi1> to vector<1x128xi1>
    %613 = vector.broadcast %612 : vector<1x128xi1> to vector<8x128xi1>
    %614 = vector.broadcast %cst_233 : f32 to vector<8x128xf32>
    %615 = arith.select %613, %601, %614 : vector<8x128xi1>, vector<8x128xf32>
    %616 = tpu.concatenate %615, %583, %598 in 0 : vector<8x128xf32>, vector<8x128xf32>, vector<8x128xf32> -> vector<24x128xf32>
    %c1_i32_234 = arith.constant 1 : i32
    %617 = tpu.dynamic_rotate %593 by %c1_i32_234 dim 1 : vector<8x128xf32>, i32 -> vector<8x128xf32>
    %618 = tpu.iota {dimensions = array<i32: 1>} : vector<1x128xi32>
    %c-1_i32_235 = arith.constant -1 : i32
    %619 = vector.broadcast %c-1_i32_235 : i32 to vector<1x128xi32>
    %620 = arith.addi %618, %619 : vector<1x128xi32>
    %c0_i32_236 = arith.constant 0 : i32
    %621 = vector.broadcast %c0_i32_236 : i32 to vector<1x128xi32>
    %622 = arith.cmpi sge, %620, %621 : vector<1x128xi32>
    %c-1_i32_237 = arith.constant -1 : i32
    %623 = vector.broadcast %c-1_i32_237 : i32 to vector<1x128xi32>
    %624 = arith.addi %618, %623 : vector<1x128xi32>
    %c8_i32_238 = arith.constant 8 : i32
    %625 = vector.broadcast %c8_i32_238 : i32 to vector<1x128xi32>
    %626 = arith.cmpi slt, %624, %625 : vector<1x128xi32>
    %627 = arith.andi %622, %626 : vector<1x128xi1>
    %cst_239 = arith.constant 0.000000e+00 : f32
    %628 = vector.shape_cast %627 : vector<1x128xi1> to vector<1x128xi1>
    %629 = vector.broadcast %628 : vector<1x128xi1> to vector<8x128xi1>
    %630 = vector.broadcast %cst_239 : f32 to vector<8x128xf32>
    %631 = arith.select %629, %617, %630 : vector<8x128xi1>, vector<8x128xf32>
    %c127_i32_240 = arith.constant 127 : i32
    %632 = tpu.dynamic_rotate %583 by %c127_i32_240 dim 1 : vector<8x128xf32>, i32 -> vector<8x128xf32>
    %633 = tpu.iota {dimensions = array<i32: 1>} : vector<1x128xi32>
    %c1_i32_241 = arith.constant 1 : i32
    %634 = vector.broadcast %c1_i32_241 : i32 to vector<1x128xi32>
    %635 = arith.addi %633, %634 : vector<1x128xi32>
    %c0_i32_242 = arith.constant 0 : i32
    %636 = vector.broadcast %c0_i32_242 : i32 to vector<1x128xi32>
    %637 = arith.cmpi sge, %635, %636 : vector<1x128xi32>
    %c1_i32_243 = arith.constant 1 : i32
    %638 = vector.broadcast %c1_i32_243 : i32 to vector<1x128xi32>
    %639 = arith.addi %633, %638 : vector<1x128xi32>
    %c8_i32_244 = arith.constant 8 : i32
    %640 = vector.broadcast %c8_i32_244 : i32 to vector<1x128xi32>
    %641 = arith.cmpi slt, %639, %640 : vector<1x128xi32>
    %642 = arith.andi %637, %641 : vector<1x128xi1>
    %cst_245 = arith.constant 0.000000e+00 : f32
    %643 = vector.shape_cast %642 : vector<1x128xi1> to vector<1x128xi1>
    %644 = vector.broadcast %643 : vector<1x128xi1> to vector<8x128xi1>
    %645 = vector.broadcast %cst_245 : f32 to vector<8x128xf32>
    %646 = arith.select %644, %632, %645 : vector<8x128xi1>, vector<8x128xf32>
    %647 = tpu.concatenate %631, %588, %646 in 0 : vector<8x128xf32>, vector<8x128xf32>, vector<8x128xf32> -> vector<24x128xf32>
    %c1_i32_246 = arith.constant 1 : i32
    %648 = tpu.dynamic_rotate %598 by %c1_i32_246 dim 1 : vector<8x128xf32>, i32 -> vector<8x128xf32>
    %649 = tpu.iota {dimensions = array<i32: 1>} : vector<1x128xi32>
    %c-1_i32_247 = arith.constant -1 : i32
    %650 = vector.broadcast %c-1_i32_247 : i32 to vector<1x128xi32>
    %651 = arith.addi %649, %650 : vector<1x128xi32>
    %c0_i32_248 = arith.constant 0 : i32
    %652 = vector.broadcast %c0_i32_248 : i32 to vector<1x128xi32>
    %653 = arith.cmpi sge, %651, %652 : vector<1x128xi32>
    %c-1_i32_249 = arith.constant -1 : i32
    %654 = vector.broadcast %c-1_i32_249 : i32 to vector<1x128xi32>
    %655 = arith.addi %649, %654 : vector<1x128xi32>
    %c8_i32_250 = arith.constant 8 : i32
    %656 = vector.broadcast %c8_i32_250 : i32 to vector<1x128xi32>
    %657 = arith.cmpi slt, %655, %656 : vector<1x128xi32>
    %658 = arith.andi %653, %657 : vector<1x128xi1>
    %cst_251 = arith.constant 0.000000e+00 : f32
    %659 = vector.shape_cast %658 : vector<1x128xi1> to vector<1x128xi1>
    %660 = vector.broadcast %659 : vector<1x128xi1> to vector<8x128xi1>
    %661 = vector.broadcast %cst_251 : f32 to vector<8x128xf32>
    %662 = arith.select %660, %648, %661 : vector<8x128xi1>, vector<8x128xf32>
    %c127_i32_252 = arith.constant 127 : i32
    %663 = tpu.dynamic_rotate %588 by %c127_i32_252 dim 1 : vector<8x128xf32>, i32 -> vector<8x128xf32>
    %664 = tpu.iota {dimensions = array<i32: 1>} : vector<1x128xi32>
    %c1_i32_253 = arith.constant 1 : i32
    %665 = vector.broadcast %c1_i32_253 : i32 to vector<1x128xi32>
    %666 = arith.addi %664, %665 : vector<1x128xi32>
    %c0_i32_254 = arith.constant 0 : i32
    %667 = vector.broadcast %c0_i32_254 : i32 to vector<1x128xi32>
    %668 = arith.cmpi sge, %666, %667 : vector<1x128xi32>
    %c1_i32_255 = arith.constant 1 : i32
    %669 = vector.broadcast %c1_i32_255 : i32 to vector<1x128xi32>
    %670 = arith.addi %664, %669 : vector<1x128xi32>
    %c8_i32_256 = arith.constant 8 : i32
    %671 = vector.broadcast %c8_i32_256 : i32 to vector<1x128xi32>
    %672 = arith.cmpi slt, %670, %671 : vector<1x128xi32>
    %673 = arith.andi %668, %672 : vector<1x128xi1>
    %cst_257 = arith.constant 0.000000e+00 : f32
    %674 = vector.shape_cast %673 : vector<1x128xi1> to vector<1x128xi1>
    %675 = vector.broadcast %674 : vector<1x128xi1> to vector<8x128xi1>
    %676 = vector.broadcast %cst_257 : f32 to vector<8x128xf32>
    %677 = arith.select %675, %663, %676 : vector<8x128xi1>, vector<8x128xf32>
    %678 = tpu.concatenate %662, %593, %677 in 0 : vector<8x128xf32>, vector<8x128xf32>, vector<8x128xf32> -> vector<24x128xf32>
    %c127_i32_258 = arith.constant 127 : i32
    %679 = tpu.dynamic_rotate %593 by %c127_i32_258 dim 1 : vector<8x128xf32>, i32 -> vector<8x128xf32>
    %680 = tpu.iota {dimensions = array<i32: 1>} : vector<1x128xi32>
    %c1_i32_259 = arith.constant 1 : i32
    %681 = vector.broadcast %c1_i32_259 : i32 to vector<1x128xi32>
    %682 = arith.addi %680, %681 : vector<1x128xi32>
    %c0_i32_260 = arith.constant 0 : i32
    %683 = vector.broadcast %c0_i32_260 : i32 to vector<1x128xi32>
    %684 = arith.cmpi sge, %682, %683 : vector<1x128xi32>
    %c1_i32_261 = arith.constant 1 : i32
    %685 = vector.broadcast %c1_i32_261 : i32 to vector<1x128xi32>
    %686 = arith.addi %680, %685 : vector<1x128xi32>
    %c8_i32_262 = arith.constant 8 : i32
    %687 = vector.broadcast %c8_i32_262 : i32 to vector<1x128xi32>
    %688 = arith.cmpi slt, %686, %687 : vector<1x128xi32>
    %689 = arith.andi %684, %688 : vector<1x128xi1>
    %cst_263 = arith.constant 0.000000e+00 : f32
    %690 = vector.shape_cast %689 : vector<1x128xi1> to vector<1x128xi1>
    %691 = vector.broadcast %690 : vector<1x128xi1> to vector<8x128xi1>
    %692 = vector.broadcast %cst_263 : f32 to vector<8x128xf32>
    %693 = arith.select %691, %679, %692 : vector<8x128xi1>, vector<8x128xf32>
    %694 = tpu.concatenate %583, %598, %693 in 0 : vector<8x128xf32>, vector<8x128xf32>, vector<8x128xf32> -> vector<24x128xf32>
    %695 = tpu.concatenate %616, %647, %678, %694 in 1 : vector<24x128xf32>, vector<24x128xf32>, vector<24x128xf32>, vector<24x128xf32> -> vector<24x512xf32>
    %696 = arith.truncf %695 : vector<24x512xf32> to vector<24x512xbf16>
    %cst_264 = arith.constant dense<0.000000e+00> : vector<8x512xf32>
    %697 = tpu.matmul %599, %696, %cst_264 {dimension_numbers = #tpu.dot_dimension_numbers<[1], [0], [0], [1], [0, 0, 1, 1], [], []>} : vector<8x24xbf16>, vector<24x512xbf16>, vector<8x512xf32> -> vector<8x512xf32>
    %698 = vector.broadcast %600 : vector<8x1xf32> to vector<8x512xf32>
    %699 = arith.addf %697, %698 : vector<8x512xf32>
    %700 = vector.extract_strided_slice %699 {offsets = [0, 0], sizes = [8, 128], strides = [1, 1]} : vector<8x512xf32> to vector<8x128xf32>
    %701 = vector.extract_strided_slice %699 {offsets = [0, 128], sizes = [8, 128], strides = [1, 1]} : vector<8x512xf32> to vector<8x128xf32>
    %702 = vector.extract_strided_slice %699 {offsets = [0, 256], sizes = [8, 128], strides = [1, 1]} : vector<8x512xf32> to vector<8x128xf32>
    %703 = vector.extract_strided_slice %699 {offsets = [0, 384], sizes = [8, 128], strides = [1, 1]} : vector<8x512xf32> to vector<8x128xf32>
    %704 = arith.addf %575, %700 : vector<8x128xf32>
    %705 = arith.addf %576, %701 : vector<8x128xf32>
    %706 = arith.addf %577, %702 : vector<8x128xf32>
    %707 = arith.addf %578, %703 : vector<8x128xf32>
    %cst_265 = arith.constant 0.000000e+00 : f32
    %708 = vector.broadcast %cst_265 : f32 to vector<8x128xf32>
    %709 = arith.cmpf ogt, %473, %708 : vector<8x128xf32>
    %cst_266 = arith.constant 1.000000e-01 : f32
    %710 = vector.broadcast %cst_266 : f32 to vector<8x128xf32>
    %711 = arith.mulf %710, %473 : vector<8x128xf32>
    %712 = arith.select %709, %473, %711 : vector<8x128xi1>, vector<8x128xf32>
    %cst_267 = arith.constant 0.000000e+00 : f32
    %713 = vector.broadcast %cst_267 : f32 to vector<8x128xf32>
    %714 = arith.cmpf ogt, %480, %713 : vector<8x128xf32>
    %cst_268 = arith.constant 1.000000e-01 : f32
    %715 = vector.broadcast %cst_268 : f32 to vector<8x128xf32>
    %716 = arith.mulf %715, %480 : vector<8x128xf32>
    %717 = arith.select %714, %480, %716 : vector<8x128xi1>, vector<8x128xf32>
    %cst_269 = arith.constant 0.000000e+00 : f32
    %718 = vector.broadcast %cst_269 : f32 to vector<8x128xf32>
    %719 = arith.cmpf ogt, %487, %718 : vector<8x128xf32>
    %cst_270 = arith.constant 1.000000e-01 : f32
    %720 = vector.broadcast %cst_270 : f32 to vector<8x128xf32>
    %721 = arith.mulf %720, %487 : vector<8x128xf32>
    %722 = arith.select %719, %487, %721 : vector<8x128xi1>, vector<8x128xf32>
    %cst_271 = arith.constant 0.000000e+00 : f32
    %723 = vector.broadcast %cst_271 : f32 to vector<8x128xf32>
    %724 = arith.cmpf ogt, %509, %723 : vector<8x128xf32>
    %cst_272 = arith.constant 1.000000e-01 : f32
    %725 = vector.broadcast %cst_272 : f32 to vector<8x128xf32>
    %726 = arith.mulf %725, %509 : vector<8x128xf32>
    %727 = arith.select %724, %509, %726 : vector<8x128xi1>, vector<8x128xf32>
    %c224 = arith.constant 224 : index
    %c0_273 = arith.constant 0 : index
    %728 = vector.load %arg2[%c224, %c0_273] : memref<272x256xbf16, #tpu.memory_space<vmem>>, vector<8x24xbf16>
    %c176_274 = arith.constant 176 : index
    %c0_275 = arith.constant 0 : index
    %729 = vector.load %arg3[%c176_274, %c0_275] : memref<200x1xf32, #tpu.memory_space<vmem>>, vector<8x1xf32>
    %c1_i32_276 = arith.constant 1 : i32
    %730 = tpu.dynamic_rotate %727 by %c1_i32_276 dim 1 : vector<8x128xf32>, i32 -> vector<8x128xf32>
    %731 = tpu.iota {dimensions = array<i32: 1>} : vector<1x128xi32>
    %c-1_i32_277 = arith.constant -1 : i32
    %732 = vector.broadcast %c-1_i32_277 : i32 to vector<1x128xi32>
    %733 = arith.addi %731, %732 : vector<1x128xi32>
    %c0_i32_278 = arith.constant 0 : i32
    %734 = vector.broadcast %c0_i32_278 : i32 to vector<1x128xi32>
    %735 = arith.cmpi sge, %733, %734 : vector<1x128xi32>
    %c-1_i32_279 = arith.constant -1 : i32
    %736 = vector.broadcast %c-1_i32_279 : i32 to vector<1x128xi32>
    %737 = arith.addi %731, %736 : vector<1x128xi32>
    %c8_i32_280 = arith.constant 8 : i32
    %738 = vector.broadcast %c8_i32_280 : i32 to vector<1x128xi32>
    %739 = arith.cmpi slt, %737, %738 : vector<1x128xi32>
    %740 = arith.andi %735, %739 : vector<1x128xi1>
    %cst_281 = arith.constant 0.000000e+00 : f32
    %741 = vector.shape_cast %740 : vector<1x128xi1> to vector<1x128xi1>
    %742 = vector.broadcast %741 : vector<1x128xi1> to vector<8x128xi1>
    %743 = vector.broadcast %cst_281 : f32 to vector<8x128xf32>
    %744 = arith.select %742, %730, %743 : vector<8x128xi1>, vector<8x128xf32>
    %745 = tpu.concatenate %744, %712, %717 in 0 : vector<8x128xf32>, vector<8x128xf32>, vector<8x128xf32> -> vector<24x128xf32>
    %746 = tpu.concatenate %712, %717, %722 in 0 : vector<8x128xf32>, vector<8x128xf32>, vector<8x128xf32> -> vector<24x128xf32>
    %747 = tpu.concatenate %717, %722, %727 in 0 : vector<8x128xf32>, vector<8x128xf32>, vector<8x128xf32> -> vector<24x128xf32>
    %c127_i32_282 = arith.constant 127 : i32
    %748 = tpu.dynamic_rotate %712 by %c127_i32_282 dim 1 : vector<8x128xf32>, i32 -> vector<8x128xf32>
    %749 = tpu.iota {dimensions = array<i32: 1>} : vector<1x128xi32>
    %c1_i32_283 = arith.constant 1 : i32
    %750 = vector.broadcast %c1_i32_283 : i32 to vector<1x128xi32>
    %751 = arith.addi %749, %750 : vector<1x128xi32>
    %c0_i32_284 = arith.constant 0 : i32
    %752 = vector.broadcast %c0_i32_284 : i32 to vector<1x128xi32>
    %753 = arith.cmpi sge, %751, %752 : vector<1x128xi32>
    %c1_i32_285 = arith.constant 1 : i32
    %754 = vector.broadcast %c1_i32_285 : i32 to vector<1x128xi32>
    %755 = arith.addi %749, %754 : vector<1x128xi32>
    %c8_i32_286 = arith.constant 8 : i32
    %756 = vector.broadcast %c8_i32_286 : i32 to vector<1x128xi32>
    %757 = arith.cmpi slt, %755, %756 : vector<1x128xi32>
    %758 = arith.andi %753, %757 : vector<1x128xi1>
    %cst_287 = arith.constant 0.000000e+00 : f32
    %759 = vector.shape_cast %758 : vector<1x128xi1> to vector<1x128xi1>
    %760 = vector.broadcast %759 : vector<1x128xi1> to vector<8x128xi1>
    %761 = vector.broadcast %cst_287 : f32 to vector<8x128xf32>
    %762 = arith.select %760, %748, %761 : vector<8x128xi1>, vector<8x128xf32>
    %763 = tpu.concatenate %722, %727, %762 in 0 : vector<8x128xf32>, vector<8x128xf32>, vector<8x128xf32> -> vector<24x128xf32>
    %764 = tpu.concatenate %745, %746, %747, %763 in 1 : vector<24x128xf32>, vector<24x128xf32>, vector<24x128xf32>, vector<24x128xf32> -> vector<24x512xf32>
    %765 = arith.truncf %764 : vector<24x512xf32> to vector<24x512xbf16>
    %cst_288 = arith.constant dense<0.000000e+00> : vector<8x512xf32>
    %766 = tpu.matmul %728, %765, %cst_288 {dimension_numbers = #tpu.dot_dimension_numbers<[1], [0], [0], [1], [0, 0, 1, 1], [], []>} : vector<8x24xbf16>, vector<24x512xbf16>, vector<8x512xf32> -> vector<8x512xf32>
    %767 = vector.broadcast %729 : vector<8x1xf32> to vector<8x512xf32>
    %768 = arith.addf %766, %767 : vector<8x512xf32>
    %769 = vector.extract_strided_slice %768 {offsets = [0, 0], sizes = [8, 128], strides = [1, 1]} : vector<8x512xf32> to vector<8x128xf32>
    %770 = vector.extract_strided_slice %768 {offsets = [0, 128], sizes = [8, 128], strides = [1, 1]} : vector<8x512xf32> to vector<8x128xf32>
    %771 = vector.extract_strided_slice %768 {offsets = [0, 256], sizes = [8, 128], strides = [1, 1]} : vector<8x512xf32> to vector<8x128xf32>
    %772 = vector.extract_strided_slice %768 {offsets = [0, 384], sizes = [8, 128], strides = [1, 1]} : vector<8x512xf32> to vector<8x128xf32>
    %773 = arith.addf %473, %769 : vector<8x128xf32>
    %774 = arith.addf %480, %770 : vector<8x128xf32>
    %775 = arith.addf %487, %771 : vector<8x128xf32>
    %776 = arith.addf %509, %772 : vector<8x128xf32>
    %cst_289 = arith.constant 0.000000e+00 : f32
    %777 = vector.broadcast %cst_289 : f32 to vector<8x128xf32>
    %778 = arith.cmpf ogt, %773, %777 : vector<8x128xf32>
    %cst_290 = arith.constant 1.000000e-01 : f32
    %779 = vector.broadcast %cst_290 : f32 to vector<8x128xf32>
    %780 = arith.mulf %779, %773 : vector<8x128xf32>
    %781 = arith.select %778, %773, %780 : vector<8x128xi1>, vector<8x128xf32>
    %cst_291 = arith.constant 0.000000e+00 : f32
    %782 = vector.broadcast %cst_291 : f32 to vector<8x128xf32>
    %783 = arith.cmpf ogt, %774, %782 : vector<8x128xf32>
    %cst_292 = arith.constant 1.000000e-01 : f32
    %784 = vector.broadcast %cst_292 : f32 to vector<8x128xf32>
    %785 = arith.mulf %784, %774 : vector<8x128xf32>
    %786 = arith.select %783, %774, %785 : vector<8x128xi1>, vector<8x128xf32>
    %cst_293 = arith.constant 0.000000e+00 : f32
    %787 = vector.broadcast %cst_293 : f32 to vector<8x128xf32>
    %788 = arith.cmpf ogt, %775, %787 : vector<8x128xf32>
    %cst_294 = arith.constant 1.000000e-01 : f32
    %789 = vector.broadcast %cst_294 : f32 to vector<8x128xf32>
    %790 = arith.mulf %789, %775 : vector<8x128xf32>
    %791 = arith.select %788, %775, %790 : vector<8x128xi1>, vector<8x128xf32>
    %cst_295 = arith.constant 0.000000e+00 : f32
    %792 = vector.broadcast %cst_295 : f32 to vector<8x128xf32>
    %793 = arith.cmpf ogt, %776, %792 : vector<8x128xf32>
    %cst_296 = arith.constant 1.000000e-01 : f32
    %794 = vector.broadcast %cst_296 : f32 to vector<8x128xf32>
    %795 = arith.mulf %794, %776 : vector<8x128xf32>
    %796 = arith.select %793, %776, %795 : vector<8x128xi1>, vector<8x128xf32>
    %c240 = arith.constant 240 : index
    %c0_297 = arith.constant 0 : index
    %797 = vector.load %arg2[%c240, %c0_297] : memref<272x256xbf16, #tpu.memory_space<vmem>>, vector<8x24xbf16>
    %c184 = arith.constant 184 : index
    %c0_298 = arith.constant 0 : index
    %798 = vector.load %arg3[%c184, %c0_298] : memref<200x1xf32, #tpu.memory_space<vmem>>, vector<8x1xf32>
    %c1_i32_299 = arith.constant 1 : i32
    %799 = tpu.dynamic_rotate %786 by %c1_i32_299 dim 1 : vector<8x128xf32>, i32 -> vector<8x128xf32>
    %800 = tpu.iota {dimensions = array<i32: 1>} : vector<1x128xi32>
    %c-1_i32_300 = arith.constant -1 : i32
    %801 = vector.broadcast %c-1_i32_300 : i32 to vector<1x128xi32>
    %802 = arith.addi %800, %801 : vector<1x128xi32>
    %c0_i32_301 = arith.constant 0 : i32
    %803 = vector.broadcast %c0_i32_301 : i32 to vector<1x128xi32>
    %804 = arith.cmpi sge, %802, %803 : vector<1x128xi32>
    %c-1_i32_302 = arith.constant -1 : i32
    %805 = vector.broadcast %c-1_i32_302 : i32 to vector<1x128xi32>
    %806 = arith.addi %800, %805 : vector<1x128xi32>
    %c8_i32_303 = arith.constant 8 : i32
    %807 = vector.broadcast %c8_i32_303 : i32 to vector<1x128xi32>
    %808 = arith.cmpi slt, %806, %807 : vector<1x128xi32>
    %809 = arith.andi %804, %808 : vector<1x128xi1>
    %cst_304 = arith.constant 0.000000e+00 : f32
    %810 = vector.shape_cast %809 : vector<1x128xi1> to vector<1x128xi1>
    %811 = vector.broadcast %810 : vector<1x128xi1> to vector<8x128xi1>
    %812 = vector.broadcast %cst_304 : f32 to vector<8x128xf32>
    %813 = arith.select %811, %799, %812 : vector<8x128xi1>, vector<8x128xf32>
    %814 = tpu.concatenate %813, %781, %796 in 0 : vector<8x128xf32>, vector<8x128xf32>, vector<8x128xf32> -> vector<24x128xf32>
    %c1_i32_305 = arith.constant 1 : i32
    %815 = tpu.dynamic_rotate %791 by %c1_i32_305 dim 1 : vector<8x128xf32>, i32 -> vector<8x128xf32>
    %816 = tpu.iota {dimensions = array<i32: 1>} : vector<1x128xi32>
    %c-1_i32_306 = arith.constant -1 : i32
    %817 = vector.broadcast %c-1_i32_306 : i32 to vector<1x128xi32>
    %818 = arith.addi %816, %817 : vector<1x128xi32>
    %c0_i32_307 = arith.constant 0 : i32
    %819 = vector.broadcast %c0_i32_307 : i32 to vector<1x128xi32>
    %820 = arith.cmpi sge, %818, %819 : vector<1x128xi32>
    %c-1_i32_308 = arith.constant -1 : i32
    %821 = vector.broadcast %c-1_i32_308 : i32 to vector<1x128xi32>
    %822 = arith.addi %816, %821 : vector<1x128xi32>
    %c8_i32_309 = arith.constant 8 : i32
    %823 = vector.broadcast %c8_i32_309 : i32 to vector<1x128xi32>
    %824 = arith.cmpi slt, %822, %823 : vector<1x128xi32>
    %825 = arith.andi %820, %824 : vector<1x128xi1>
    %cst_310 = arith.constant 0.000000e+00 : f32
    %826 = vector.shape_cast %825 : vector<1x128xi1> to vector<1x128xi1>
    %827 = vector.broadcast %826 : vector<1x128xi1> to vector<8x128xi1>
    %828 = vector.broadcast %cst_310 : f32 to vector<8x128xf32>
    %829 = arith.select %827, %815, %828 : vector<8x128xi1>, vector<8x128xf32>
    %c127_i32_311 = arith.constant 127 : i32
    %830 = tpu.dynamic_rotate %781 by %c127_i32_311 dim 1 : vector<8x128xf32>, i32 -> vector<8x128xf32>
    %831 = tpu.iota {dimensions = array<i32: 1>} : vector<1x128xi32>
    %c1_i32_312 = arith.constant 1 : i32
    %832 = vector.broadcast %c1_i32_312 : i32 to vector<1x128xi32>
    %833 = arith.addi %831, %832 : vector<1x128xi32>
    %c0_i32_313 = arith.constant 0 : i32
    %834 = vector.broadcast %c0_i32_313 : i32 to vector<1x128xi32>
    %835 = arith.cmpi sge, %833, %834 : vector<1x128xi32>
    %c1_i32_314 = arith.constant 1 : i32
    %836 = vector.broadcast %c1_i32_314 : i32 to vector<1x128xi32>
    %837 = arith.addi %831, %836 : vector<1x128xi32>
    %c8_i32_315 = arith.constant 8 : i32
    %838 = vector.broadcast %c8_i32_315 : i32 to vector<1x128xi32>
    %839 = arith.cmpi slt, %837, %838 : vector<1x128xi32>
    %840 = arith.andi %835, %839 : vector<1x128xi1>
    %cst_316 = arith.constant 0.000000e+00 : f32
    %841 = vector.shape_cast %840 : vector<1x128xi1> to vector<1x128xi1>
    %842 = vector.broadcast %841 : vector<1x128xi1> to vector<8x128xi1>
    %843 = vector.broadcast %cst_316 : f32 to vector<8x128xf32>
    %844 = arith.select %842, %830, %843 : vector<8x128xi1>, vector<8x128xf32>
    %845 = tpu.concatenate %829, %786, %844 in 0 : vector<8x128xf32>, vector<8x128xf32>, vector<8x128xf32> -> vector<24x128xf32>
    %c1_i32_317 = arith.constant 1 : i32
    %846 = tpu.dynamic_rotate %796 by %c1_i32_317 dim 1 : vector<8x128xf32>, i32 -> vector<8x128xf32>
    %847 = tpu.iota {dimensions = array<i32: 1>} : vector<1x128xi32>
    %c-1_i32_318 = arith.constant -1 : i32
    %848 = vector.broadcast %c-1_i32_318 : i32 to vector<1x128xi32>
    %849 = arith.addi %847, %848 : vector<1x128xi32>
    %c0_i32_319 = arith.constant 0 : i32
    %850 = vector.broadcast %c0_i32_319 : i32 to vector<1x128xi32>
    %851 = arith.cmpi sge, %849, %850 : vector<1x128xi32>
    %c-1_i32_320 = arith.constant -1 : i32
    %852 = vector.broadcast %c-1_i32_320 : i32 to vector<1x128xi32>
    %853 = arith.addi %847, %852 : vector<1x128xi32>
    %c8_i32_321 = arith.constant 8 : i32
    %854 = vector.broadcast %c8_i32_321 : i32 to vector<1x128xi32>
    %855 = arith.cmpi slt, %853, %854 : vector<1x128xi32>
    %856 = arith.andi %851, %855 : vector<1x128xi1>
    %cst_322 = arith.constant 0.000000e+00 : f32
    %857 = vector.shape_cast %856 : vector<1x128xi1> to vector<1x128xi1>
    %858 = vector.broadcast %857 : vector<1x128xi1> to vector<8x128xi1>
    %859 = vector.broadcast %cst_322 : f32 to vector<8x128xf32>
    %860 = arith.select %858, %846, %859 : vector<8x128xi1>, vector<8x128xf32>
    %c127_i32_323 = arith.constant 127 : i32
    %861 = tpu.dynamic_rotate %786 by %c127_i32_323 dim 1 : vector<8x128xf32>, i32 -> vector<8x128xf32>
    %862 = tpu.iota {dimensions = array<i32: 1>} : vector<1x128xi32>
    %c1_i32_324 = arith.constant 1 : i32
    %863 = vector.broadcast %c1_i32_324 : i32 to vector<1x128xi32>
    %864 = arith.addi %862, %863 : vector<1x128xi32>
    %c0_i32_325 = arith.constant 0 : i32
    %865 = vector.broadcast %c0_i32_325 : i32 to vector<1x128xi32>
    %866 = arith.cmpi sge, %864, %865 : vector<1x128xi32>
    %c1_i32_326 = arith.constant 1 : i32
    %867 = vector.broadcast %c1_i32_326 : i32 to vector<1x128xi32>
    %868 = arith.addi %862, %867 : vector<1x128xi32>
    %c8_i32_327 = arith.constant 8 : i32
    %869 = vector.broadcast %c8_i32_327 : i32 to vector<1x128xi32>
    %870 = arith.cmpi slt, %868, %869 : vector<1x128xi32>
    %871 = arith.andi %866, %870 : vector<1x128xi1>
    %cst_328 = arith.constant 0.000000e+00 : f32
    %872 = vector.shape_cast %871 : vector<1x128xi1> to vector<1x128xi1>
    %873 = vector.broadcast %872 : vector<1x128xi1> to vector<8x128xi1>
    %874 = vector.broadcast %cst_328 : f32 to vector<8x128xf32>
    %875 = arith.select %873, %861, %874 : vector<8x128xi1>, vector<8x128xf32>
    %876 = tpu.concatenate %860, %791, %875 in 0 : vector<8x128xf32>, vector<8x128xf32>, vector<8x128xf32> -> vector<24x128xf32>
    %c127_i32_329 = arith.constant 127 : i32
    %877 = tpu.dynamic_rotate %791 by %c127_i32_329 dim 1 : vector<8x128xf32>, i32 -> vector<8x128xf32>
    %878 = tpu.iota {dimensions = array<i32: 1>} : vector<1x128xi32>
    %c1_i32_330 = arith.constant 1 : i32
    %879 = vector.broadcast %c1_i32_330 : i32 to vector<1x128xi32>
    %880 = arith.addi %878, %879 : vector<1x128xi32>
    %c0_i32_331 = arith.constant 0 : i32
    %881 = vector.broadcast %c0_i32_331 : i32 to vector<1x128xi32>
    %882 = arith.cmpi sge, %880, %881 : vector<1x128xi32>
    %c1_i32_332 = arith.constant 1 : i32
    %883 = vector.broadcast %c1_i32_332 : i32 to vector<1x128xi32>
    %884 = arith.addi %878, %883 : vector<1x128xi32>
    %c8_i32_333 = arith.constant 8 : i32
    %885 = vector.broadcast %c8_i32_333 : i32 to vector<1x128xi32>
    %886 = arith.cmpi slt, %884, %885 : vector<1x128xi32>
    %887 = arith.andi %882, %886 : vector<1x128xi1>
    %cst_334 = arith.constant 0.000000e+00 : f32
    %888 = vector.shape_cast %887 : vector<1x128xi1> to vector<1x128xi1>
    %889 = vector.broadcast %888 : vector<1x128xi1> to vector<8x128xi1>
    %890 = vector.broadcast %cst_334 : f32 to vector<8x128xf32>
    %891 = arith.select %889, %877, %890 : vector<8x128xi1>, vector<8x128xf32>
    %892 = tpu.concatenate %781, %796, %891 in 0 : vector<8x128xf32>, vector<8x128xf32>, vector<8x128xf32> -> vector<24x128xf32>
    %893 = tpu.concatenate %814, %845, %876, %892 in 1 : vector<24x128xf32>, vector<24x128xf32>, vector<24x128xf32>, vector<24x128xf32> -> vector<24x512xf32>
    %894 = arith.truncf %893 : vector<24x512xf32> to vector<24x512xbf16>
    %cst_335 = arith.constant dense<0.000000e+00> : vector<8x512xf32>
    %895 = tpu.matmul %797, %894, %cst_335 {dimension_numbers = #tpu.dot_dimension_numbers<[1], [0], [0], [1], [0, 0, 1, 1], [], []>} : vector<8x24xbf16>, vector<24x512xbf16>, vector<8x512xf32> -> vector<8x512xf32>
    %896 = vector.broadcast %798 : vector<8x1xf32> to vector<8x512xf32>
    %897 = arith.addf %895, %896 : vector<8x512xf32>
    %898 = vector.extract_strided_slice %897 {offsets = [0, 0], sizes = [8, 128], strides = [1, 1]} : vector<8x512xf32> to vector<8x128xf32>
    %899 = vector.extract_strided_slice %897 {offsets = [0, 128], sizes = [8, 128], strides = [1, 1]} : vector<8x512xf32> to vector<8x128xf32>
    %900 = vector.extract_strided_slice %897 {offsets = [0, 256], sizes = [8, 128], strides = [1, 1]} : vector<8x512xf32> to vector<8x128xf32>
    %901 = vector.extract_strided_slice %897 {offsets = [0, 384], sizes = [8, 128], strides = [1, 1]} : vector<8x512xf32> to vector<8x128xf32>
    %902 = arith.addf %773, %898 : vector<8x128xf32>
    %903 = arith.addf %774, %899 : vector<8x128xf32>
    %904 = arith.addf %775, %900 : vector<8x128xf32>
    %905 = arith.addf %776, %901 : vector<8x128xf32>
    %906 = arith.addf %704, %902 : vector<8x128xf32>
    %907 = arith.addf %705, %903 : vector<8x128xf32>
    %908 = arith.addf %706, %904 : vector<8x128xf32>
    %909 = arith.addf %707, %905 : vector<8x128xf32>
    %cst_336 = arith.constant 5.000000e-01 : f32
    %910 = vector.broadcast %cst_336 : f32 to vector<8x128xf32>
    %911 = arith.mulf %906, %910 : vector<8x128xf32>
    %cst_337 = arith.constant 5.000000e-01 : f32
    %912 = vector.broadcast %cst_337 : f32 to vector<8x128xf32>
    %913 = arith.mulf %907, %912 : vector<8x128xf32>
    %cst_338 = arith.constant 5.000000e-01 : f32
    %914 = vector.broadcast %cst_338 : f32 to vector<8x128xf32>
    %915 = arith.mulf %908, %914 : vector<8x128xf32>
    %cst_339 = arith.constant 5.000000e-01 : f32
    %916 = vector.broadcast %cst_339 : f32 to vector<8x128xf32>
    %917 = arith.mulf %909, %916 : vector<8x128xf32>
    %cst_340 = arith.constant 0.000000e+00 : f32
    %918 = vector.broadcast %cst_340 : f32 to vector<8x128xf32>
    %919 = arith.cmpf ogt, %911, %918 : vector<8x128xf32>
    %cst_341 = arith.constant 1.000000e-01 : f32
    %920 = vector.broadcast %cst_341 : f32 to vector<8x128xf32>
    %921 = arith.mulf %920, %911 : vector<8x128xf32>
    %922 = arith.select %919, %911, %921 : vector<8x128xi1>, vector<8x128xf32>
    %cst_342 = arith.constant 0.000000e+00 : f32
    %923 = vector.broadcast %cst_342 : f32 to vector<8x128xf32>
    %924 = arith.cmpf ogt, %913, %923 : vector<8x128xf32>
    %cst_343 = arith.constant 1.000000e-01 : f32
    %925 = vector.broadcast %cst_343 : f32 to vector<8x128xf32>
    %926 = arith.mulf %925, %913 : vector<8x128xf32>
    %927 = arith.select %924, %913, %926 : vector<8x128xi1>, vector<8x128xf32>
    %cst_344 = arith.constant 0.000000e+00 : f32
    %928 = vector.broadcast %cst_344 : f32 to vector<8x128xf32>
    %929 = arith.cmpf ogt, %915, %928 : vector<8x128xf32>
    %cst_345 = arith.constant 1.000000e-01 : f32
    %930 = vector.broadcast %cst_345 : f32 to vector<8x128xf32>
    %931 = arith.mulf %930, %915 : vector<8x128xf32>
    %932 = arith.select %929, %915, %931 : vector<8x128xi1>, vector<8x128xf32>
    %cst_346 = arith.constant 0.000000e+00 : f32
    %933 = vector.broadcast %cst_346 : f32 to vector<8x128xf32>
    %934 = arith.cmpf ogt, %917, %933 : vector<8x128xf32>
    %cst_347 = arith.constant 1.000000e-01 : f32
    %935 = vector.broadcast %cst_347 : f32 to vector<8x128xf32>
    %936 = arith.mulf %935, %917 : vector<8x128xf32>
    %937 = arith.select %934, %917, %936 : vector<8x128xi1>, vector<8x128xf32>
    %c256 = arith.constant 256 : index
    %c0_348 = arith.constant 0 : index
    %938 = vector.load %arg2[%c256, %c0_348] : memref<272x256xbf16, #tpu.memory_space<vmem>>, vector<1x56xbf16>
    %c192_349 = arith.constant 192 : index
    %c0_350 = arith.constant 0 : index
    %939 = vector.load %arg3[%c192_349, %c0_350] : memref<200x1xf32, #tpu.memory_space<vmem>>, vector<1x1xf32>
    %c1_i32_351 = arith.constant 1 : i32
    %940 = tpu.dynamic_rotate %927 by %c1_i32_351 dim 1 : vector<8x128xf32>, i32 -> vector<8x128xf32>
    %941 = tpu.iota {dimensions = array<i32: 1>} : vector<1x128xi32>
    %c-1_i32_352 = arith.constant -1 : i32
    %942 = vector.broadcast %c-1_i32_352 : i32 to vector<1x128xi32>
    %943 = arith.addi %941, %942 : vector<1x128xi32>
    %c0_i32_353 = arith.constant 0 : i32
    %944 = vector.broadcast %c0_i32_353 : i32 to vector<1x128xi32>
    %945 = arith.cmpi sge, %943, %944 : vector<1x128xi32>
    %c-1_i32_354 = arith.constant -1 : i32
    %946 = vector.broadcast %c-1_i32_354 : i32 to vector<1x128xi32>
    %947 = arith.addi %941, %946 : vector<1x128xi32>
    %c8_i32_355 = arith.constant 8 : i32
    %948 = vector.broadcast %c8_i32_355 : i32 to vector<1x128xi32>
    %949 = arith.cmpi slt, %947, %948 : vector<1x128xi32>
    %950 = arith.andi %945, %949 : vector<1x128xi1>
    %cst_356 = arith.constant 0.000000e+00 : f32
    %951 = vector.shape_cast %950 : vector<1x128xi1> to vector<1x128xi1>
    %952 = vector.broadcast %951 : vector<1x128xi1> to vector<8x128xi1>
    %953 = vector.broadcast %cst_356 : f32 to vector<8x128xf32>
    %954 = arith.select %952, %940, %953 : vector<8x128xi1>, vector<8x128xf32>
    %c1_i32_357 = arith.constant 1 : i32
    %955 = tpu.dynamic_rotate %932 by %c1_i32_357 dim 1 : vector<8x128xf32>, i32 -> vector<8x128xf32>
    %956 = tpu.iota {dimensions = array<i32: 1>} : vector<1x128xi32>
    %c-1_i32_358 = arith.constant -1 : i32
    %957 = vector.broadcast %c-1_i32_358 : i32 to vector<1x128xi32>
    %958 = arith.addi %956, %957 : vector<1x128xi32>
    %c0_i32_359 = arith.constant 0 : i32
    %959 = vector.broadcast %c0_i32_359 : i32 to vector<1x128xi32>
    %960 = arith.cmpi sge, %958, %959 : vector<1x128xi32>
    %c-1_i32_360 = arith.constant -1 : i32
    %961 = vector.broadcast %c-1_i32_360 : i32 to vector<1x128xi32>
    %962 = arith.addi %956, %961 : vector<1x128xi32>
    %c8_i32_361 = arith.constant 8 : i32
    %963 = vector.broadcast %c8_i32_361 : i32 to vector<1x128xi32>
    %964 = arith.cmpi slt, %962, %963 : vector<1x128xi32>
    %965 = arith.andi %960, %964 : vector<1x128xi1>
    %cst_362 = arith.constant 0.000000e+00 : f32
    %966 = vector.shape_cast %965 : vector<1x128xi1> to vector<1x128xi1>
    %967 = vector.broadcast %966 : vector<1x128xi1> to vector<8x128xi1>
    %968 = vector.broadcast %cst_362 : f32 to vector<8x128xf32>
    %969 = arith.select %967, %955, %968 : vector<8x128xi1>, vector<8x128xf32>
    %c1_i32_363 = arith.constant 1 : i32
    %970 = tpu.dynamic_rotate %937 by %c1_i32_363 dim 1 : vector<8x128xf32>, i32 -> vector<8x128xf32>
    %971 = tpu.iota {dimensions = array<i32: 1>} : vector<1x128xi32>
    %c-1_i32_364 = arith.constant -1 : i32
    %972 = vector.broadcast %c-1_i32_364 : i32 to vector<1x128xi32>
    %973 = arith.addi %971, %972 : vector<1x128xi32>
    %c0_i32_365 = arith.constant 0 : i32
    %974 = vector.broadcast %c0_i32_365 : i32 to vector<1x128xi32>
    %975 = arith.cmpi sge, %973, %974 : vector<1x128xi32>
    %c-1_i32_366 = arith.constant -1 : i32
    %976 = vector.broadcast %c-1_i32_366 : i32 to vector<1x128xi32>
    %977 = arith.addi %971, %976 : vector<1x128xi32>
    %c8_i32_367 = arith.constant 8 : i32
    %978 = vector.broadcast %c8_i32_367 : i32 to vector<1x128xi32>
    %979 = arith.cmpi slt, %977, %978 : vector<1x128xi32>
    %980 = arith.andi %975, %979 : vector<1x128xi1>
    %cst_368 = arith.constant 0.000000e+00 : f32
    %981 = vector.shape_cast %980 : vector<1x128xi1> to vector<1x128xi1>
    %982 = vector.broadcast %981 : vector<1x128xi1> to vector<8x128xi1>
    %983 = vector.broadcast %cst_368 : f32 to vector<8x128xf32>
    %984 = arith.select %982, %970, %983 : vector<8x128xi1>, vector<8x128xf32>
    %985 = tpu.concatenate %954, %969, %984, %922, %927, %932, %937 in 0 : vector<8x128xf32>, vector<8x128xf32>, vector<8x128xf32>, vector<8x128xf32>, vector<8x128xf32>, vector<8x128xf32>, vector<8x128xf32> -> vector<56x128xf32>
    %c1_i32_369 = arith.constant 1 : i32
    %986 = tpu.dynamic_rotate %932 by %c1_i32_369 dim 1 : vector<8x128xf32>, i32 -> vector<8x128xf32>
    %987 = tpu.iota {dimensions = array<i32: 1>} : vector<1x128xi32>
    %c-1_i32_370 = arith.constant -1 : i32
    %988 = vector.broadcast %c-1_i32_370 : i32 to vector<1x128xi32>
    %989 = arith.addi %987, %988 : vector<1x128xi32>
    %c0_i32_371 = arith.constant 0 : i32
    %990 = vector.broadcast %c0_i32_371 : i32 to vector<1x128xi32>
    %991 = arith.cmpi sge, %989, %990 : vector<1x128xi32>
    %c-1_i32_372 = arith.constant -1 : i32
    %992 = vector.broadcast %c-1_i32_372 : i32 to vector<1x128xi32>
    %993 = arith.addi %987, %992 : vector<1x128xi32>
    %c8_i32_373 = arith.constant 8 : i32
    %994 = vector.broadcast %c8_i32_373 : i32 to vector<1x128xi32>
    %995 = arith.cmpi slt, %993, %994 : vector<1x128xi32>
    %996 = arith.andi %991, %995 : vector<1x128xi1>
    %cst_374 = arith.constant 0.000000e+00 : f32
    %997 = vector.shape_cast %996 : vector<1x128xi1> to vector<1x128xi1>
    %998 = vector.broadcast %997 : vector<1x128xi1> to vector<8x128xi1>
    %999 = vector.broadcast %cst_374 : f32 to vector<8x128xf32>
    %1000 = arith.select %998, %986, %999 : vector<8x128xi1>, vector<8x128xf32>
    %c1_i32_375 = arith.constant 1 : i32
    %1001 = tpu.dynamic_rotate %937 by %c1_i32_375 dim 1 : vector<8x128xf32>, i32 -> vector<8x128xf32>
    %1002 = tpu.iota {dimensions = array<i32: 1>} : vector<1x128xi32>
    %c-1_i32_376 = arith.constant -1 : i32
    %1003 = vector.broadcast %c-1_i32_376 : i32 to vector<1x128xi32>
    %1004 = arith.addi %1002, %1003 : vector<1x128xi32>
    %c0_i32_377 = arith.constant 0 : i32
    %1005 = vector.broadcast %c0_i32_377 : i32 to vector<1x128xi32>
    %1006 = arith.cmpi sge, %1004, %1005 : vector<1x128xi32>
    %c-1_i32_378 = arith.constant -1 : i32
    %1007 = vector.broadcast %c-1_i32_378 : i32 to vector<1x128xi32>
    %1008 = arith.addi %1002, %1007 : vector<1x128xi32>
    %c8_i32_379 = arith.constant 8 : i32
    %1009 = vector.broadcast %c8_i32_379 : i32 to vector<1x128xi32>
    %1010 = arith.cmpi slt, %1008, %1009 : vector<1x128xi32>
    %1011 = arith.andi %1006, %1010 : vector<1x128xi1>
    %cst_380 = arith.constant 0.000000e+00 : f32
    %1012 = vector.shape_cast %1011 : vector<1x128xi1> to vector<1x128xi1>
    %1013 = vector.broadcast %1012 : vector<1x128xi1> to vector<8x128xi1>
    %1014 = vector.broadcast %cst_380 : f32 to vector<8x128xf32>
    %1015 = arith.select %1013, %1001, %1014 : vector<8x128xi1>, vector<8x128xf32>
    %c127_i32_381 = arith.constant 127 : i32
    %1016 = tpu.dynamic_rotate %922 by %c127_i32_381 dim 1 : vector<8x128xf32>, i32 -> vector<8x128xf32>
    %1017 = tpu.iota {dimensions = array<i32: 1>} : vector<1x128xi32>
    %c1_i32_382 = arith.constant 1 : i32
    %1018 = vector.broadcast %c1_i32_382 : i32 to vector<1x128xi32>
    %1019 = arith.addi %1017, %1018 : vector<1x128xi32>
    %c0_i32_383 = arith.constant 0 : i32
    %1020 = vector.broadcast %c0_i32_383 : i32 to vector<1x128xi32>
    %1021 = arith.cmpi sge, %1019, %1020 : vector<1x128xi32>
    %c1_i32_384 = arith.constant 1 : i32
    %1022 = vector.broadcast %c1_i32_384 : i32 to vector<1x128xi32>
    %1023 = arith.addi %1017, %1022 : vector<1x128xi32>
    %c8_i32_385 = arith.constant 8 : i32
    %1024 = vector.broadcast %c8_i32_385 : i32 to vector<1x128xi32>
    %1025 = arith.cmpi slt, %1023, %1024 : vector<1x128xi32>
    %1026 = arith.andi %1021, %1025 : vector<1x128xi1>
    %cst_386 = arith.constant 0.000000e+00 : f32
    %1027 = vector.shape_cast %1026 : vector<1x128xi1> to vector<1x128xi1>
    %1028 = vector.broadcast %1027 : vector<1x128xi1> to vector<8x128xi1>
    %1029 = vector.broadcast %cst_386 : f32 to vector<8x128xf32>
    %1030 = arith.select %1028, %1016, %1029 : vector<8x128xi1>, vector<8x128xf32>
    %1031 = tpu.concatenate %1000, %1015, %922, %927, %932, %937, %1030 in 0 : vector<8x128xf32>, vector<8x128xf32>, vector<8x128xf32>, vector<8x128xf32>, vector<8x128xf32>, vector<8x128xf32>, vector<8x128xf32> -> vector<56x128xf32>
    %c1_i32_387 = arith.constant 1 : i32
    %1032 = tpu.dynamic_rotate %937 by %c1_i32_387 dim 1 : vector<8x128xf32>, i32 -> vector<8x128xf32>
    %1033 = tpu.iota {dimensions = array<i32: 1>} : vector<1x128xi32>
    %c-1_i32_388 = arith.constant -1 : i32
    %1034 = vector.broadcast %c-1_i32_388 : i32 to vector<1x128xi32>
    %1035 = arith.addi %1033, %1034 : vector<1x128xi32>
    %c0_i32_389 = arith.constant 0 : i32
    %1036 = vector.broadcast %c0_i32_389 : i32 to vector<1x128xi32>
    %1037 = arith.cmpi sge, %1035, %1036 : vector<1x128xi32>
    %c-1_i32_390 = arith.constant -1 : i32
    %1038 = vector.broadcast %c-1_i32_390 : i32 to vector<1x128xi32>
    %1039 = arith.addi %1033, %1038 : vector<1x128xi32>
    %c8_i32_391 = arith.constant 8 : i32
    %1040 = vector.broadcast %c8_i32_391 : i32 to vector<1x128xi32>
    %1041 = arith.cmpi slt, %1039, %1040 : vector<1x128xi32>
    %1042 = arith.andi %1037, %1041 : vector<1x128xi1>
    %cst_392 = arith.constant 0.000000e+00 : f32
    %1043 = vector.shape_cast %1042 : vector<1x128xi1> to vector<1x128xi1>
    %1044 = vector.broadcast %1043 : vector<1x128xi1> to vector<8x128xi1>
    %1045 = vector.broadcast %cst_392 : f32 to vector<8x128xf32>
    %1046 = arith.select %1044, %1032, %1045 : vector<8x128xi1>, vector<8x128xf32>
    %c127_i32_393 = arith.constant 127 : i32
    %1047 = tpu.dynamic_rotate %922 by %c127_i32_393 dim 1 : vector<8x128xf32>, i32 -> vector<8x128xf32>
    %1048 = tpu.iota {dimensions = array<i32: 1>} : vector<1x128xi32>
    %c1_i32_394 = arith.constant 1 : i32
    %1049 = vector.broadcast %c1_i32_394 : i32 to vector<1x128xi32>
    %1050 = arith.addi %1048, %1049 : vector<1x128xi32>
    %c0_i32_395 = arith.constant 0 : i32
    %1051 = vector.broadcast %c0_i32_395 : i32 to vector<1x128xi32>
    %1052 = arith.cmpi sge, %1050, %1051 : vector<1x128xi32>
    %c1_i32_396 = arith.constant 1 : i32
    %1053 = vector.broadcast %c1_i32_396 : i32 to vector<1x128xi32>
    %1054 = arith.addi %1048, %1053 : vector<1x128xi32>
    %c8_i32_397 = arith.constant 8 : i32
    %1055 = vector.broadcast %c8_i32_397 : i32 to vector<1x128xi32>
    %1056 = arith.cmpi slt, %1054, %1055 : vector<1x128xi32>
    %1057 = arith.andi %1052, %1056 : vector<1x128xi1>
    %cst_398 = arith.constant 0.000000e+00 : f32
    %1058 = vector.shape_cast %1057 : vector<1x128xi1> to vector<1x128xi1>
    %1059 = vector.broadcast %1058 : vector<1x128xi1> to vector<8x128xi1>
    %1060 = vector.broadcast %cst_398 : f32 to vector<8x128xf32>
    %1061 = arith.select %1059, %1047, %1060 : vector<8x128xi1>, vector<8x128xf32>
    %c127_i32_399 = arith.constant 127 : i32
    %1062 = tpu.dynamic_rotate %927 by %c127_i32_399 dim 1 : vector<8x128xf32>, i32 -> vector<8x128xf32>
    %1063 = tpu.iota {dimensions = array<i32: 1>} : vector<1x128xi32>
    %c1_i32_400 = arith.constant 1 : i32
    %1064 = vector.broadcast %c1_i32_400 : i32 to vector<1x128xi32>
    %1065 = arith.addi %1063, %1064 : vector<1x128xi32>
    %c0_i32_401 = arith.constant 0 : i32
    %1066 = vector.broadcast %c0_i32_401 : i32 to vector<1x128xi32>
    %1067 = arith.cmpi sge, %1065, %1066 : vector<1x128xi32>
    %c1_i32_402 = arith.constant 1 : i32
    %1068 = vector.broadcast %c1_i32_402 : i32 to vector<1x128xi32>
    %1069 = arith.addi %1063, %1068 : vector<1x128xi32>
    %c8_i32_403 = arith.constant 8 : i32
    %1070 = vector.broadcast %c8_i32_403 : i32 to vector<1x128xi32>
    %1071 = arith.cmpi slt, %1069, %1070 : vector<1x128xi32>
    %1072 = arith.andi %1067, %1071 : vector<1x128xi1>
    %cst_404 = arith.constant 0.000000e+00 : f32
    %1073 = vector.shape_cast %1072 : vector<1x128xi1> to vector<1x128xi1>
    %1074 = vector.broadcast %1073 : vector<1x128xi1> to vector<8x128xi1>
    %1075 = vector.broadcast %cst_404 : f32 to vector<8x128xf32>
    %1076 = arith.select %1074, %1062, %1075 : vector<8x128xi1>, vector<8x128xf32>
    %1077 = tpu.concatenate %1046, %922, %927, %932, %937, %1061, %1076 in 0 : vector<8x128xf32>, vector<8x128xf32>, vector<8x128xf32>, vector<8x128xf32>, vector<8x128xf32>, vector<8x128xf32>, vector<8x128xf32> -> vector<56x128xf32>
    %c127_i32_405 = arith.constant 127 : i32
    %1078 = tpu.dynamic_rotate %922 by %c127_i32_405 dim 1 : vector<8x128xf32>, i32 -> vector<8x128xf32>
    %1079 = tpu.iota {dimensions = array<i32: 1>} : vector<1x128xi32>
    %c1_i32_406 = arith.constant 1 : i32
    %1080 = vector.broadcast %c1_i32_406 : i32 to vector<1x128xi32>
    %1081 = arith.addi %1079, %1080 : vector<1x128xi32>
    %c0_i32_407 = arith.constant 0 : i32
    %1082 = vector.broadcast %c0_i32_407 : i32 to vector<1x128xi32>
    %1083 = arith.cmpi sge, %1081, %1082 : vector<1x128xi32>
    %c1_i32_408 = arith.constant 1 : i32
    %1084 = vector.broadcast %c1_i32_408 : i32 to vector<1x128xi32>
    %1085 = arith.addi %1079, %1084 : vector<1x128xi32>
    %c8_i32_409 = arith.constant 8 : i32
    %1086 = vector.broadcast %c8_i32_409 : i32 to vector<1x128xi32>
    %1087 = arith.cmpi slt, %1085, %1086 : vector<1x128xi32>
    %1088 = arith.andi %1083, %1087 : vector<1x128xi1>
    %cst_410 = arith.constant 0.000000e+00 : f32
    %1089 = vector.shape_cast %1088 : vector<1x128xi1> to vector<1x128xi1>
    %1090 = vector.broadcast %1089 : vector<1x128xi1> to vector<8x128xi1>
    %1091 = vector.broadcast %cst_410 : f32 to vector<8x128xf32>
    %1092 = arith.select %1090, %1078, %1091 : vector<8x128xi1>, vector<8x128xf32>
    %c127_i32_411 = arith.constant 127 : i32
    %1093 = tpu.dynamic_rotate %927 by %c127_i32_411 dim 1 : vector<8x128xf32>, i32 -> vector<8x128xf32>
    %1094 = tpu.iota {dimensions = array<i32: 1>} : vector<1x128xi32>
    %c1_i32_412 = arith.constant 1 : i32
    %1095 = vector.broadcast %c1_i32_412 : i32 to vector<1x128xi32>
    %1096 = arith.addi %1094, %1095 : vector<1x128xi32>
    %c0_i32_413 = arith.constant 0 : i32
    %1097 = vector.broadcast %c0_i32_413 : i32 to vector<1x128xi32>
    %1098 = arith.cmpi sge, %1096, %1097 : vector<1x128xi32>
    %c1_i32_414 = arith.constant 1 : i32
    %1099 = vector.broadcast %c1_i32_414 : i32 to vector<1x128xi32>
    %1100 = arith.addi %1094, %1099 : vector<1x128xi32>
    %c8_i32_415 = arith.constant 8 : i32
    %1101 = vector.broadcast %c8_i32_415 : i32 to vector<1x128xi32>
    %1102 = arith.cmpi slt, %1100, %1101 : vector<1x128xi32>
    %1103 = arith.andi %1098, %1102 : vector<1x128xi1>
    %cst_416 = arith.constant 0.000000e+00 : f32
    %1104 = vector.shape_cast %1103 : vector<1x128xi1> to vector<1x128xi1>
    %1105 = vector.broadcast %1104 : vector<1x128xi1> to vector<8x128xi1>
    %1106 = vector.broadcast %cst_416 : f32 to vector<8x128xf32>
    %1107 = arith.select %1105, %1093, %1106 : vector<8x128xi1>, vector<8x128xf32>
    %c127_i32_417 = arith.constant 127 : i32
    %1108 = tpu.dynamic_rotate %932 by %c127_i32_417 dim 1 : vector<8x128xf32>, i32 -> vector<8x128xf32>
    %1109 = tpu.iota {dimensions = array<i32: 1>} : vector<1x128xi32>
    %c1_i32_418 = arith.constant 1 : i32
    %1110 = vector.broadcast %c1_i32_418 : i32 to vector<1x128xi32>
    %1111 = arith.addi %1109, %1110 : vector<1x128xi32>
    %c0_i32_419 = arith.constant 0 : i32
    %1112 = vector.broadcast %c0_i32_419 : i32 to vector<1x128xi32>
    %1113 = arith.cmpi sge, %1111, %1112 : vector<1x128xi32>
    %c1_i32_420 = arith.constant 1 : i32
    %1114 = vector.broadcast %c1_i32_420 : i32 to vector<1x128xi32>
    %1115 = arith.addi %1109, %1114 : vector<1x128xi32>
    %c8_i32_421 = arith.constant 8 : i32
    %1116 = vector.broadcast %c8_i32_421 : i32 to vector<1x128xi32>
    %1117 = arith.cmpi slt, %1115, %1116 : vector<1x128xi32>
    %1118 = arith.andi %1113, %1117 : vector<1x128xi1>
    %cst_422 = arith.constant 0.000000e+00 : f32
    %1119 = vector.shape_cast %1118 : vector<1x128xi1> to vector<1x128xi1>
    %1120 = vector.broadcast %1119 : vector<1x128xi1> to vector<8x128xi1>
    %1121 = vector.broadcast %cst_422 : f32 to vector<8x128xf32>
    %1122 = arith.select %1120, %1108, %1121 : vector<8x128xi1>, vector<8x128xf32>
    %1123 = tpu.concatenate %922, %927, %932, %937, %1092, %1107, %1122 in 0 : vector<8x128xf32>, vector<8x128xf32>, vector<8x128xf32>, vector<8x128xf32>, vector<8x128xf32>, vector<8x128xf32>, vector<8x128xf32> -> vector<56x128xf32>
    %1124 = tpu.concatenate %985, %1031, %1077, %1123 in 1 : vector<56x128xf32>, vector<56x128xf32>, vector<56x128xf32>, vector<56x128xf32> -> vector<56x512xf32>
    %1125 = arith.truncf %1124 : vector<56x512xf32> to vector<56x512xbf16>
    %cst_423 = arith.constant dense<0.000000e+00> : vector<1x512xf32>
    %1126 = tpu.matmul %938, %1125, %cst_423 {dimension_numbers = #tpu.dot_dimension_numbers<[1], [0], [0], [1], [0, 0, 1, 1], [], []>} : vector<1x56xbf16>, vector<56x512xbf16>, vector<1x512xf32> -> vector<1x512xf32>
    %1127 = vector.broadcast %939 : vector<1x1xf32> to vector<1x512xf32>
    %1128 = arith.addf %1126, %1127 : vector<1x512xf32>
    %1129 = vector.extract_strided_slice %1128 {offsets = [0, 0], sizes = [1, 128], strides = [1, 1]} : vector<1x512xf32> to vector<1x128xf32>
    %1130 = vector.extract_strided_slice %1128 {offsets = [0, 128], sizes = [1, 128], strides = [1, 1]} : vector<1x512xf32> to vector<1x128xf32>
    %1131 = vector.extract_strided_slice %1128 {offsets = [0, 256], sizes = [1, 128], strides = [1, 1]} : vector<1x512xf32> to vector<1x128xf32>
    %1132 = vector.extract_strided_slice %1128 {offsets = [0, 384], sizes = [1, 128], strides = [1, 1]} : vector<1x512xf32> to vector<1x128xf32>
    %1133 = tpu.concatenate %1129, %1130, %1131, %1132 in 0 : vector<1x128xf32>, vector<1x128xf32>, vector<1x128xf32>, vector<1x128xf32> -> vector<4x128xf32>
    %1134 = math.tanh %1133 : vector<4x128xf32>
    %c0_424 = arith.constant 0 : index
    %c0_425 = arith.constant 0 : index
    %1135 = vector.load %arg4[%c0_424, %c0_425] : memref<4x128xf32, #tpu.memory_space<vmem>>, vector<4x128xf32>
    tpu.vector_store %arg4[%c0_424, %c0_425], %1134 {strides = array<i32>} : memref<4x128xf32, #tpu.memory_space<vmem>>, vector<4x128xf32>,
    return
  }
}

</mosaic_0001>

<bundles_post_ra>
// kernel: wrapper_forward_pallas.1
= control target key start
LH: loop header
LB: loop body
LE: loop exit
PB: predicated region body
PF: predicated region fallthrough
CT: control target
= control target key end

     0   :  { %9 = vsyncpa [#allocation3], 0  ;;  %s1768_s18 = smov [#allocation2]   ;;  %s1769_s20 = smov 128   ;;  %s2387_s0 = inlined_call_operand.vmem [shape: f32[16,128], index: 0, kind: input, shape index: {}]   ;;  %s2388_s1 = inlined_call_operand.vmem [shape: f32[1,128], index: 1, kind: input, shape index: {}]   ;;  %s2389_s2 = inlined_call_operand.hbm [shape: bf16[272,256], index: 2, kind: input, shape index: {}]   ;;  %s2390_s3 = inlined_call_operand.vmem [shape: f32[200,1], index: 3, kind: input, shape index: {}]   ;;  %s2391_s4 = inlined_call_operand.vmem [shape: f32[4,128], index: 4, kind: output, shape index: {}]  }
   0x1   :  { %s18_s17 = sshll.u32 %s2389_s2, 4  ;;  %s20_s19 = sshll.u32 %s1768_s18, 4  ;;  %s19_s17 = int_to_ptr.hbm [resolvable:$true] %s18_s17  ;;  %s21_s19 = int_to_ptr.vmem [resolvable:$true] %s20_s19 }
   0x2   :  { %s1770_s21 = smov 8  }
   0x3   :  { %26 = dma.hbm_to_vmem [thread:$0]  %s19_s17, 4352, %s21_s19, [#allocation3], %s1769_s20, %s1769_s20, %s1770_s21  }
   0x4   :  { %1766 = dma.done.wait [#allocation3], 4352  }
   0x5   :  { %1767 = vsyncadd [#allocation3], 4294962944  ;;  %v36_v0 = vld [vmem:[%s2388_s1] sm:$0x1]  ;;  %v1813_v1 = vld [vmem:[%s2387_s0 + $0x8] sm:$0xff]  ;;  %s1771_s2 = smov 127   ;;  %v42_v4 = vlaneseq }
   0x6   :  { %vm37_vm0 = vcmp.gt.f32.partialorder %v36_v0, 0.0  ;;  %108 = vrot.lane.b32.xlu1 %v1813_v1, %s1771_s2  ;;  %s1772_s26 = smov 1   ;;  %v34_v8 = vld [vmem:[%s2387_s0] sm:$0xff]  ;;  %s1773_s28 = smov 2   ;;  %v58_v26 = vld [vmem:[%s2390_s3 + $0x18] sm:$0xff]  ;;  %v1777_v27 = vmov 0  }
   0x7   :  { %93 = vrot.lane.b32.xlu2 %v1813_v1, %s1772_s26  ;;  %v38_v2 = vsel %vm37_vm0, %v36_v0, 0.0  ;;  %v43_v5 = vshrl.u32 %v42_v4, 7  ;;  %s1774_s29 = smov 126   ;;  %s1775_s30 = smov 3   ;;  %v66_v14 = vand.u32 127, %v42_v4  ;;  %1626 = vset.pattern.permute.xlu1 %v1777_v27  ;;  %vm1778_vm8 = vmmov 1  }
   0x8   :  { %v39_v3 = vmul.f32 1.442695, %v38_v2  ;;  %s1776_s0 = smov 125   ;;  %1625 = vset.pattern.permute.xlu0 %v1777_v27  ;;  %1627 = vset.pattern.permute.xlu2 %v1777_v27  ;;  %v56_v37 = vld [vmem:[%s2390_s3 + $0x8] sm:$0xff]  ;;  %vm207_vm12 = vcmask 1043456   ;;  %v57_v57 = vld [vmem:[%s2390_s3 + $0x10] sm:$0xff] }
   0x9   :  { %vm44_vm1 = vcmp.eq.s32.totalorder %v43_v5, 0  ;;  %v1836_v17 = vadd.s32 1, %v66_v14  ;;  %v1838_v18 = vadd.s32 2, %v66_v14  ;;  %v97_v24 = vadd.s32 4294967295, %v66_v14  ;;  %v55_v58 = vld [vmem:[%s2390_s3] sm:$0xff] }
   0xa   :  { %1738 = vpow2.f32 %v39_v3  ;;  %v142_v29 = vadd.s32 3, %v66_v14  ;;  %vm1394_vm9 = vmpackc.low %vm44_vm1, %vm1778_vm8  ;;  %v82_v36 = vadd.s32 4294967294, %v66_v14  ;;  %v67_v47 = vadd.s32 4294967293, %v66_v14  ;;  %v1574_v61 = vld [vmem:[#allocation2 + $0x4] sm:$0xf] }
   0xb   :  { %vm114_vm2 = vcmp.lt.s32.totalorder %v1836_v17, 8  ;;  %vm129_vm3 = vcmp.lt.s32.totalorder %v1838_v18, 8  ;;  %vm98_vm6 = vcmp.ge.s32.totalorder %v97_v24, 0  ;;  %vm99_vm7 = vcmp.lt.s32.totalorder %v97_v24, 8  ;;  %v1376_v62 = vld [vmem:[#allocation2 + $0x8] sm:$0xf0] }
   0xc   :  { %vm1388_vm4 = vmpackc.low %vm129_vm3, %vm114_vm2  ;;  %vm144_vm10 = vcmp.lt.s32.totalorder %v142_v29, 8  ;;  %vm83_vm14 = vcmp.ge.s32.totalorder %v82_v36, 0  ;;  %vm84_vm15 = vcmp.lt.s32.totalorder %v82_v36, 8  ;;  %v1379_v3 = vor.u32 %v1574_v61, %v1376_v62  ;;  %v1382_v14 = vld [vmem:[#allocation2 + $0x10] sm:$0xf] }
   0xd   :  { %vm1854_vm5 = vmpackc.low %vm114_vm2, %vm114_vm2  ;;  %v1245_v17 = vld [vmem:[#allocation2 + $0x100] sm:$0x1] }
   0xe   :  { %vm100_vm11 = vmand %vm98_vm6, %vm99_vm7  ;;  %vm68_vm6 = vcmp.ge.s32.totalorder %v67_v47, 0  ;;  %vm69_vm7 = vcmp.lt.s32.totalorder %v67_v47, 8 }
   0xf   :  { %vm1868_vm13 = vmpackc.low %vm1778_vm8, %vm100_vm11 }
  0x10   :  { %v1739_v6 = vpop.eup %1738 }
  0x11   :  { %v41_v7 = vsel %vm37_vm0, %v1739_v6, %v36_v0  ;;  %vm1872_vm0 = vmpackc.low %vm100_vm11, %vm100_vm11 }
  0x12   :  { %v48_v9 = vperm.slane %v41_v7, 0  ;;  %vm1911_vm11 = vmand %vm68_vm6, %vm69_vm7  ;;  %v1374_v7 = vld [vmem:[#allocation2] sm:$0xf] }
  0x14   :  { %v50_v10 = vsel %vm44_vm1, %v48_v9, 0.0  ;;  %v1395_v33 = vpack.c.bf16 %v48_v9, %v1813_v1  ;;  %vm1412_vm1 = vmpackc.low %vm144_vm10, %vm144_vm10 }
  0x15   :  { %v1595_v11 = vpack.i.bf16 %v34_v8, %v50_v10  ;;  %v1605_v12 = vpack.i.bf16 %v50_v10, %v1813_v1 }
  0x17   :  { %1596 = vrot.lane.b32.xlu0 %v1595_v11, %s1771_s2  ;;  %1601 = vrot.lane.b32.xlu1 %v1595_v11, %s1772_s26 }
  0x18   :  { %1606 = vrot.lane.b32.xlu2 %v1605_v12, %s1773_s28 }
  0x1f   :  { %121 = vrot.lane.b32.xlu0 %v34_v8, %s1774_s29  ;;  %1616 = vrot.lane.b32.xlu1 %v1595_v11, %s1775_s30 }
  0x20   :  { %76 = vrot.lane.b32.xlu2 %v34_v8, %s1773_s28 }
  0x27   :  { %1611 = vrot.lane.b32.xlu0 %v1595_v11, %s1776_s0  ;;  %61 = vrot.lane.b32.xlu1 %v1813_v1, %s1775_s30  ;;  %v1576_v11 = vld [vmem:[#allocation2 + $0x14] sm:$0xf] }
  0x28   :  { %1621 = vrot.lane.b32.xlu2 %v1605_v12, %s1774_s29  ;;  %v1384_v12 = vld [vmem:[#allocation2 + $0x18] sm:$0xf0] }
  0x2f   :  { %138 = vrot.lane.b32.xlu0 %v1813_v1, %s1776_s0  ;;  %179 = vperm.xlu1 %1626, %v58_v26  }
  0x30   :  { %164 = vperm.xlu2 %1627, %v55_v58  }
  0x37   :  { %169 = vperm.xlu1 %1626, %v56_v37   ;;  %174 = vperm.xlu0 %1625, %v57_v57   ;;  %v330_v57 = vld [vmem:[%s2390_s3 + $0x30] sm:$0xff] }
  0x61   :  { %v1832_v13 = vpop.permute.xlu2 %93 }
  0x72   :  { %v1834_v16 = vpop.permute.xlu2 %1606 }
  0x73   :  { %v1609_v54 = vunpack.i.h.bf16 %v1834_v16  ;;  %v1608_v55 = vunpack.i.l.bf16 %v1834_v16 }
  0x75   :  { %v1404_v0 = vpack.c.bf16 %v1609_v54, %v1608_v55  ;;  %v280_v55 = vld [vmem:[%s2390_s3 + $0x28] sm:$0xff] }
  0x78   :  { %v109_v19 = vpop.permute.xlu1 %108 }
  0x7a   :  { %v1846_v25 = vpop.permute.xlu2 %76 }
  0x82   :  { %v1622_v42 = vpop.permute.xlu2 %1621 }
  0x83   :  { %v1624_v48 = vunpack.i.h.bf16 %v1622_v42  ;;  %v1623_v49 = vunpack.i.l.bf16 %v1622_v42 }
  0x85   :  { %v1416_v59 = vpack.c.bf16 %v1624_v48, %v1623_v49 }
  0x89   :  { %v1597_v15 = vpop.permute.xlu0 %1596  ;;  %v1602_v31 = vpop.permute.xlu1 %1601 }
  0x8a   :  { %v1598_v20 = vunpack.i.l.bf16 %v1597_v15  ;;  %v1599_v22 = vunpack.i.h.bf16 %v1597_v15  ;;  %v1603_v32 = vunpack.i.l.bf16 %v1602_v31  ;;  %v1604_v43 = vunpack.i.h.bf16 %v1602_v31  ;;  %v1577_v15 = vld [vmem:[#allocation2 + $0x14] sm:$0xf0] }
  0x8b   :  { %v1383_v16 = vor.u32 %v1577_v15, %v1382_v14  ;;  %v1433_v14 = vld [vmem:[#allocation2 + $0x30] sm:$0xf]  ;;  %v1579_v15 = vld [vmem:[#allocation2 + $0x34] sm:$0xf0] }
  0x8c   :  { %v1392_v30 = vpack.c.bf16 %v109_v19, %v1599_v22  ;;  %v1398_v38 = vpack.c.bf16 %v34_v8, %v1603_v32  ;;  %v1401_v53 = vpack.c.bf16 %v1832_v13, %v1604_v43  ;;  %v1575_v8 = vld [vmem:[#allocation2 + $0x4] sm:$0xf0]  ;;  %v1387_v13 = vor.u32 %v1576_v11, %v1384_v12 }
  0x8d   :  { %v1375_v10 = vor.u32 %v1575_v8, %v1374_v7 }
  0x91   :  { %v122_v21 = vpop.permute.xlu0 %121  ;;  %v1617_v50 = vpop.permute.xlu1 %1616 }
  0x92   :  { %v1389_v23 = vpack.c.bf16 %v122_v21, %v1598_v20  ;;  %v1618_v1 = vunpack.i.l.bf16 %v1617_v50  ;;  %v1619_v4 = vunpack.i.h.bf16 %v1617_v50  ;;  %v165_v20 = vpop.permute.xlu2 %164 }
  0x94   :  { %1390 = vmatpush.bf16.msk.msra.mxu0 %vm1388_vm4, %v1389_v23  ;;  %vm1881_vm4 = vmand %vm83_vm14, %vm84_vm15  ;;  %v1407_v5 = vpack.c.bf16 %v1846_v25, %v1618_v1 }
  0x95   :  { %vm1406_vm14 = vmpackc.low %vm1881_vm4, %vm1911_vm11 }
  0x96   :  { %vm1409_vm15 = vmpackc.low %vm1911_vm11, %vm1911_vm11  ;;  %vm296_vm11 = vcmask 523264  }
  0x98   :  { %1393 = vmatpush.bf16.msk.msra.mxu0 %vm1854_vm5, %v1392_v30 }
  0x99   :  { %v1612_v34 = vpop.permute.xlu0 %1611  ;;  %v62_v6 = vpop.permute.xlu1 %61 }
  0x9a   :  { %v1613_v35 = vunpack.i.l.bf16 %v1612_v34  ;;  %v1614_v44 = vunpack.i.h.bf16 %v1612_v34  ;;  %v1410_v9 = vpack.c.bf16 %v62_v6, %v1619_v4  ;;  %v1422_v4 = vld [vmem:[#allocation2 + $0x20] sm:$0xf] }
  0x9c   :  { %1396 = vmatpush.bf16.msk.msra.mxu0 %vm1394_vm9, %v1395_v33  ;;  %v150_v39 = vsel %vm144_vm10, %v1613_v35, 0.0  ;;  %vm1899_vm9 = vmpackc.low %vm1881_vm4, %vm1881_vm4 }
  0x9d   :  { %v161_v41 = vpack.c.bf16 %v150_v39, %v150_v39  ;;  %vm1906_vm10 = vmpackc.low %vm129_vm3, %vm129_vm3  ;;  %vm200_vm3 = vcmask 326656  }
  0x9f   :  { %v209_v46 = vsel %vm207_vm12, %v161_v41, 0  ;;  %v279_v41 = vld [vmem:[%s2390_s3 + $0x20] sm:$0xff] }
  0xa0   :  { %1399 = vmatpush.bf16.msk.msra.mxu0 %vm1868_vm13, %v1398_v38  ;;  %235 = vmatpush.bf16.msra.mxu1 %v209_v46 }
  0xa1   :  { %v139_v51 = vpop.permute.xlu0 %138  ;;  %v180_v18 = vpop.permute.xlu1 %179 }
  0xa2   :  { %v1413_v56 = vpack.c.bf16 %v139_v51, %v1614_v44 }
  0xa4   :  { %1402 = vmatpush.bf16.msk.msra.mxu0 %vm1872_vm0, %v1401_v53  ;;  %1414 = vmatpush.bf16.msk.msra.mxu1 %vm1412_vm1, %v1413_v56  ;;  %v331_v53 = vld [vmem:[%s2390_s3 + $0x38] sm:$0xff]  ;;  %v378_v56 = vld [vmem:[%s2390_s3 + $0x40] sm:$0xff] }
  0xa8   :  { %1405 = vmatpush.bf16.msk.msra.mxu0 %vm1899_vm9, %v1404_v0  ;;  %1417 = vmatpush.bf16.msk.msra.mxu1 %vm1906_vm10, %v1416_v59 }
  0xa9   :  { %v170_v23 = vpop.permute.xlu1 %169  ;;  %v175_v32 = vpop.permute.xlu0 %174 }
  0xab   :  { %1418 = vmatmul.msk.bf16.vlgmr.msra.gmra.mxu1 %vm200_vm3, %v1379_v3 }
  0xac   :  { %1408 = vmatpush.bf16.msk.msra.mxu0 %vm1406_vm14, %v1407_v5  ;;  %v1578_v5 = vld [vmem:[#allocation2 + $0x24] sm:$0xf0] }
  0xad   :  { %v1423_v6 = vor.u32 %v1578_v5, %v1422_v4 }
  0xb0   :  { %1411 = vmatpush.bf16.msk.msra.mxu0 %vm1409_vm15, %v1410_v9 }
  0xb3   :  { %219 = vmatmul.bf16.vlgmr.msra.gmra.mxu0 %v1375_v10 }
  0xbb   :  { %1419 = vmatmul.msk.bf16.gmra.mxu1 %vm200_vm3, %v1387_v13 }
  0xc3   :  { %224 = vmatmul.bf16.gmra.mxu0 %v1383_v16 }
 0x128   :  { %v239_v19 = vpop.f32.mrf.mxu1 }
 0x130   :  { %v220_v21 = vpop.f32.mrf.mxu0  ;;  %v241_v25 = vpop.f32.mrf.mxu1 }
 0x131   :  { %v221_v22 = vadd.f32 %v220_v21, %v165_v20 }
 0x133   :  { %v240_v24 = vadd.f32 %v239_v19, %v221_v22 }
 0x135   :  { %v253_v29 = vmul.f32 0.1, %v240_v24  ;;  %vm249_vm1 = vcmp.gt.f32.partialorder %v240_v24, 0.0 }
 0x137   :  { %v257_v33 = vsel %vm249_vm1, %v240_v24, %v253_v29 }
 0x138   :  { %v222_v26 = vpop.f32.mrf.mxu0  ;;  %v244_v35 = vpop.f32.mrf.mxu1 }
 0x139   :  { %v223_v27 = vadd.f32 %v222_v26, %v170_v23 }
 0x13b   :  { %v242_v30 = vadd.f32 %v241_v25, %v223_v27 }
 0x13d   :  { %vm250_vm4 = vcmp.gt.f32.partialorder %v242_v30, 0.0  ;;  %v254_v31 = vmul.f32 0.1, %v242_v30 }
 0x13f   :  { %v258_v34 = vsel %vm250_vm4, %v242_v30, %v254_v31  ;;  %vm411_vm4 = vcmask 392192  }
 0x140   :  { %v225_v36 = vpop.f32.mrf.mxu0  ;;  %v1633_v37 = vpack.i.bf16 %v258_v34, %v257_v33  ;;  %v246_v44 = vpop.f32.mrf.mxu1  ;;  %v275_v54 = vpack.c.bf16 %v258_v34, %v257_v33 }
 0x141   :  { %v226_v38 = vadd.f32 %v225_v36, %v175_v32 }
 0x142   :  { %1634 = vrot.lane.b32.xlu0 %v1633_v37, %s1772_s26 }
 0x143   :  { %v245_v39 = vadd.f32 %v244_v35, %v226_v38 }
 0x145   :  { %v255_v46 = vmul.f32 0.1, %v245_v39  ;;  %vm251_vm6 = vcmp.gt.f32.partialorder %v245_v39, 0.0 }
 0x147   :  { %v259_v49 = vsel %vm251_vm6, %v245_v39, %v255_v46  ;;  %v545_v46 = vld [vmem:[%s2390_s3 + $0x60] sm:$0xff] }
 0x148   :  { %v227_v42 = vpop.f32.mrf.mxu0 }
 0x149   :  { %v228_v43 = vadd.f32 %v227_v42, %v180_v18  ;;  %v1434_v18 = vor.u32 %v1579_v15, %v1433_v14 }
 0x14a   :  { %283 = vperm.xlu0 %1625, %v279_v41  }
 0x14b   :  { %v247_v47 = vadd.f32 %v246_v44, %v228_v43 }
 0x14d   :  { %vm252_vm7 = vcmp.gt.f32.partialorder %v247_v47, 0.0  ;;  %v256_v48 = vmul.f32 0.1, %v247_v47 }
 0x14f   :  { %v260_v50 = vsel %vm252_vm7, %v247_v47, %v256_v48 }
 0x150   :  { %v1638_v51 = vpack.i.bf16 %v260_v50, %v259_v49  ;;  %v276_v52 = vpack.c.bf16 %v260_v50, %v259_v49 }
 0x152   :  { %1639 = vrot.lane.b32.xlu1 %v1638_v51, %s1771_s2  ;;  %1629 = vrot.lane.b32.xlu2 %v1638_v51, %s1772_s26  ;;  %v1444_v51 = vld [vmem:[#allocation2 + $0x40] sm:$0xf] }
 0x153   :  { %354 = vmatpush.bf16.msra.mxu3 %v276_v52  ;;  %339 = vperm.xlu0 %1625, %v331_v53  }
 0x157   :  { %355 = vmatpush.bf16.msra.mxu3 %v275_v54 }
 0x15a   :  { %288 = vperm.xlu1 %1626, %v280_v55   ;;  %1644 = vrot.lane.b32.xlu2 %v1633_v37, %s1771_s2  ;;  %v379_v37 = vld [vmem:[%s2390_s3 + $0x48] sm:$0xff] }
 0x15b   :  { %398 = vperm.xlu0 %1625, %v378_v56  }
 0x162   :  { %334 = vperm.xlu2 %1627, %v330_v57  }
 0x1ac   :  { %v1630_v58 = vpop.permute.xlu2 %1629 }
 0x1ad   :  { %v1632_v59 = vunpack.i.h.bf16 %v1630_v58  ;;  %v1631_v61 = vunpack.i.l.bf16 %v1630_v58 }
 0x1af   :  { %v1425_v62 = vpack.c.bf16 %v1632_v59, %v1631_v61  ;;  %v1474_v59 = vld [vmem:[#allocation2 + $0x60] sm:$0xf]  ;;  %v1582_v61 = vld [vmem:[#allocation2 + $0x64] sm:$0xf0] }
 0x1b1   :  { %1426 = vmatpush.bf16.msk.msra.mxu2 %vm1872_vm0, %v1425_v62  ;;  %v2005_v62 = vor.u32 %v1582_v61, %v1474_v59  ;;  %v1581_v59 = vld [vmem:[#allocation2 + $0x54] sm:$0xf0] }
 0x1b4   :  { %v1635_v0 = vpop.permute.xlu0 %1634  ;;  %v1645_v7 = vpop.permute.xlu2 %1644 }
 0x1b5   :  { %v1637_v1 = vunpack.i.h.bf16 %v1635_v0  ;;  %v1636_v2 = vunpack.i.l.bf16 %v1635_v0  ;;  %v1647_v11 = vunpack.i.h.bf16 %v1645_v7  ;;  %v1646_v12 = vunpack.i.l.bf16 %v1645_v7 }
 0x1b7   :  { %v1428_v3 = vpack.c.bf16 %v1637_v1, %v1636_v2  ;;  %v1439_v16 = vpack.c.bf16 %v1647_v11, %v1646_v12 }
 0x1b9   :  { %1429 = vmatpush.bf16.msk.msra.mxu2 %vm1872_vm0, %v1428_v3 }
 0x1bc   :  { %v284_v20 = vpop.permute.xlu0 %283  ;;  %v335_v32 = vpop.permute.xlu2 %334 }
 0x1bd   :  { %306 = vmatpush.bf16.msra.mxu2 %v276_v52  ;;  %v1580_v52 = vld [vmem:[#allocation2 + $0x44] sm:$0xf0] }
 0x1c1   :  { %307 = vmatpush.bf16.msra.mxu2 %v275_v54  ;;  %v1445_v54 = vor.u32 %v1580_v52, %v1444_v51 }
 0x1c4   :  { %v1640_v8 = vpop.permute.xlu1 %1639  ;;  %1430 = vmatmul.msk.bf16.vlgmr.msra.gmra.mxu2 %vm296_vm11, %v1423_v6 }
 0x1c5   :  { %v1642_v9 = vunpack.i.h.bf16 %v1640_v8  ;;  %v1641_v10 = vunpack.i.l.bf16 %v1640_v8  ;;  %v340_v34 = vpop.permute.xlu0 %339 }
 0x1c7   :  { %v1436_v13 = vpack.c.bf16 %v1642_v9, %v1641_v10 }
 0x1c9   :  { %1437 = vmatpush.bf16.msk.msra.mxu3 %vm1854_vm5, %v1436_v13 }
 0x1cc   :  { %v289_v22 = vpop.permute.xlu1 %288 }
 0x1cd   :  { %1440 = vmatpush.bf16.msk.msra.mxu3 %vm1854_vm5, %v1439_v16  ;;  %v399_v1 = vpop.permute.xlu0 %398 }
 0x1d0   :  { %1441 = vmatmul.msk.bf16.vlgmr.msra.gmra.mxu3 %vm296_vm11, %v1434_v18 }
 0x247   :  { %v309_v19 = vpop.f32.mrf.mxu2 }
 0x248   :  { %v1956_v21 = vadd.f32 %v309_v19, %v284_v20 }
 0x24a   :  { %v366_v25 = vmul.f32 0.1, %v1956_v21  ;;  %vm364_vm3 = vcmp.gt.f32.partialorder %v1956_v21, 0.0 }
 0x24c   :  { %v368_v29 = vsel %vm364_vm3, %v1956_v21, %v366_v25 }
 0x24f   :  { %v311_v23 = vpop.f32.mrf.mxu2 }
 0x250   :  { %v1958_v24 = vadd.f32 %v311_v23, %v289_v22 }
 0x252   :  { %vm365_vm14 = vcmp.gt.f32.partialorder %v1958_v24, 0.0  ;;  %v367_v26 = vmul.f32 0.1, %v1958_v24 }
 0x253   :  { %v359_v27 = vpop.f32.mrf.mxu3 }
 0x254   :  { %v369_v30 = vsel %vm365_vm14, %v1958_v24, %v367_v26  ;;  %v1967_v33 = vadd.f32 %v359_v27, %v335_v32 }
 0x255   :  { %v1648_v31 = vpack.i.bf16 %v369_v30, %v368_v29  ;;  %v1987_v47 = vpack.c.bf16 %v369_v30, %v368_v29  ;;  %v546_v30 = vld [vmem:[%s2390_s3 + $0x68] sm:$0xff] }
 0x256   :  { %v372_v38 = vmul.f32 0.1, %v1967_v33  ;;  %vm370_vm15 = vcmp.gt.f32.partialorder %v1967_v33, 0.0 }
 0x257   :  { %1649 = vrot.lane.b32.xlu1 %v1648_v31, %s1771_s2 }
 0x258   :  { %v374_v41 = vsel %vm370_vm15, %v1967_v33, %v372_v38 }
 0x25b   :  { %v361_v35 = vpop.f32.mrf.mxu3 }
 0x25c   :  { %v1969_v36 = vadd.f32 %v361_v35, %v340_v34 }
 0x25e   :  { %vm371_vm1 = vcmp.gt.f32.partialorder %v1969_v36, 0.0  ;;  %v373_v39 = vmul.f32 0.1, %v1969_v36 }
 0x25f   :  { %403 = vperm.xlu1 %1626, %v379_v37  }
 0x260   :  { %v375_v42 = vsel %vm371_vm1, %v1969_v36, %v373_v39 }
 0x261   :  { %v1653_v43 = vpack.i.bf16 %v375_v42, %v374_v41  ;;  %v1980_v44 = vpack.c.bf16 %v375_v42, %v374_v41 }
 0x263   :  { %1654 = vrot.lane.b32.xlu2 %v1653_v43, %s1772_s26  ;;  %420 = vmatpush.bf16.msrb.mxu2 %v1980_v44 }
 0x267   :  { %549 = vperm.xlu1 %1626, %v545_v46   ;;  %421 = vmatpush.bf16.msrb.mxu2 %v1987_v47 }
 0x2bd   :  { %v1655_v48 = vpop.permute.xlu2 %1654 }
 0x2be   :  { %v1657_v49 = vunpack.i.h.bf16 %v1655_v48  ;;  %v1656_v50 = vunpack.i.l.bf16 %v1655_v48 }
 0x2c0   :  { %v1447_v53 = vpack.c.bf16 %v1657_v49, %v1656_v50 }
 0x2c2   :  { %1448 = vmatpush.bf16.msk.msrb.mxu2 %vm1872_vm0, %v1447_v53 }
 0x2c5   :  { %1449 = vmatmul.msk.bf16.vlgmr.msrb.gmra.mxu2 %vm411_vm4, %v1445_v54 }
 0x2c9   :  { %v1650_v55 = vpop.permute.xlu1 %1649 }
 0x2ca   :  { %v1652_v56 = vunpack.i.h.bf16 %v1650_v55  ;;  %v1651_v57 = vunpack.i.l.bf16 %v1650_v55 }
 0x2cc   :  { %v1993_v58 = vpack.c.bf16 %v1652_v56, %v1651_v57  ;;  %v1456_v57 = vld [vmem:[#allocation2 + $0x50] sm:$0xf] }
 0x2ce   :  { %1452 = vmatpush.bf16.msk.msrb.mxu3 %vm1854_vm5, %v1993_v58 }
 0x2d1   :  { %v404_v4 = vpop.permute.xlu1 %403 }
 0x2d2   :  { %435 = vmatpush.bf16.msrb.mxu3 %v1980_v44 }
 0x2d6   :  { %436 = vmatpush.bf16.msrb.mxu3 %v1987_v47 }
 0x2d9   :  { %1453 = vmatmul.msk.bf16.vlgmr.msrb.gmra.mxu3 %vm411_vm4, %v1445_v54  ;;  %v550_v37 = vpop.permute.xlu1 %549 }
 0x2da   :  { %570 = vmatpush.bf16.msra.mxu3 %v1980_v44 }
 0x2de   :  { %571 = vmatpush.bf16.msra.mxu3 %v1987_v47 }
 0x2e2   :  { %1478 = vmatpush.bf16.msk.msra.mxu3 %vm1872_vm0, %v1447_v53 }
 0x2e9   :  { %1479 = vmatmul.msk.bf16.vlgmr.msra.gmra.mxu3 %vm411_vm4, %v2005_v62 }
 0x348   :  { %v424_v0 = vpop.f32.mrf.mxu2 }
 0x349   :  { %v425_v2 = vadd.f32 %v424_v0, %v399_v1  ;;  %v1457_v0 = vor.u32 %v1581_v59, %v1456_v57 }
 0x34b   :  { %v2010_v3 = vadd.f32 %v425_v2, %v1956_v21 }
 0x34d   :  { %v449_v7 = vmul.f32 0.1, %v2010_v3  ;;  %vm447_vm6 = vcmp.gt.f32.partialorder %v2010_v3, 0.0 }
 0x34f   :  { %v451_v10 = vsel %vm447_vm6, %v2010_v3, %v449_v7 }
 0x350   :  { %v426_v5 = vpop.f32.mrf.mxu2 }
 0x351   :  { %v427_v6 = vadd.f32 %v426_v5, %v404_v4 }
 0x353   :  { %v2014_v8 = vadd.f32 %v427_v6, %v1958_v24 }
 0x355   :  { %v450_v9 = vmul.f32 0.1, %v2014_v8  ;;  %vm448_vm7 = vcmp.gt.f32.partialorder %v2014_v8, 0.0 }
 0x357   :  { %v452_v11 = vsel %vm448_vm7, %v2014_v8, %v450_v9 }
 0x358   :  { %v1673_v12 = vpack.i.bf16 %v452_v11, %v451_v10  ;;  %v489_v13 = vpack.c.bf16 %v452_v11, %v451_v10 }
 0x35a   :  { %1674 = vrot.lane.b32.xlu1 %v1673_v12, %s1772_s26 }
 0x35c   :  { %v438_v14 = vpop.f32.mrf.mxu3 }
 0x35d   :  { %v439_v15 = vadd.f32 %v438_v14, %v399_v1 }
 0x35f   :  { %v2023_v16 = vadd.f32 %v439_v15, %v1967_v33 }
 0x361   :  { %v455_v20 = vmul.f32 0.1, %v2023_v16  ;;  %vm453_vm11 = vcmp.gt.f32.partialorder %v2023_v16, 0.0 }
 0x363   :  { %v457_v25 = vsel %vm453_vm11, %v2023_v16, %v455_v20  ;;  %vm728_vm11 = vcmask 261120  }
 0x364   :  { %v440_v18 = vpop.f32.mrf.mxu3 }
 0x365   :  { %v441_v19 = vadd.f32 %v440_v18, %v404_v4 }
 0x367   :  { %v2027_v22 = vadd.f32 %v441_v19, %v1969_v36 }
 0x369   :  { %v456_v23 = vmul.f32 0.1, %v2027_v22  ;;  %vm454_vm3 = vcmp.gt.f32.partialorder %v2027_v22, 0.0 }
 0x36b   :  { %v458_v26 = vsel %vm454_vm3, %v2027_v22, %v456_v23 }
 0x36c   :  { %v1663_v27 = vpack.i.bf16 %v458_v26, %v457_v25  ;;  %v490_v29 = vpack.c.bf16 %v458_v26, %v457_v25  ;;  %v574_v31 = vpop.f32.mrf.mxu3 }
 0x36d   :  { %v575_v38 = vadd.f32 %v574_v31, %v550_v37 }
 0x36e   :  { %1664 = vrot.lane.b32.xlu0 %v1663_v27, %s1773_s28  ;;  %1659 = vrot.lane.b32.xlu2 %v1663_v27, %s1771_s2 }
 0x36f   :  { %v2043_v42 = vadd.f32 %v575_v38, %v1956_v21  ;;  %v461_v38 = vld [vmem:[%s2390_s3 + $0x50] sm:$0xff] }
 0x371   :  { %v599_v48 = vmul.f32 0.1, %v2043_v42  ;;  %vm597_vm14 = vcmp.gt.f32.partialorder %v2043_v42, 0.0 }
 0x373   :  { %v2053_v51 = vsel %vm597_vm14, %v2043_v42, %v599_v48 }
 0x374   :  { %v576_v41 = vpop.f32.mrf.mxu3 }
 0x376   :  { %554 = vperm.xlu2 %1627, %v546_v30   ;;  %1669 = vrot.lane.b32.xlu0 %v1673_v12, %s1774_s29 }
 0x3c8   :  { %v1660_v32 = vpop.permute.xlu2 %1659 }
 0x3c9   :  { %v1662_v34 = vunpack.i.h.bf16 %v1660_v32  ;;  %v1661_v35 = vunpack.i.l.bf16 %v1660_v32 }
 0x3cb   :  { %v1459_v39 = vpack.c.bf16 %v1662_v34, %v1661_v35  ;;  %v1583_v34 = vld [vmem:[#allocation2 + $0x74] sm:$0xf0] }
 0x3cc   :  { %v1675_v6 = vpop.permute.xlu1 %1674 }
 0x3cd   :  { %1460 = vmatpush.bf16.msk.msrb.mxu1 %vm1854_vm5, %v1459_v39  ;;  %v1677_v7 = vunpack.i.h.bf16 %v1675_v6  ;;  %v1676_v9 = vunpack.i.l.bf16 %v1675_v6  ;;  %v612_v39 = vld [vmem:[%s2390_s3 + $0x78] sm:$0xff] }
 0x3cf   :  { %v1469_v10 = vpack.c.bf16 %v1677_v7, %v1676_v9 }
 0x3d0   :  { %v555_v43 = vpop.permute.xlu2 %554 }
 0x3d1   :  { %v577_v46 = vadd.f32 %v576_v41, %v555_v43  ;;  %517 = vmatpush.bf16.msrb.mxu1 %v489_v13  ;;  %v800_v41 = vld [vmem:[%s2390_s3 + $0x98] sm:$0xff] }
 0x3d3   :  { %v2047_v49 = vadd.f32 %v577_v46, %v1958_v24  ;;  %v462_v24 = vld [vmem:[%s2390_s3 + $0x58] sm:$0xff]  ;;  %v835_v46 = vld [vmem:[%s2390_s3 + $0xa0] sm:$0xff] }
 0x3d5   :  { %vm598_vm15 = vcmp.gt.f32.partialorder %v2047_v49, 0.0  ;;  %v600_v50 = vmul.f32 0.1, %v2047_v49 }
 0x3d7   :  { %v2056_v21 = vsel %vm598_vm15, %v2047_v49, %v600_v50 }
 0x3d8   :  { %v1678_v52 = vpack.i.bf16 %v2056_v21, %v2053_v51  ;;  %v639_v53 = vpack.c.bf16 %v2056_v21, %v2053_v51 }
 0x3da   :  { %1679 = vrot.lane.b32.xlu2 %v1678_v52, %s1774_s29  ;;  %1689 = vrot.lane.b32.xlu1 %v1678_v52, %s1772_s26 }
 0x3e0   :  { %v1665_v54 = vpop.permute.xlu0 %1664 }
 0x3e1   :  { %v1667_v55 = vunpack.i.h.bf16 %v1665_v54  ;;  %v1666_v56 = vunpack.i.l.bf16 %v1665_v54 }
 0x3e2   :  { %500 = vperm.xlu1 %1626, %v462_v24  }
 0x3e3   :  { %v1462_v61 = vpack.c.bf16 %v1667_v55, %v1666_v56 }
 0x3e5   :  { %1463 = vmatpush.bf16.msk.msrb.mxu1 %vm1899_vm9, %v1462_v61 }
 0x3e8   :  { %v1670_v1 = vpop.permute.xlu0 %1669  ;;  %1464 = vmatmul.msk.bf16.vlgmr.msrb.gmra.mxu1 %vm411_vm4, %v1457_v0 }
 0x3e9   :  { %1482 = vmatpush.bf16.msk.msra.mxu1 %vm1854_vm5, %v1993_v58  ;;  %v1672_v2 = vunpack.i.h.bf16 %v1670_v1  ;;  %v1671_v4 = vunpack.i.l.bf16 %v1670_v1 }
 0x3eb   :  { %v1466_v5 = vpack.c.bf16 %v1672_v2, %v1671_v4 }
 0x3ed   :  { %585 = vmatpush.bf16.msra.mxu1 %v1980_v44  ;;  %1467 = vmatpush.bf16.msk.msra.mxu2 %vm1906_vm10, %v1466_v5 }
 0x3f1   :  { %586 = vmatpush.bf16.msra.mxu1 %v1987_v47  ;;  %531 = vmatpush.bf16.msra.mxu2 %v490_v29 }
 0x3f5   :  { %1470 = vmatpush.bf16.msk.msra.mxu2 %vm1872_vm0, %v1469_v10 }
 0x3f8   :  { %1471 = vmatmul.msk.bf16.vlgmr.msra.gmra.mxu2 %vm411_vm4, %v1457_v0  ;;  %1483 = vmatmul.msk.bf16.vlgmr.msra.gmra.mxu1 %vm411_vm4, %v2005_v62 }
 0x434   :  { %v1680_v44 = vpop.permute.xlu2 %1679 }
 0x435   :  { %v1682_v58 = vunpack.i.h.bf16 %v1680_v44  ;;  %v1681_v11 = vunpack.i.l.bf16 %v1680_v44 }
 0x437   :  { %v1496_v12 = vpack.c.bf16 %v1682_v58, %v1681_v11 }
 0x439   :  { %1497 = vmatpush.bf16.msk.msrb.mxu2 %vm1906_vm10, %v1496_v12 }
 0x44c   :  { %v1690_v26 = vpop.permute.xlu1 %1689 }
 0x44d   :  { %v1692_v31 = vunpack.i.h.bf16 %v1690_v26  ;;  %v1691_v32 = vunpack.i.l.bf16 %v1690_v26 }
 0x44f   :  { %v1499_v35 = vpack.c.bf16 %v1692_v31, %v1691_v32 }
 0x454   :  { %v501_v9 = vpop.permute.xlu1 %500 }
 0x465   :  { %v2084_v47 = vpop.f32.mrf.mxu1 }
 0x46d   :  { %v2086_v13 = vpop.f32.mrf.mxu1 }
 0x475   :  { %v588_v14 = vpop.f32.mrf.mxu1 }
 0x476   :  { %v589_v15 = vadd.f32 %v588_v14, %v550_v37 }
 0x478   :  { %v595_v18 = vadd.f32 %v589_v15, %v1967_v33  ;;  %v1486_v33 = vld [vmem:[#allocation2 + $0x70] sm:$0xf] }
 0x479   :  { %v1487_v37 = vor.u32 %v1583_v34, %v1486_v33 }
 0x47a   :  { %v605_v23 = vmul.f32 0.1, %v595_v18  ;;  %vm603_vm1 = vcmp.gt.f32.partialorder %v595_v18, 0.0 }
 0x47b   :  { %v534_v55 = vpop.f32.mrf.mxu2 }
 0x47c   :  { %v607_v27 = vsel %vm603_vm1, %v595_v18, %v605_v23  ;;  %vm855_vm1 = vcmask 195584  }
 0x47d   :  { %v590_v19 = vpop.f32.mrf.mxu1 }
 0x47e   :  { %v591_v20 = vadd.f32 %v590_v19, %v555_v43  ;;  %v770_v43 = vld [vmem:[%s2390_s3 + $0x90] sm:$0xff] }
 0x480   :  { %v596_v62 = vadd.f32 %v591_v20, %v1969_v36  ;;  %v611_v36 = vld [vmem:[%s2390_s3 + $0x70] sm:$0xff] }
 0x482   :  { %v606_v25 = vmul.f32 0.1, %v596_v62  ;;  %vm604_vm6 = vcmp.gt.f32.partialorder %v596_v62, 0.0 }
 0x483   :  { %v536_v61 = vpop.f32.mrf.mxu2 }
 0x484   :  { %v608_v63 = vsel %vm604_vm6, %v596_v62, %v606_v25  ;;  %v537_v10 = vadd.f32 %v536_v61, %v501_v9 }
 0x485   :  { %v1693_v29 = vpack.i.bf16 %v608_v63, %v607_v27  ;;  %v640_v30 = vpack.c.bf16 %v608_v63, %v607_v27 }
 0x486   :  { %v542_v60 = vadd.f32 %v537_v10, %v2027_v22  ;;  %v722_v22 = vld [vmem:[%s2390_s3 + $0x80] sm:$0xff] }
 0x487   :  { %1694 = vrot.lane.b32.xlu2 %v1693_v29, %s1773_s28  ;;  %1684 = vrot.lane.b32.xlu0 %v1693_v29, %s1771_s2  ;;  %v523_v29 = vadd.f32 %v2086_v13, %v501_v9 }
 0x488   :  { %681 = vmatpush.bf16.msrb.mxu2 %v640_v30 }
 0x489   :  { %v540_v33 = vadd.f32 %v523_v29, %v2014_v8  ;;  %v745_v8 = vld [vmem:[#allocation2 + $0x90] sm:$0xf] }
 0x48c   :  { %1500 = vmatpush.bf16.msk.msrb.mxu2 %vm1872_vm0, %v1499_v35 }
 0x48f   :  { %1501 = vmatmul.msk.bf16.vlgmr.msrb.gmra.mxu2 %vm411_vm4, %v1487_v37  ;;  %645 = vperm.xlu2 %1627, %v611_v36  }
 0x490   :  { %495 = vperm.xlu0 %1625, %v461_v38  }
 0x498   :  { %650 = vperm.xlu0 %1625, %v612_v39  }
 0x4a0   :  { %803 = vperm.xlu0 %1625, %v800_v41  }
 0x4a8   :  { %773 = vperm.xlu0 %1625, %v770_v43  }
 0x4b0   :  { %852 = vperm.xlu0 %1625, %v835_v46  }
 0x4e1   :  { %v1695_v54 = vpop.permute.xlu2 %1694 }
 0x4e2   :  { %v1697_v56 = vunpack.i.h.bf16 %v1695_v54  ;;  %v1696_v57 = vunpack.i.l.bf16 %v1695_v54 }
 0x4e4   :  { %v1492_v59 = vpack.c.bf16 %v1697_v56, %v1696_v57  ;;  %v798_v57 = vld [vmem:[#allocation2 + $0xb0] sm:$0xf] }
 0x4e9   :  { %v646_v1 = vpop.permute.xlu2 %645 }
 0x4f9   :  { %v1685_v48 = vpop.permute.xlu0 %1684 }
 0x4fa   :  { %v1687_v50 = vunpack.i.h.bf16 %v1685_v48  ;;  %v1686_v52 = vunpack.i.l.bf16 %v1685_v48 }
 0x4fc   :  { %v1489_v24 = vpack.c.bf16 %v1687_v50, %v1686_v52  ;;  %v747_v50 = vld [vmem:[%s2390_s3 + $0x88] sm:$0xff]  ;;  %v719_v52 = vld [vmem:[#allocation2 + $0x80] sm:$0xf] }
 0x4fe   :  { %1490 = vmatpush.bf16.msk.msrb.mxu0 %vm1854_vm5, %v1489_v24 }
 0x502   :  { %667 = vmatpush.bf16.msrb.mxu0 %v639_v53  ;;  %v496_v0 = vpop.permute.xlu0 %495 }
 0x503   :  { %v535_v4 = vadd.f32 %v534_v55, %v496_v0  ;;  %v521_v25 = vadd.f32 %v2084_v47, %v496_v0 }
 0x505   :  { %v541_v7 = vadd.f32 %v535_v4, %v2023_v16  ;;  %v539_v63 = vadd.f32 %v521_v25, %v2010_v3 }
 0x506   :  { %1493 = vmatpush.bf16.msk.msrb.mxu0 %vm1899_vm9, %v1492_v59 }
 0x509   :  { %1494 = vmatmul.msk.bf16.vlgmr.msrb.gmra.mxu0 %vm411_vm4, %v1487_v37 }
 0x50a   :  { %v651_v51 = vpop.permute.xlu0 %650 }
 0x512   :  { %v684_v2 = vpop.f32.mrf.mxu2  ;;  %v804_v59 = vpop.permute.xlu0 %803 }
 0x513   :  { %v685_v5 = vadd.f32 %v684_v2, %v646_v1 }
 0x515   :  { %v691_v6 = vadd.f32 %v685_v5, %v595_v18 }
 0x517   :  { %v695_v44 = vadd.f32 %v691_v6, %v541_v7 }
 0x519   :  { %v699_v58 = vmul.f32 0.5, %v695_v44 }
 0x51a   :  { %v686_v21 = vpop.f32.mrf.mxu2 }
 0x51b   :  { %v687_v53 = vadd.f32 %v686_v21, %v651_v51  ;;  %v709_v15 = vmul.f32 0.1, %v699_v58  ;;  %vm707_vm9 = vcmp.gt.f32.partialorder %v699_v58, 0.0 }
 0x51d   :  { %v692_v11 = vadd.f32 %v687_v53, %v596_v62  ;;  %v711_v20 = vsel %vm707_vm9, %v699_v58, %v709_v15 }
 0x51f   :  { %v696_v12 = vadd.f32 %v692_v11, %v542_v60 }
 0x521   :  { %v700_v14 = vmul.f32 0.5, %v696_v12 }
 0x523   :  { %vm708_vm10 = vcmp.gt.f32.partialorder %v700_v14, 0.0  ;;  %v710_v19 = vmul.f32 0.1, %v700_v14 }
 0x525   :  { %v712_v18 = vsel %vm708_vm10, %v700_v14, %v710_v19 }
 0x526   :  { %v1698_v23 = vpack.i.bf16 %v712_v18, %v711_v20  ;;  %v746_v16 = vpack.c.bf16 %v712_v18, %v711_v20  ;;  %v834_v18 = vld [vmem:[#allocation2 + $0xc0] sm:$0xf] }
 0x528   :  { %1699 = vrot.lane.b32.xlu1 %v1698_v23, %s1772_s26  ;;  %762 = vmatpush.bf16.msrb.mxu1 %v746_v16 }
 0x529   :  { %785 = vmatpush.bf16.msra.mxu0 %v746_v16  ;;  %815 = vmatpush.bf16.msra.mxu2 %v746_v16 }
 0x530   :  { %725 = vperm.xlu1 %1626, %v722_v22  }
 0x586   :  { %v670_v62 = vpop.f32.mrf.mxu0 }
 0x587   :  { %v671_v26 = vadd.f32 %v670_v62, %v646_v1  ;;  %v774_v1 = vpop.permute.xlu0 %773 }
 0x589   :  { %v689_v27 = vadd.f32 %v671_v26, %v2043_v42 }
 0x58b   :  { %v693_v30 = vadd.f32 %v689_v27, %v539_v63 }
 0x58d   :  { %v697_v34 = vmul.f32 0.5, %v693_v30 }
 0x58e   :  { %v672_v31 = vpop.f32.mrf.mxu0 }
 0x58f   :  { %v673_v32 = vadd.f32 %v672_v31, %v651_v51  ;;  %v703_v38 = vmul.f32 0.1, %v697_v34  ;;  %vm701_vm4 = vcmp.gt.f32.partialorder %v697_v34, 0.0 }
 0x591   :  { %v690_v35 = vadd.f32 %v673_v32, %v2047_v49  ;;  %v705_v39 = vsel %vm701_vm4, %v697_v34, %v703_v38  ;;  %v769_v49 = vld [vmem:[#allocation2 + $0xa0] sm:$0xf] }
 0x593   :  { %v694_v37 = vadd.f32 %v690_v35, %v540_v33  ;;  %v853_v35 = vpop.permute.xlu0 %852 }
 0x595   :  { %v698_v36 = vmul.f32 0.5, %v694_v37 }
 0x597   :  { %vm702_vm7 = vcmp.gt.f32.partialorder %v698_v36, 0.0  ;;  %v704_v47 = vmul.f32 0.1, %v698_v36 }
 0x599   :  { %v706_v42 = vsel %vm702_vm7, %v698_v36, %v704_v47 }
 0x59a   :  { %v1700_v41 = vpop.permute.xlu1 %1699  ;;  %v1703_v3 = vpack.i.bf16 %v706_v42, %v705_v39  ;;  %v720_v43 = vpack.c.bf16 %v706_v42, %v705_v39 }
 0x59b   :  { %v1702_v13 = vunpack.i.h.bf16 %v1700_v41  ;;  %v1701_v46 = vunpack.i.l.bf16 %v1700_v41  ;;  %v1044_v41 = vld [vmem:[%s2390_s3 + $0xb0] sm:$0xff] }
 0x59c   :  { %1704 = vrot.lane.b32.xlu2 %v1703_v3, %s1771_s2  ;;  %763 = vmatpush.bf16.msrb.mxu1 %v720_v43 }
 0x59d   :  { %v1503_v48 = vpack.c.bf16 %v1702_v13, %v1701_v46  ;;  %786 = vmatpush.bf16.msra.mxu0 %v720_v43 }
 0x59f   :  { %1504 = vmatpush.bf16.msk.msrb.mxu3 %vm1872_vm0, %v1503_v48  ;;  %1506 = vmatmul.msk.bf16.vlgmr.msrb.gmra.mxu1 %vm728_vm11, %v745_v8 }
 0x5a0   :  { %1507 = vmatmul.msk.bf16.vlgmr.msra.gmra.mxu0 %vm728_vm11, %v769_v49 }
 0x5a2   :  { %v726_v11 = vpop.permute.xlu1 %725 }
 0x5a3   :  { %739 = vmatpush.bf16.msrb.mxu3 %v720_v43 }
 0x5a4   :  { %750 = vperm.xlu2 %1627, %v747_v50  }
 0x5a6   :  { %1505 = vmatmul.msk.bf16.vlgmr.msrb.gmra.mxu3 %vm728_vm11, %v719_v52 }
 0x5f6   :  { %v1705_v24 = vpop.permute.xlu2 %1704 }
 0x5f7   :  { %v1707_v54 = vunpack.i.h.bf16 %v1705_v24  ;;  %v1706_v55 = vunpack.i.l.bf16 %v1705_v24 }
 0x5f9   :  { %v1509_v56 = vpack.c.bf16 %v1707_v54, %v1706_v55 }
 0x5fb   :  { %1510 = vmatpush.bf16.msk.msra.mxu2 %vm1854_vm5, %v1509_v56 }
 0x5fe   :  { %1511 = vmatmul.msk.bf16.vlgmr.msra.gmra.mxu2 %vm728_vm11, %v798_v57  ;;  %v751_v61 = vpop.permute.xlu2 %750 }
 0x61c   :  { %v765_v0 = vpop.f32.mrf.mxu1 }
 0x61d   :  { %v2145_v2 = vadd.f32 %v765_v0, %v751_v61  ;;  %v788_v4 = vpop.f32.mrf.mxu0 }
 0x61e   :  { %v2147_v5 = vadd.f32 %v788_v4, %v774_v1 }
 0x61f   :  { %vm825_vm3 = vcmp.gt.f32.partialorder %v2145_v2, 0.0  ;;  %v826_v6 = vmul.f32 0.1, %v2145_v2 }
 0x620   :  { %vm828_vm14 = vcmp.gt.f32.partialorder %v2147_v5, 0.0  ;;  %v829_v7 = vmul.f32 0.1, %v2147_v5 }
 0x621   :  { %v827_v9 = vsel %vm825_vm3, %v2145_v2, %v826_v6 }
 0x622   :  { %v846_v10 = vpack.c.bf16 %v827_v9, %v827_v9  ;;  %v830_v44 = vsel %vm828_vm14, %v2147_v5, %v829_v7 }
 0x623   :  { %v847_v51 = vpack.c.bf16 %v830_v44, %v830_v44  ;;  %v2185_v32 = vpack.c.bf16 %v830_v44, %v827_v9 }
 0x624   :  { %v2156_v21 = vsel %vm207_vm12, %v846_v10, 0  ;;  %v767_v53 = vpop.f32.mrf.mxu1 }
 0x625   :  { %877 = vmatpush.bf16.msra.mxu3 %v2156_v21  ;;  %v2160_v60 = vsel %vm207_vm12, %v847_v51, 0  ;;  %v790_v58 = vpop.f32.mrf.mxu0 }
 0x626   :  { %890 = vmatpush.bf16.msra.mxu1 %v2160_v60 }
 0x629   :  { %v741_v12 = vpop.f32.mrf.mxu3 }
 0x62a   :  { %v2163_v14 = vadd.f32 %v741_v12, %v726_v11 }
 0x62c   :  { %vm822_vm15 = vcmp.gt.f32.partialorder %v2163_v14, 0.0  ;;  %v823_v15 = vmul.f32 0.1, %v2163_v14 }
 0x62e   :  { %v824_v19 = vsel %vm822_vm15, %v2163_v14, %v823_v15 }
 0x62f   :  { %839 = vrot.lane.b32.xlu2 %v824_v19, %s1771_s2  ;;  %v2169_v20 = vpack.c.bf16 %v827_v9, %v824_v19 }
 0x631   :  { %891 = vmatpush.bf16.msra.mxu1 %v2169_v20  ;;  %v743_v23 = vpop.f32.mrf.mxu3 }
 0x632   :  { %v1043_v23 = vld [vmem:[#allocation2 + $0xe0] sm:$0xf] }
 0x634   :  { %1516 = vmatmul.msk.bf16.vlgmr.msra.gmra.mxu1 %vm855_vm1, %v834_v18 }
 0x681   :  { %v818_v16 = vpop.f32.mrf.mxu2 }
 0x682   :  { %v2173_v22 = vadd.f32 %v818_v16, %v804_v59 }
 0x684   :  { %vm831_vm6 = vcmp.gt.f32.partialorder %v2173_v22, 0.0  ;;  %v832_v62 = vmul.f32 0.1, %v2173_v22 }
 0x686   :  { %v833_v25 = vsel %vm831_vm6, %v2173_v22, %v832_v62 }
 0x687   :  { %836 = vrot.lane.b32.xlu1 %v833_v25, %s1772_s26  ;;  %v848_v26 = vpack.c.bf16 %v833_v25, %v833_v25  ;;  %v2192_v34 = vpack.c.bf16 %v833_v25, %v830_v44 }
 0x689   :  { %v840_v27 = vpop.permute.xlu2 %839  ;;  %v2180_v63 = vsel %vm207_vm12, %v848_v26, 0  ;;  %v820_v29 = vpop.f32.mrf.mxu2 }
 0x68a   :  { %v841_v30 = vsel %vm114_vm2, %v840_v27, 0.0  ;;  %903 = vmatpush.bf16.msrb.mxu0 %v2180_v63 }
 0x68b   :  { %v849_v31 = vpack.c.bf16 %v841_v30, %v841_v30 }
 0x68d   :  { %v2188_v33 = vsel %vm207_vm12, %v849_v31, 0 }
 0x68e   :  { %916 = vmatpush.bf16.msrb.mxu2 %v2188_v33  ;;  %904 = vmatpush.bf16.msrb.mxu0 %v2185_v32 }
 0x691   :  { %1517 = vmatmul.msk.bf16.vlgmr.msrb.gmra.mxu0 %vm855_vm1, %v834_v18 }
 0x692   :  { %917 = vmatpush.bf16.msrb.mxu2 %v2192_v34 }
 0x695   :  { %1518 = vmatmul.msk.bf16.vlgmr.msrb.gmra.mxu2 %vm855_vm1, %v834_v18 }
 0x6b1   :  { %v893_v37 = vpop.f32.mrf.mxu1 }
 0x6b2   :  { %v894_v36 = vadd.f32 %v893_v37, %v853_v35 }
 0x6b4   :  { %v2198_v38 = vadd.f32 %v894_v36, %v2145_v2 }
 0x6b6   :  { %vm930_vm9 = vcmp.gt.f32.partialorder %v2198_v38, 0.0  ;;  %v931_v47 = vmul.f32 0.1, %v2198_v38 }
 0x6b8   :  { %v2203_v39 = vsel %vm930_vm9, %v2198_v38, %v931_v47 }
 0x6b9   :  { %953 = vrot.lane.b32.xlu2 %v2203_v39, %s1771_s2  ;;  %v895_v42 = vpop.f32.mrf.mxu1 }
 0x6c1   :  { %1047 = vperm.xlu2 %1627, %v1044_v41  }
 0x6f9   :  { %v837_v3 = vpop.permute.xlu1 %836 }
 0x6fa   :  { %v1513_v43 = vpack.c.bf16 %v824_v19, %v837_v3 }
 0x6fc   :  { %1514 = vmatpush.bf16.msk.msra.mxu3 %vm1868_vm13, %v1513_v43 }
 0x6ff   :  { %1515 = vmatmul.msk.bf16.vlgmr.msra.gmra.mxu3 %vm855_vm1, %v834_v18  ;;  %v939_v18 = vld [vmem:[#allocation2 + $0xd0] sm:$0xf] }
 0x70e   :  { %v906_v13 = vpop.f32.mrf.mxu0 }
 0x70f   :  { %v907_v46 = vadd.f32 %v906_v13, %v853_v35 }
 0x711   :  { %v2214_v8 = vadd.f32 %v907_v46, %v2147_v5 }
 0x713   :  { %v934_v48 = vmul.f32 0.1, %v2214_v8  ;;  %v954_v49 = vpop.permute.xlu2 %953  ;;  %vm933_vm10 = vcmp.gt.f32.partialorder %v2214_v8, 0.0 }
 0x714   :  { %v955_v50 = vsel %vm114_vm2, %v954_v49, 0.0 }
 0x715   :  { %v965_v52 = vpack.c.bf16 %v955_v50, %v955_v50  ;;  %v935_v24 = vsel %vm933_vm10, %v2214_v8, %v934_v48 }
 0x716   :  { %v1713_v54 = vpack.i.bf16 %v935_v24, %v2203_v39  ;;  %v908_v55 = vpop.f32.mrf.mxu0 }
 0x717   :  { %v982_v56 = vsel %vm207_vm12, %v965_v52, 0 }
 0x718   :  { %v919_v57 = vpop.f32.mrf.mxu2  ;;  %1019 = vmatpush.bf16.msra.mxu0 %v982_v56  ;;  %1714 = vrot.lane.b32.xlu0 %v1713_v54, %s1772_s26 }
 0x719   :  { %v920_v59 = vadd.f32 %v919_v57, %v853_v35 }
 0x71b   :  { %v2225_v61 = vadd.f32 %v920_v59, %v2173_v22 }
 0x71d   :  { %v937_v0 = vmul.f32 0.1, %v2225_v61  ;;  %vm936_vm4 = vcmp.gt.f32.partialorder %v2225_v61, 0.0 }
 0x71f   :  { %v938_v1 = vsel %vm936_vm4, %v2225_v61, %v937_v0  ;;  %vm1563_vm4 = vmpackc.low %vm114_vm2, %vm1778_vm8  ;;  %vm1361_vm8 = vcmask 1041408  }
 0x720   :  { %v963_v4 = vpack.c.bf16 %v938_v1, %v938_v1  ;;  %v921_v6 = vpop.f32.mrf.mxu2 }
 0x722   :  { %v976_v7 = vsel %vm207_vm12, %v963_v4, 0 }
 0x723   :  { %993 = vmatpush.bf16.msrb.mxu3 %v976_v7 }
 0x782   :  { %v880_v9 = vpop.f32.mrf.mxu3 }
 0x783   :  { %v881_v10 = vadd.f32 %v880_v9, %v853_v35 }
 0x785   :  { %v2232_v44 = vadd.f32 %v881_v10, %v2163_v14 }
 0x787   :  { %vm927_vm7 = vcmp.gt.f32.partialorder %v2232_v44, 0.0  ;;  %v928_v51 = vmul.f32 0.1, %v2232_v44 }
 0x789   :  { %v929_v53 = vsel %vm927_vm7, %v2232_v44, %v928_v51 }
 0x78a   :  { %v1715_v58 = vpop.permute.xlu0 %1714  ;;  %v1708_v11 = vpack.i.bf16 %v935_v24, %v929_v53  ;;  %v882_v12 = vpop.f32.mrf.mxu3  ;;  %v962_v42 = vpack.c.bf16 %v938_v1, %v929_v53 }
 0x78b   :  { %v1716_v15 = vunpack.i.l.bf16 %v1715_v58  ;;  %v1717_v30 = vunpack.i.h.bf16 %v1715_v58 }
 0x78c   :  { %1709 = vrot.lane.b32.xlu1 %v1708_v11, %s1771_s2 }
 0x78d   :  { %v1520_v19 = vpack.c.bf16 %v929_v53, %v1716_v15  ;;  %v1524_v36 = vpack.c.bf16 %v2203_v39, %v1717_v30 }
 0x78f   :  { %1521 = vmatpush.bf16.msk.msrb.mxu3 %vm1868_vm13, %v1520_v19 }
 0x792   :  { %1522 = vmatmul.msk.bf16.vlgmr.msrb.gmra.mxu3 %vm855_vm1, %v939_v18 }
 0x793   :  { %1059 = vmatpush.bf16.msra.mxu3 %v2156_v21 }
 0x794   :  { %950 = vrot.lane.b32.xlu1 %v938_v1, %s1772_s26 }
 0x797   :  { %1534 = vmatpush.bf16.msk.msra.mxu3 %vm1868_vm13, %v1513_v43  ;;  %v1122_v43 = vld [vmem:[%s2390_s3 + $0xb8] sm:$0xff] }
 0x7a2   :  { %1535 = vmatmul.msk.bf16.vlgmr.msra.gmra.mxu3 %vm855_vm1, %v1043_v23 }
 0x7fe   :  { %v1710_v16 = vpop.permute.xlu1 %1709 }
 0x7ff   :  { %v1712_v62 = vunpack.i.h.bf16 %v1710_v16  ;;  %v1711_v25 = vunpack.i.l.bf16 %v1710_v16 }
 0x801   :  { %v958_v26 = vsel %vm114_vm2, %v1712_v62, 0.0  ;;  %v949_v27 = vsel %vm114_vm2, %v1711_v25, 0.0 }
 0x802   :  { %v966_v21 = vpack.c.bf16 %v958_v26, %v958_v26  ;;  %v964_v29 = vpack.c.bf16 %v949_v27, %v949_v27 }
 0x804   :  { %v979_v31 = vsel %vm207_vm12, %v964_v29, 0  ;;  %v985_v35 = vsel %vm207_vm12, %v966_v21, 0 }
 0x805   :  { %1006 = vmatpush.bf16.msrb.mxu1 %v979_v31  ;;  %1032 = vmatpush.bf16.msra.mxu2 %v985_v35 }
 0x806   :  { %v951_v37 = vpop.permute.xlu1 %950 }
 0x807   :  { %v1528_v47 = vpack.c.bf16 %v935_v24, %v951_v37 }
 0x809   :  { %1525 = vmatpush.bf16.msk.msrb.mxu1 %vm1868_vm13, %v1524_v36  ;;  %1529 = vmatpush.bf16.msk.msra.mxu0 %vm1868_vm13, %v1528_v47 }
 0x80a   :  { %1033 = vmatpush.bf16.msra.mxu2 %v962_v42 }
 0x80c   :  { %1526 = vmatmul.msk.bf16.vlgmr.msrb.gmra.mxu1 %vm855_vm1, %v939_v18  ;;  %1530 = vmatmul.msk.bf16.vlgmr.msra.gmra.mxu0 %vm855_vm1, %v939_v18 }
 0x80d   :  { %1072 = vmatpush.bf16.msra.mxu1 %v2160_v60  ;;  %1085 = vmatpush.bf16.msrb.mxu0 %v2180_v63  ;;  %v1048_v63 = vpop.permute.xlu2 %1047 }
 0x80e   :  { %1098 = vmatpush.bf16.msrb.mxu2 %v2188_v33 }
 0x80f   :  { %1531 = vmatmul.msk.bf16.vlgmr.msra.gmra.mxu2 %vm855_vm1, %v939_v18 }
 0x811   :  { %1073 = vmatpush.bf16.msra.mxu1 %v2169_v20  ;;  %1086 = vmatpush.bf16.msrb.mxu0 %v2185_v32 }
 0x812   :  { %1099 = vmatpush.bf16.msrb.mxu2 %v2192_v34 }
 0x815   :  { %v2266_v39 = vpop.f32.mrf.mxu3 }
 0x81c   :  { %1536 = vmatmul.msk.bf16.vlgmr.msra.gmra.mxu1 %vm855_vm1, %v1043_v23  ;;  %1537 = vmatmul.msk.bf16.vlgmr.msrb.gmra.mxu0 %vm855_vm1, %v1043_v23 }
 0x81d   :  { %v998_v60 = vpop.f32.mrf.mxu3 }
 0x81f   :  { %1538 = vmatmul.msk.bf16.vlgmr.msrb.gmra.mxu2 %vm855_vm1, %v1043_v23 }
 0x825   :  { %v1062_v33 = vpop.f32.mrf.mxu3 }
 0x826   :  { %v1063_v41 = vadd.f32 %v1062_v33, %v1048_v63 }
 0x828   :  { %v2272_v3 = vadd.f32 %v1063_v41, %v2163_v14 }
 0x82a   :  { %vm1109_vm11 = vcmp.gt.f32.partialorder %v2272_v3, 0.0  ;;  %v1110_v20 = vmul.f32 0.1, %v2272_v3 }
 0x82c   :  { %v2277_v32 = vsel %vm1109_vm11, %v2272_v3, %v1110_v20  ;;  %v1121_v20 = vld [vmem:[#allocation2 + $0xf0] sm:$0xf] }
 0x82d   :  { %1129 = vrot.lane.b32.xlu2 %v2277_v32, %s1771_s2  ;;  %v1064_v34 = vpop.f32.mrf.mxu3 }
 0x835   :  { %1151 = vperm.xlu2 %1627, %v1122_v43  }
 0x887   :  { %v1130_v13 = vpop.permute.xlu2 %1129 }
 0x888   :  { %v1131_v14 = vsel %vm114_vm2, %v1130_v13, 0.0 }
 0x889   :  { %v1146_v46 = vpack.c.bf16 %v1131_v14, %v1131_v14  ;;  %v2286_v48 = vpop.f32.mrf.mxu1  ;;  %v2288_v49 = vpop.f32.mrf.mxu0 }
 0x88b   :  { %v1161_v50 = vsel %vm207_vm12, %v1146_v46, 0 }
 0x88c   :  { %1188 = vmatpush.bf16.msrb.mxu1 %v1161_v50 }
 0x88f   :  { %v1152_v43 = vpop.permute.xlu2 %1151 }
 0x891   :  { %v1011_v24 = vpop.f32.mrf.mxu1  ;;  %v1024_v54 = vpop.f32.mrf.mxu0 }
 0x892   :  { %v2291_v52 = vpop.f32.mrf.mxu2 }
 0x899   :  { %v1075_v56 = vpop.f32.mrf.mxu1  ;;  %v1088_v57 = vpop.f32.mrf.mxu0 }
 0x89a   :  { %v1037_v55 = vpop.f32.mrf.mxu2  ;;  %v1076_v59 = vadd.f32 %v1075_v56, %v1048_v63  ;;  %v1089_v0 = vadd.f32 %v1088_v57, %v1048_v63 }
 0x89c   :  { %v2294_v1 = vadd.f32 %v1076_v59, %v2145_v2  ;;  %v2297_v4 = vadd.f32 %v1089_v0, %v2147_v5 }
 0x89e   :  { %v1113_v6 = vmul.f32 0.1, %v2294_v1  ;;  %v1116_v7 = vmul.f32 0.1, %v2297_v4  ;;  %vm1112_vm3 = vcmp.gt.f32.partialorder %v2294_v1, 0.0  ;;  %vm1115_vm14 = vcmp.gt.f32.partialorder %v2297_v4, 0.0 }
 0x8a0   :  { %v1114_v10 = vsel %vm1112_vm3, %v2294_v1, %v1113_v6  ;;  %v1117_v51 = vsel %vm1115_vm14, %v2297_v4, %v1116_v7 }
 0x8a1   :  { %v1718_v58 = vpack.i.bf16 %v1117_v51, %v1114_v10  ;;  %v1077_v2 = vpop.f32.mrf.mxu1  ;;  %v1090_v11 = vpop.f32.mrf.mxu0 }
 0x8a2   :  { %v1101_v9 = vpop.f32.mrf.mxu2 }
 0x8a3   :  { %v1102_v53 = vadd.f32 %v1101_v9, %v1048_v63  ;;  %1719 = vrot.lane.b32.xlu0 %v1718_v58, %s1771_s2 }
 0x8a5   :  { %v2306_v5 = vadd.f32 %v1102_v53, %v2173_v22  ;;  %v940_v22 = vld [vmem:[%s2390_s3 + $0xa8] sm:$0xff] }
 0x8a7   :  { %v1119_v12 = vmul.f32 0.1, %v2306_v5  ;;  %vm1118_vm15 = vcmp.gt.f32.partialorder %v2306_v5, 0.0 }
 0x8a9   :  { %v1120_v15 = vsel %vm1118_vm15, %v2306_v5, %v1119_v12 }
 0x8aa   :  { %v1723_v19 = vpack.i.bf16 %v1120_v15, %v1114_v10  ;;  %v1145_v18 = vpack.c.bf16 %v1120_v15, %v1120_v15  ;;  %v1103_v23 = vpop.f32.mrf.mxu2  ;;  %v1144_v63 = vpack.c.bf16 %v1120_v15, %v2277_v32 }
 0x8ab   :  { %1126 = vrot.lane.b32.xlu0 %v1117_v51, %s1772_s26 }
 0x8ac   :  { %1724 = vrot.lane.b32.xlu1 %v1723_v19, %s1772_s26  ;;  %v1158_v16 = vsel %vm207_vm12, %v1145_v18, 0 }
 0x8ad   :  { %1175 = vmatpush.bf16.msrb.mxu3 %v1158_v16 }
 0x8b4   :  { %969 = vperm.xlu1 %1626, %v940_v22  }
 0x915   :  { %v1720_v62 = vpop.permute.xlu0 %1719 }
 0x916   :  { %v1722_v25 = vunpack.i.h.bf16 %v1720_v62  ;;  %v1721_v26 = vunpack.i.l.bf16 %v1720_v62 }
 0x918   :  { %v1140_v27 = vsel %vm114_vm2, %v1722_v25, 0.0  ;;  %v1137_v21 = vsel %vm114_vm2, %v1721_v26, 0.0 }
 0x919   :  { %v1148_v29 = vpack.c.bf16 %v1140_v27, %v1140_v27  ;;  %v1147_v30 = vpack.c.bf16 %v1137_v21, %v1137_v21 }
 0x91b   :  { %v1164_v31 = vsel %vm207_vm12, %v1147_v30, 0  ;;  %v1167_v35 = vsel %vm207_vm12, %v1148_v29, 0 }
 0x91c   :  { %1201 = vmatpush.bf16.msra.mxu0 %v1164_v31  ;;  %1214 = vmatpush.bf16.msra.mxu2 %v1167_v35 }
 0x91d   :  { %v1127_v42 = vpop.permute.xlu0 %1126 }
 0x91e   :  { %v1725_v37 = vpop.permute.xlu1 %1724  ;;  %v1544_v60 = vpack.c.bf16 %v1114_v10, %v1127_v42 }
 0x91f   :  { %v1727_v36 = vunpack.i.h.bf16 %v1725_v37  ;;  %v1726_v47 = vunpack.i.l.bf16 %v1725_v37 }
 0x920   :  { %1545 = vmatpush.bf16.msk.msrb.mxu1 %vm1868_vm13, %v1544_v60  ;;  %1215 = vmatpush.bf16.msra.mxu2 %v1144_v63 }
 0x921   :  { %v1548_v33 = vpack.c.bf16 %v1117_v51, %v1727_v36  ;;  %v1540_v41 = vpack.c.bf16 %v2277_v32, %v1726_v47 }
 0x923   :  { %1541 = vmatpush.bf16.msk.msrb.mxu3 %vm1868_vm13, %v1540_v41  ;;  %1549 = vmatpush.bf16.msk.msra.mxu0 %vm1868_vm13, %v1548_v33 }
 0x924   :  { %1546 = vmatmul.msk.bf16.vlgmr.msrb.gmra.mxu1 %vm855_vm1, %v1121_v20  ;;  %1551 = vmatmul.msk.bf16.vlgmr.msra.gmra.mxu2 %vm855_vm1, %v1121_v20 }
 0x926   :  { %1542 = vmatmul.msk.bf16.vlgmr.msrb.gmra.mxu3 %vm855_vm1, %v1121_v20  ;;  %1550 = vmatmul.msk.bf16.vlgmr.msra.gmra.mxu0 %vm855_vm1, %v1121_v20  ;;  %v970_v32 = vpop.permute.xlu1 %969 }
 0x927   :  { %v1010_v34 = vadd.f32 %v2286_v48, %v970_v32  ;;  %v1023_v13 = vadd.f32 %v2288_v49, %v970_v32  ;;  %v1036_v59 = vadd.f32 %v2291_v52, %v970_v32  ;;  %v997_v48 = vadd.f32 %v2266_v39, %v970_v32 }
 0x929   :  { %v1040_v54 = vadd.f32 %v1010_v34, %v2198_v38  ;;  %v1041_v56 = vadd.f32 %v1023_v13, %v2214_v8  ;;  %v1042_v38 = vadd.f32 %v1036_v59, %v2225_v61  ;;  %v1039_v52 = vadd.f32 %v997_v48, %v2232_v44  ;;  %v1246_v44 = vld [vmem:[%s2390_s3 + $0xc0] sm:$0x1] }
 0x9a1   :  { %v1191_v14 = vpop.f32.mrf.mxu1 }
 0x9a2   :  { %v1192_v46 = vadd.f32 %v1191_v14, %v1152_v43 }
 0x9a3   :  { %v1204_v50 = vpop.f32.mrf.mxu0 }
 0x9a4   :  { %v1205_v24 = vadd.f32 %v1204_v50, %v1152_v43  ;;  %v1222_v55 = vadd.f32 %v1192_v46, %v2294_v1 }
 0x9a6   :  { %v1223_v57 = vadd.f32 %v1205_v24, %v2297_v4  ;;  %v1226_v0 = vadd.f32 %v1222_v55, %v1040_v54 }
 0x9a7   :  { %v1217_v7 = vpop.f32.mrf.mxu2 }
 0x9a8   :  { %v1227_v6 = vadd.f32 %v1223_v57, %v1041_v56  ;;  %v1230_v49 = vmul.f32 0.5, %v1226_v0  ;;  %v1218_v10 = vadd.f32 %v1217_v7, %v1152_v43 }
 0x9a9   :  { %v1178_v9 = vpop.f32.mrf.mxu3  ;;  %v1193_v53 = vpop.f32.mrf.mxu1 }
 0x9aa   :  { %v1179_v51 = vadd.f32 %v1178_v9, %v1152_v43  ;;  %v1224_v1 = vadd.f32 %v1218_v10, %v2306_v5  ;;  %vm1236_vm1 = vcmp.gt.f32.partialorder %v1230_v49, 0.0  ;;  %v1237_v8 = vmul.f32 0.1, %v1230_v49 }
 0x9ab   :  { %v1206_v58 = vpop.f32.mrf.mxu0  ;;  %v1231_v4 = vmul.f32 0.5, %v1227_v6 }
 0x9ac   :  { %v1221_v2 = vadd.f32 %v1179_v51, %v2272_v3  ;;  %v1228_v39 = vadd.f32 %v1224_v1, %v1042_v38  ;;  %v2348_v11 = vsel %vm1236_vm1, %v1230_v49, %v1237_v8 }
 0x9ad   :  { %1259 = vrot.lane.b32.xlu1 %v2348_v11, %s1771_s2  ;;  %v1240_v19 = vmul.f32 0.1, %v1231_v4  ;;  %vm1239_vm6 = vcmp.gt.f32.partialorder %v1231_v4, 0.0 }
 0x9ae   :  { %v1225_v12 = vadd.f32 %v1221_v2, %v1039_v52  ;;  %v1232_v15 = vmul.f32 0.5, %v1228_v39 }
 0x9af   :  { %v1219_v18 = vpop.f32.mrf.mxu2  ;;  %v1241_v62 = vsel %vm1239_vm6, %v1231_v4, %v1240_v19 }
 0x9b0   :  { %v1229_v61 = vmul.f32 0.5, %v1225_v12  ;;  %vm1242_vm9 = vcmp.gt.f32.partialorder %v1232_v15, 0.0  ;;  %v1243_v5 = vmul.f32 0.1, %v1232_v15  ;;  %v1269_v29 = vpack.c.bf16 %v1241_v62, %v2348_v11 }
 0x9b1   :  { %v1180_v23 = vpop.f32.mrf.mxu3 }
 0x9b2   :  { %v1234_v16 = vmul.f32 0.1, %v1229_v61  ;;  %vm1233_vm10 = vcmp.gt.f32.partialorder %v1229_v61, 0.0  ;;  %v1244_v3 = vsel %vm1242_vm9, %v1232_v15, %v1243_v5 }
 0x9b3   :  { %v1733_v25 = vpack.i.bf16 %v2348_v11, %v1244_v3  ;;  %v1273_v26 = vpack.c.bf16 %v1244_v3, %v1244_v3  ;;  %v1270_v54 = vpack.c.bf16 %v1244_v3, %v1241_v62 }
 0x9b4   :  { %v1235_v22 = vsel %vm1233_vm10, %v1229_v61, %v1234_v16 }
 0x9b5   :  { %v1728_v27 = vpack.i.bf16 %v1235_v22, %v1241_v62  ;;  %1279 = vperm.xlu1 %1626, %v1246_v44   ;;  %1734 = vrot.lane.b32.xlu2 %v1733_v25, %s1772_s26  ;;  %v1287_v21 = vsel %vm207_vm12, %v1273_v26, 0  ;;  %v1268_v56 = vpack.c.bf16 %v2348_v11, %v1235_v22 }
 0x9b6   :  { %1302 = vmatpush.bf16.msra.mxu3 %v1287_v21 }
 0x9b7   :  { %1729 = vrot.lane.b32.xlu0 %v1728_v27, %s1771_s2 }
 0x9ba   :  { %1303 = vmatpush.bf16.msra.mxu3 %v1269_v29 }
 0x9bf   :  { %1250 = vrot.lane.b32.xlu0 %v1241_v62, %s1772_s26 }
 0xa0f   :  { %v1735_v30 = vpop.permute.xlu2 %1734 }
 0xa10   :  { %v1736_v31 = vunpack.i.l.bf16 %v1735_v30  ;;  %v1737_v46 = vunpack.i.h.bf16 %v1735_v30 }
 0xa12   :  { %v1553_v35 = vpack.c.bf16 %v1235_v22, %v1736_v31 }
 0xa14   :  { %1554 = vmatpush.bf16.msk.msra.mxu3 %vm1868_vm13, %v1553_v35 }
 0xa1f   :  { %v1260_v37 = vpop.permute.xlu1 %1259 }
 0xa20   :  { %v1261_v36 = vsel %vm114_vm2, %v1260_v37, 0.0 }
 0xa21   :  { %v1275_v47 = vpack.c.bf16 %v1261_v36, %v1261_v36 }
 0xa23   :  { %v1293_v42 = vsel %vm207_vm12, %v1275_v47, 0 }
 0xa24   :  { %1328 = vmatpush.bf16.msrb.mxu0 %v1293_v42 }
 0xa27   :  { %v1280_v28 = vpop.permute.xlu1 %1279 }
 0xa29   :  { %v1730_v60 = vpop.permute.xlu0 %1729 }
 0xa2a   :  { %v1732_v63 = vunpack.i.h.bf16 %v1730_v60  ;;  %v1731_v33 = vunpack.i.l.bf16 %v1730_v60 }
 0xa2c   :  { %v1264_v41 = vsel %vm114_vm2, %v1731_v33, 0.0  ;;  %v1564_v20 = vpack.c.bf16 %v1732_v63, %v1244_v3  ;;  %v1258_v32 = vsel %vm114_vm2, %v1732_v63, 0.0  ;;  %v1571_v55 = vpack.c.bf16 %v1260_v37, %v1732_v63 }
 0xa2d   :  { %v1276_v34 = vpack.c.bf16 %v1264_v41, %v1264_v41  ;;  %v1274_v43 = vpack.c.bf16 %v1258_v32, %v1258_v32  ;;  %vm1282_vm2 = vcmask 457728  }
 0xa2e   :  { %1565 = vmatpush.bf16.msk.msrb.mxu0 %vm1563_vm4, %v1564_v20 }
 0xa2f   :  { %v1290_v13 = vsel %vm207_vm12, %v1274_v43, 0  ;;  %v1296_v14 = vsel %vm207_vm12, %v1276_v34, 0  ;;  %vm1363_vm12 = vcmask 1042432  }
 0xa30   :  { %1315 = vmatpush.bf16.msra.mxu1 %v1290_v13  ;;  %1341 = vmatpush.bf16.msrb.mxu2 %v1296_v14 }
 0xa31   :  { %v1251_v50 = vpop.permute.xlu0 %1250 }
 0xa32   :  { %v1556_v24 = vpack.c.bf16 %v1251_v50, %v1737_v46  ;;  %1330 = vmatpush.bf16.msrb.mxu0 %v1269_v29  ;;  %v1560_v57 = vpack.c.bf16 %v1736_v31, %v1251_v50 }
 0xa34   :  { %1557 = vmatpush.bf16.msk.msra.mxu3 %vm1872_vm0, %v1556_v24  ;;  %1316 = vmatpush.bf16.msra.mxu1 %v1270_v54 }
 0xa35   :  { %1572 = vmatpush.bf16.msk.msrb.mxu2 %vm1854_vm5, %v1571_v55  ;;  %vm1359_vm5 = vcmask 1040384  }
 0xa36   :  { %1568 = vmatpush.bf16.msk.msrb.mxu0 %vm1868_vm13, %v1553_v35 }
 0xa37   :  { %1558 = vmatmul.msk.bf16.vlgmr.msra.gmra.mxu3 %vm1282_vm2, %v1245_v17 }
 0xa38   :  { %1317 = vmatpush.bf16.msra.mxu1 %v1268_v56 }
 0xa39   :  { %1343 = vmatpush.bf16.msrb.mxu2 %v1270_v54  ;;  %1569 = vmatmul.msk.bf16.vlgmr.msrb.gmra.mxu0 %vm1282_vm2, %v1245_v17 }
 0xa3c   :  { %1561 = vmatpush.bf16.msk.msra.mxu1 %vm1872_vm0, %v1560_v57 }
 0xa3d   :  { %1344 = vmatpush.bf16.msrb.mxu2 %v1268_v56 }
 0xa3f   :  { %1562 = vmatmul.msk.bf16.vlgmr.msra.gmra.mxu1 %vm1282_vm2, %v1245_v17 }
 0xa40   :  { %1573 = vmatmul.msk.bf16.vlgmr.msrb.gmra.mxu2 %vm1282_vm2, %v1245_v17 }
 0xab6   :  { %v1333_v59 = vpop.f32.mrf.mxu0 }
 0xab7   :  { %v1334_v49 = vadd.f32 %v1333_v59, %v1280_v28 }
 0xab9   :  { %v1354_v1 = vrot.slane %v1334_v49, 6 }
 0xaba   :  { %v1307_v0 = vpop.f32.mrf.mxu3 }
 0xabb   :  { %v1308_v9 = vadd.f32 %v1307_v0, %v1280_v28 }
 0xabc   :  { %v1320_v48 = vpop.f32.mrf.mxu1 }
 0xabd   :  { %v1321_v6 = vadd.f32 %v1320_v48, %v1280_v28 }
 0xabe   :  { %v1335_v40 = vpop.f32.mrf.mxu0 }
 0xabf   :  { %v1351_v7 = vrot.slane %v1321_v6, 7 }
 0xac1   :  { %v1360_v53 = vsel %vm1359_vm5, %v1308_v9, %v1351_v7 }
 0xac2   :  { %v1309_v10 = vpop.f32.mrf.mxu3  ;;  %v1362_v58 = vsel %vm1361_vm8, %v1360_v53, %v1354_v1 }
 0xac3   :  { %v1346_v51 = vpop.f32.mrf.mxu2 }
 0xac4   :  { %v1347_v38 = vadd.f32 %v1346_v51, %v1280_v28  ;;  %v1322_v45 = vpop.f32.mrf.mxu1 }
 0xac6   :  { %v1357_v8 = vrot.slane %v1347_v38, 5 }
 0xac8   :  { %v1364_v4 = vsel %vm1363_vm12, %v1362_v58, %v1357_v8 }
 0xac9   :  { %1740 = vtanh.f32 %v1364_v4 }
 0xacb   :  { %v1348_v52 = vpop.f32.mrf.mxu2 }
 0xacf   :  { %v1741_v2 = vpop.eup %1740 }
 0xad0   :  { %1366 = vst [vmem:[%s2391_s4] sm:$0xf] %v1741_v2 }
 0xad1   :  { %1371 = vsyncpa [#allocation3], 1 }

</bundles_post_ra>
